<compile_context>
chip_gen: v5e
topology: v5e:2x2
jax: 0.10.0
libtpu: 0.0.40
codegen_flags: <defaults>
</compile_context>

<pallas_src>
import math

import jax
import jax.numpy as jnp
from jax.experimental import pallas as pl
from jax.experimental.pallas import tpu as pltpu

# ---- Hyperparameters (small shapes consistent with the module) --------------
BATCH = 2
INPUT_DIM = 16          # sequence length (each scalar feature is a token)
D_MODEL = 32
NHEAD = 4
D_HID = 64
NLAYERS = 2
HEAD_DIM = D_MODEL // NHEAD
LN_EPS = 1e-5

BS = BATCH * INPUT_DIM          # fused batch*seq rows (32)

# ---- Weight slab layout: 2-D [W_ROWS, 64], everything at lane offset 0 -------
W_LANES = 64

# Globals section
MASK_R = 0                       # [BS, BS]  block-diagonal additive mask (0 / -1e9)
POOL_R = MASK_R + BS             # [8, BS]   mean-pool matrix (rows >= BATCH are zero)
WIN_R = POOL_R + 8               # [8, D]    row 0 = input_fc.weight[:,0], row 1 = input_fc.bias
WOUT_R = WIN_R + 8               # [D, 64]   output_fc.weight replicated across lanes
G_ROWS = WOUT_R + D_MODEL        # 80

# Per-layer section (row offsets within a layer block)
AQK_OFF = 0                            # NHEAD x [D, D]   scale * Wq_h @ Wk_h^T
VO_OFF = AQK_OFF + NHEAD * D_MODEL     # NHEAD x [D, D]   Wv_h @ Wout_h
FF1_OFF = VO_OFF + NHEAD * D_MODEL     # [D, DH]          linear1.weight^T
FF2_OFF = FF1_OFF + D_MODEL            # [DH, D]          linear2.weight^T
PL_ROWS = FF2_OFF + D_HID              # 352

W_ROWS = G_ROWS + NLAYERS * PL_ROWS    # 784

# ---- Vector slab layout: 2-D [V_ROWS, 64] ------------------------------------
V_LANES = 64
VPL_ROWS = 16
# per-layer rows: 0..3 folded q-bias (scale * bq_h @ Wk_h^T), 4 attn bias total,
#                 5 ff1_b, 6 ff2_b, 7 ln1_g, 8 ln1_b, 9 ln2_g, 10 ln2_b
VG_ROW = NLAYERS * VPL_ROWS            # globals: output_fc.bias replicated across lanes
V_ROWS = VG_ROW + 8                    # 40


# ---- Kernel ------------------------------------------------------------------
def transformer_kernel(src_ref, w_ref, v_ref, out_ref):
    # src_ref: [B*S, 8]   col 0 = token scalar, col 1 = 1.0 (folds input_fc bias), cols 2..7 zero
    # w_ref:   [W_ROWS, 64]   packed matrices (see layout above)
    # v_ref:   [V_ROWS, 64]   packed biases / LN params
    # out_ref: [8, 64]        row b, every lane = output for batch b (rows >= BATCH hold b_out only)
    D, DH = D_MODEL, D_HID
    f32 = jnp.float32

    # Constant columns so lane-direction reductions run on the MXU instead of the XLU.
    inv_d_col = jnp.full((D, 1), 1.0 / D, f32)
    ones_bs_col = jnp.ones((BS, 1), f32)

    def layer_norm(xv, gamma, beta):
        mean = jnp.dot(xv, inv_d_col, preferred_element_type=f32)          # [BS, 1] (MXU)
        cen = xv - mean
        var = jnp.dot(cen * cen, inv_d_col, preferred_element_type=f32)    # [BS, 1] (MXU)
        return cen * jax.lax.rsqrt(var + LN_EPS) * gamma + beta

    def gelu_exact(xv):
        # PyTorch activation='gelu' default is the exact (erf) GELU.
        return 0.5 * xv * (1.0 + jax.lax.erf(xv * (1.0 / math.sqrt(2.0))))

    # Precomputed globals (item 4: no iota/div/select in-kernel).
    mask = w_ref[MASK_R:MASK_R + BS, 0:BS]              # [BS, BS]
    pool8 = w_ref[POOL_R:POOL_R + 8, 0:BS]              # [8, BS]
    w_in8 = w_ref[WIN_R:WIN_R + 8, 0:D]                 # [8, D]
    wout_rep = w_ref[WOUT_R:WOUT_R + D, 0:W_LANES]      # [D, 64]
    b_out_row = v_ref[VG_ROW:VG_ROW + 1, 0:V_LANES]     # [1, 64]

    # input_fc for the whole fused batch (bias folded via the constant-1 column of src).
    x = jnp.dot(src_ref[...], w_in8, preferred_element_type=f32)           # [B*S, D]

    for l in range(NLAYERS):                 # static unroll (NLAYERS == 2)
        wb = G_ROWS + l * PL_ROWS
        vb = l * VPL_ROWS
        attn_b = v_ref[vb + 4:vb + 5, 0:D]
        ff1_b = v_ref[vb + 5:vb + 6, 0:DH]
        ff2_b = v_ref[vb + 6:vb + 7, 0:D]
        ln1_g = v_ref[vb + 7:vb + 8, 0:D]
        ln1_b = v_ref[vb + 8:vb + 9, 0:D]
        ln2_g = v_ref[vb + 9:vb + 10, 0:D]
        ln2_b = v_ref[vb + 10:vb + 11, 0:D]

        # --- Multi-head self-attention on the fused [B*S, .] slab (folded QK / VO) ---
        attn = None
        for h in range(NHEAD):               # static unroll (NHEAD == 4)
            aqk = w_ref[wb + AQK_OFF + h * D: wb + AQK_OFF + (h + 1) * D, 0:D]   # [D, D]
            vo = w_ref[wb + VO_OFF + h * D: wb + VO_OFF + (h + 1) * D, 0:D]      # [D, D]
            aqb = v_ref[vb + h:vb + h + 1, 0:D]                                  # [1, D]

            t = jnp.dot(x, aqk, preferred_element_type=f32) + aqb                # [BS, D]
            # sc[i,j] = t_i . x_j  (contraction on the lane axis of x; shared across heads).
            sc = jax.lax.dot_general(t, x, (((1,), (1,)), ((), ())),
                                     preferred_element_type=f32) + mask          # [BS, BS]
            sc = sc - jnp.max(sc, axis=-1, keepdims=True)
            p = jnp.exp(sc)
            den = jnp.dot(p, ones_bs_col, preferred_element_type=f32)            # [BS, 1] (MXU)
            xvo = jnp.dot(x, vo, preferred_element_type=f32)                     # [BS, D]
            part = jnp.dot(p, xvo, preferred_element_type=f32) * pl.reciprocal(den, approx=True)
            attn = part if attn is None else attn + part

        x = layer_norm(x + attn + attn_b, ln1_g, ln1_b)

        # --- Feed-forward (exact GELU) ---
        ff1_w = w_ref[wb + FF1_OFF: wb + FF1_OFF + D, 0:DH]                      # [D, DH]
        ff2_w = w_ref[wb + FF2_OFF: wb + FF2_OFF + DH, 0:D]                      # [DH, D]
        h1 = gelu_exact(jnp.dot(x, ff1_w, preferred_element_type=f32) + ff1_b)
        ff = jnp.dot(h1, ff2_w, preferred_element_type=f32) + ff2_b
        x = layer_norm(x + ff, ln2_g, ln2_b)

    # --- mean pool per batch element + output_fc, emitted as one full-tile store ---
    pooled8 = jnp.dot(pool8, x, preferred_element_type=f32)                      # [8, D]
    out_ref[...] = (jnp.dot(pooled8, wout_rep, preferred_element_type=f32)       # [8, 64]
                    + b_out_row)


# ---- Wrapper -----------------------------------------------------------------
def transformer_forward(src, w_slab, v_slab):
    B, S = src.shape
    assert B == BATCH and S == INPUT_DIM
    # Fused-batch token column + a constant-1 column (folds input_fc bias), padded to 8 lanes.
    vals = src.reshape(B * S, 1).astype(jnp.float32)
    ones = jnp.ones((B * S, 1), jnp.float32)
    src8 = jnp.concatenate([vals, ones, jnp.zeros((B * S, 6), jnp.float32)], axis=-1)

    vmem = pl.BlockSpec(memory_space=pltpu.MemorySpace.VMEM)
    out = pl.pallas_call(
        transformer_kernel,
        out_shape=jax.ShapeDtypeStruct((8, W_LANES), jnp.float32),
        in_specs=[vmem, vmem, vmem],
        out_specs=vmem,
    )(src8, w_slab, v_slab)
    return out[:BATCH, 0:1]                              # [B, 1]


# ---- Deterministic parameter init (synthetic; mirrors the module's shapes) ---
def init_params(key):
    D, DH, L = D_MODEL, D_HID, NLAYERS
    u = lambda k, shape, s=0.1: jax.random.uniform(
        k, shape, jnp.float32, minval=-s, maxval=s)

    k_in, k_out, k = jax.random.split(key, 3)
    params = {
        "w_in": u(k_in, (D,)),                    # input_fc.weight[:, 0] ~ U(-0.1, 0.1)
        "b_in": jnp.zeros((D,), jnp.float32),     # input_fc.bias = 0
        "w_out": u(k_out, (D,)),                  # output_fc.weight[0, :]
        "b_out": jnp.zeros((), jnp.float32),      # output_fc.bias = 0
        "layers": [],
    }
    for _ in range(L):
        k, k0, k1, k2, k3, k4, k5, k6, k7 = jax.random.split(k, 9)
        params["layers"].append({
            "qkv_wt": u(k0, (3 * D, D)).T,        # in_proj_weight^T   [D, 3D]
            "qkv_b": u(k1, (3 * D,)),
            "attn_wt": u(k2, (D, D)).T,           # out_proj.weight^T  [D, D]
            "attn_b": u(k3, (D,)),
            "ff1_wt": u(k4, (DH, D)).T,           # linear1.weight^T   [D, DH]
            "ff1_b": u(k5, (DH,)),
            "ff2_wt": u(k6, (D, DH)).T,           # linear2.weight^T   [DH, D]
            "ff2_b": u(k7, (D,)),
            "ln1_w": jnp.ones((D,), jnp.float32),
            "ln1_b": jnp.zeros((D,), jnp.float32),
            "ln2_w": jnp.ones((D,), jnp.float32),
            "ln2_b": jnp.zeros((D,), jnp.float32),
        })
    return params


def pack_params(p):
    """Fold + pack all parameters into two lane-aligned slabs (weights + vectors)."""
    D, DH, HD = D_MODEL, D_HID, HEAD_DIM
    scale = 1.0 / math.sqrt(HD)
    w = jnp.zeros((W_ROWS, W_LANES), jnp.float32)
    v = jnp.zeros((V_ROWS, V_LANES), jnp.float32)

    # ---- Globals: mask, pool matrix, input_fc, output_fc ----
    rb = jnp.arange(BS)[:, None] // INPUT_DIM
    cb = jnp.arange(BS)[None, :] // INPUT_DIM
    mask = jnp.where(rb == cb, 0.0, -1e9).astype(jnp.float32)                 # [BS, BS]
    w = w.at[MASK_R:MASK_R + BS, 0:BS].set(mask)

    b_idx = jnp.arange(8)[:, None]
    r_idx = jnp.arange(BS)[None, :] // INPUT_DIM
    pool = jnp.where((b_idx == r_idx) & (b_idx < BATCH),
                     1.0 / INPUT_DIM, 0.0).astype(jnp.float32)                # [8, BS]
    w = w.at[POOL_R:POOL_R + 8, 0:BS].set(pool)

    w = w.at[WIN_R, 0:D].set(p["w_in"])
    w = w.at[WIN_R + 1, 0:D].set(p["b_in"])
    w = w.at[WOUT_R:WOUT_R + D, 0:W_LANES].set(
        jnp.broadcast_to(p["w_out"][:, None], (D, W_LANES)))
    v = v.at[VG_ROW, 0:V_LANES].set(jnp.broadcast_to(p["b_out"], (V_LANES,)))

    # ---- Per-layer folded matrices / biases ----
    for l, lp in enumerate(p["layers"]):
        wb = G_ROWS + l * PL_ROWS
        vb = l * VPL_ROWS
        qkv_wt, qkv_b, attn_wt = lp["qkv_wt"], lp["qkv_b"], lp["attn_wt"]
        for h in range(NHEAD):
            WqT = qkv_wt[:, h * HD:(h + 1) * HD]                  # [D, HD]
            WkT = qkv_wt[:, D + h * HD:D + (h + 1) * HD]
            WvT = qkv_wt[:, 2 * D + h * HD:2 * D + (h + 1) * HD]
            bq = qkv_b[h * HD:(h + 1) * HD]
            WoutT_h = attn_wt[h * HD:(h + 1) * HD, :]             # [HD, D]
            aqk = scale * (WqT @ WkT.T)                           # [D, D]
            aqb = scale * (bq @ WkT.T)                            # [D]
            vo = WvT @ WoutT_h                                    # [D, D]
            w = w.at[wb + AQK_OFF + h * D: wb + AQK_OFF + (h + 1) * D, 0:D].set(aqk)
            w = w.at[wb + VO_OFF + h * D: wb + VO_OFF + (h + 1) * D, 0:D].set(vo)
            v = v.at[vb + h, 0:D].set(aqb)
        # v-bias folded through out-proj + out-proj bias (softmax rows sum to 1).
        attn_bias_total = qkv_b[2 * D:3 * D] @ attn_wt + lp["attn_b"]
        v = v.at[vb + 4, 0:D].set(attn_bias_total)

        w = w.at[wb + FF1_OFF: wb + FF1_OFF + D, 0:DH].set(lp["ff1_wt"])
        w = w.at[wb + FF2_OFF: wb + FF2_OFF + DH, 0:D].set(lp["ff2_wt"])
        v = v.at[vb + 5, 0:DH].set(lp["ff1_b"])
        v = v.at[vb + 6, 0:D].set(lp["ff2_b"])
        v = v.at[vb + 7, 0:D].set(lp["ln1_w"])
        v = v.at[vb + 8, 0:D].set(lp["ln1_b"])
        v = v.at[vb + 9, 0:D].set(lp["ln2_w"])
        v = v.at[vb + 10, 0:D].set(lp["ln2_b"])
    return w, v


if __name__ == "__main__":
    key = jax.random.PRNGKey(0)
    pkey, xkey = jax.random.split(key)
    params = init_params(pkey)
    w_slab, v_slab = pack_params(params)
    src = jax.random.normal(xkey, (BATCH, INPUT_DIM), jnp.float32)

    out = transformer_forward(src, w_slab, v_slab)
    out = jax.block_until_ready(out)

    assert out.shape == (BATCH, 1)
    assert bool(jnp.all(jnp.isfinite(out)))
    print("KERNEL_OK")
</pallas_src>

<mosaic_0001>
module attributes {stable_mosaic.version = 11 : i64} {
  func.func @transformer_kernel(%arg0: memref<32x8xf32, #tpu.memory_space<vmem>>, %arg1: memref<784x64xf32, #tpu.memory_space<vmem>>, %arg2: memref<40x64xf32, #tpu.memory_space<vmem>>, %arg3: memref<8x64xf32, #tpu.memory_space<vmem>>) attributes {dimension_semantics = [], scalar_prefetch = 0 : i64, scratch_operands = 0 : i64, tpu.core_type = #tpu.core_type<tc>} {
    %cst = arith.constant 3.125000e-02 : f32
    %0 = vector.broadcast %cst : f32 to vector<32x1xf32>
    %cst_0 = arith.constant 1.000000e+00 : f32
    %1 = vector.broadcast %cst_0 : f32 to vector<32x1xf32>
    %c0 = arith.constant 0 : index
    %c0_1 = arith.constant 0 : index
    %2 = vector.load %arg1[%c0, %c0_1] : memref<784x64xf32, #tpu.memory_space<vmem>>, vector<32x32xf32>
    %c32 = arith.constant 32 : index
    %c0_2 = arith.constant 0 : index
    %3 = vector.load %arg1[%c32, %c0_2] : memref<784x64xf32, #tpu.memory_space<vmem>>, vector<8x32xf32>
    %c40 = arith.constant 40 : index
    %c0_3 = arith.constant 0 : index
    %4 = vector.load %arg1[%c40, %c0_3] : memref<784x64xf32, #tpu.memory_space<vmem>>, vector<8x32xf32>
    %c48 = arith.constant 48 : index
    %c0_4 = arith.constant 0 : index
    %5 = vector.load %arg1[%c48, %c0_4] : memref<784x64xf32, #tpu.memory_space<vmem>>, vector<32x64xf32>
    %c32_5 = arith.constant 32 : index
    %c0_6 = arith.constant 0 : index
    %6 = vector.load %arg2[%c32_5, %c0_6] : memref<40x64xf32, #tpu.memory_space<vmem>>, vector<1x64xf32>
    %c0_7 = arith.constant 0 : index
    %c0_8 = arith.constant 0 : index
    %7 = vector.load %arg0[%c0_7, %c0_8] : memref<32x8xf32, #tpu.memory_space<vmem>>, vector<32x8xf32>
    %cst_9 = arith.constant dense<0.000000e+00> : vector<32x32xf32>
    %8 = tpu.matmul %7, %4, %cst_9 {dimension_numbers = #tpu.dot_dimension_numbers<[1], [0], [0], [1], [0, 0, 1, 1], [], []>} : vector<32x8xf32>, vector<8x32xf32>, vector<32x32xf32> -> vector<32x32xf32>
    %c4 = arith.constant 4 : index
    %c0_10 = arith.constant 0 : index
    %9 = vector.load %arg2[%c4, %c0_10] : memref<40x64xf32, #tpu.memory_space<vmem>>, vector<1x32xf32>
    %c5 = arith.constant 5 : index
    %c0_11 = arith.constant 0 : index
    %10 = vector.load %arg2[%c5, %c0_11] : memref<40x64xf32, #tpu.memory_space<vmem>>, vector<1x64xf32>
    %c6 = arith.constant 6 : index
    %c0_12 = arith.constant 0 : index
    %11 = vector.load %arg2[%c6, %c0_12] : memref<40x64xf32, #tpu.memory_space<vmem>>, vector<1x32xf32>
    %c7 = arith.constant 7 : index
    %c0_13 = arith.constant 0 : index
    %12 = vector.load %arg2[%c7, %c0_13] : memref<40x64xf32, #tpu.memory_space<vmem>>, vector<1x32xf32>
    %c8 = arith.constant 8 : index
    %c0_14 = arith.constant 0 : index
    %13 = vector.load %arg2[%c8, %c0_14] : memref<40x64xf32, #tpu.memory_space<vmem>>, vector<1x32xf32>
    %c9 = arith.constant 9 : index
    %c0_15 = arith.constant 0 : index
    %14 = vector.load %arg2[%c9, %c0_15] : memref<40x64xf32, #tpu.memory_space<vmem>>, vector<1x32xf32>
    %c10 = arith.constant 10 : index
    %c0_16 = arith.constant 0 : index
    %15 = vector.load %arg2[%c10, %c0_16] : memref<40x64xf32, #tpu.memory_space<vmem>>, vector<1x32xf32>
    %c80 = arith.constant 80 : index
    %c0_17 = arith.constant 0 : index
    %16 = vector.load %arg1[%c80, %c0_17] : memref<784x64xf32, #tpu.memory_space<vmem>>, vector<32x32xf32>
    %c208 = arith.constant 208 : index
    %c0_18 = arith.constant 0 : index
    %17 = vector.load %arg1[%c208, %c0_18] : memref<784x64xf32, #tpu.memory_space<vmem>>, vector<32x32xf32>
    %c0_19 = arith.constant 0 : index
    %c0_20 = arith.constant 0 : index
    %18 = vector.load %arg2[%c0_19, %c0_20] : memref<40x64xf32, #tpu.memory_space<vmem>>, vector<1x32xf32>
    %cst_21 = arith.constant dense<0.000000e+00> : vector<32x32xf32>
    %19 = tpu.matmul %8, %16, %cst_21 {dimension_numbers = #tpu.dot_dimension_numbers<[1], [0], [0], [1], [0, 0, 1, 1], [], []>} : vector<32x32xf32>, vector<32x32xf32>, vector<32x32xf32> -> vector<32x32xf32>
    %20 = vector.broadcast %18 : vector<1x32xf32> to vector<32x32xf32>
    %21 = arith.addf %19, %20 : vector<32x32xf32>
    %cst_22 = arith.constant dense<0.000000e+00> : vector<32x32xf32>
    %22 = tpu.matmul %21, %8, %cst_22 {dimension_numbers = #tpu.dot_dimension_numbers<[1], [1], [0], [0], [0, 0, 1, 0], [], []>} : vector<32x32xf32>, vector<32x32xf32>, vector<32x32xf32> -> vector<32x32xf32>
    %23 = arith.addf %22, %2 : vector<32x32xf32>
    %cst_23 = arith.constant dense<0xFF800000> : vector<32xf32>
    %24 = vector.multi_reduction <maximumf>, %23, %cst_23 [1] : vector<32x32xf32> to vector<32xf32>
    %25 = vector.shape_cast %24 : vector<32xf32> to vector<32x1xf32>
    %26 = vector.broadcast %25 : vector<32x1xf32> to vector<32x32xf32>
    %27 = arith.subf %23, %26 : vector<32x32xf32>
    %28 = math.exp %27 : vector<32x32xf32>
    %cst_24 = arith.constant dense<0.000000e+00> : vector<32x1xf32>
    %29 = tpu.matmul %28, %1, %cst_24 {dimension_numbers = #tpu.dot_dimension_numbers<[1], [0], [0], [1], [0, 0, 1, 1], [], []>} : vector<32x32xf32>, vector<32x1xf32>, vector<32x1xf32> -> vector<32x1xf32>
    %cst_25 = arith.constant dense<0.000000e+00> : vector<32x32xf32>
    %30 = tpu.matmul %8, %17, %cst_25 {dimension_numbers = #tpu.dot_dimension_numbers<[1], [0], [0], [1], [0, 0, 1, 1], [], []>} : vector<32x32xf32>, vector<32x32xf32>, vector<32x32xf32> -> vector<32x32xf32>
    %cst_26 = arith.constant dense<0.000000e+00> : vector<32x32xf32>
    %31 = tpu.matmul %28, %30, %cst_26 {dimension_numbers = #tpu.dot_dimension_numbers<[1], [0], [0], [1], [0, 0, 1, 1], [], []>} : vector<32x32xf32>, vector<32x32xf32>, vector<32x32xf32> -> vector<32x32xf32>
    %32 = tpu.reciprocal %29 {approx = true} : vector<32x1xf32> -> vector<32x1xf32>
    %33 = vector.broadcast %32 : vector<32x1xf32> to vector<32x32xf32>
    %34 = arith.mulf %31, %33 : vector<32x32xf32>
    %c112 = arith.constant 112 : index
    %c0_27 = arith.constant 0 : index
    %35 = vector.load %arg1[%c112, %c0_27] : memref<784x64xf32, #tpu.memory_space<vmem>>, vector<32x32xf32>
    %c240 = arith.constant 240 : index
    %c0_28 = arith.constant 0 : index
    %36 = vector.load %arg1[%c240, %c0_28] : memref<784x64xf32, #tpu.memory_space<vmem>>, vector<32x32xf32>
    %c1 = arith.constant 1 : index
    %c0_29 = arith.constant 0 : index
    %37 = vector.load %arg2[%c1, %c0_29] : memref<40x64xf32, #tpu.memory_space<vmem>>, vector<1x32xf32>
    %cst_30 = arith.constant dense<0.000000e+00> : vector<32x32xf32>
    %38 = tpu.matmul %8, %35, %cst_30 {dimension_numbers = #tpu.dot_dimension_numbers<[1], [0], [0], [1], [0, 0, 1, 1], [], []>} : vector<32x32xf32>, vector<32x32xf32>, vector<32x32xf32> -> vector<32x32xf32>
    %39 = vector.broadcast %37 : vector<1x32xf32> to vector<32x32xf32>
    %40 = arith.addf %38, %39 : vector<32x32xf32>
    %cst_31 = arith.constant dense<0.000000e+00> : vector<32x32xf32>
    %41 = tpu.matmul %40, %8, %cst_31 {dimension_numbers = #tpu.dot_dimension_numbers<[1], [1], [0], [0], [0, 0, 1, 0], [], []>} : vector<32x32xf32>, vector<32x32xf32>, vector<32x32xf32> -> vector<32x32xf32>
    %42 = arith.addf %41, %2 : vector<32x32xf32>
    %cst_32 = arith.constant dense<0xFF800000> : vector<32xf32>
    %43 = vector.multi_reduction <maximumf>, %42, %cst_32 [1] : vector<32x32xf32> to vector<32xf32>
    %44 = vector.shape_cast %43 : vector<32xf32> to vector<32x1xf32>
    %45 = vector.broadcast %44 : vector<32x1xf32> to vector<32x32xf32>
    %46 = arith.subf %42, %45 : vector<32x32xf32>
    %47 = math.exp %46 : vector<32x32xf32>
    %cst_33 = arith.constant dense<0.000000e+00> : vector<32x1xf32>
    %48 = tpu.matmul %47, %1, %cst_33 {dimension_numbers = #tpu.dot_dimension_numbers<[1], [0], [0], [1], [0, 0, 1, 1], [], []>} : vector<32x32xf32>, vector<32x1xf32>, vector<32x1xf32> -> vector<32x1xf32>
    %cst_34 = arith.constant dense<0.000000e+00> : vector<32x32xf32>
    %49 = tpu.matmul %8, %36, %cst_34 {dimension_numbers = #tpu.dot_dimension_numbers<[1], [0], [0], [1], [0, 0, 1, 1], [], []>} : vector<32x32xf32>, vector<32x32xf32>, vector<32x32xf32> -> vector<32x32xf32>
    %cst_35 = arith.constant dense<0.000000e+00> : vector<32x32xf32>
    %50 = tpu.matmul %47, %49, %cst_35 {dimension_numbers = #tpu.dot_dimension_numbers<[1], [0], [0], [1], [0, 0, 1, 1], [], []>} : vector<32x32xf32>, vector<32x32xf32>, vector<32x32xf32> -> vector<32x32xf32>
    %51 = tpu.reciprocal %48 {approx = true} : vector<32x1xf32> -> vector<32x1xf32>
    %52 = vector.broadcast %51 : vector<32x1xf32> to vector<32x32xf32>
    %53 = arith.mulf %50, %52 : vector<32x32xf32>
    %54 = arith.addf %34, %53 : vector<32x32xf32>
    %c144 = arith.constant 144 : index
    %c0_36 = arith.constant 0 : index
    %55 = vector.load %arg1[%c144, %c0_36] : memref<784x64xf32, #tpu.memory_space<vmem>>, vector<32x32xf32>
    %c272 = arith.constant 272 : index
    %c0_37 = arith.constant 0 : index
    %56 = vector.load %arg1[%c272, %c0_37] : memref<784x64xf32, #tpu.memory_space<vmem>>, vector<32x32xf32>
    %c2 = arith.constant 2 : index
    %c0_38 = arith.constant 0 : index
    %57 = vector.load %arg2[%c2, %c0_38] : memref<40x64xf32, #tpu.memory_space<vmem>>, vector<1x32xf32>
    %cst_39 = arith.constant dense<0.000000e+00> : vector<32x32xf32>
    %58 = tpu.matmul %8, %55, %cst_39 {dimension_numbers = #tpu.dot_dimension_numbers<[1], [0], [0], [1], [0, 0, 1, 1], [], []>} : vector<32x32xf32>, vector<32x32xf32>, vector<32x32xf32> -> vector<32x32xf32>
    %59 = vector.broadcast %57 : vector<1x32xf32> to vector<32x32xf32>
    %60 = arith.addf %58, %59 : vector<32x32xf32>
    %cst_40 = arith.constant dense<0.000000e+00> : vector<32x32xf32>
    %61 = tpu.matmul %60, %8, %cst_40 {dimension_numbers = #tpu.dot_dimension_numbers<[1], [1], [0], [0], [0, 0, 1, 0], [], []>} : vector<32x32xf32>, vector<32x32xf32>, vector<32x32xf32> -> vector<32x32xf32>
    %62 = arith.addf %61, %2 : vector<32x32xf32>
    %cst_41 = arith.constant dense<0xFF800000> : vector<32xf32>
    %63 = vector.multi_reduction <maximumf>, %62, %cst_41 [1] : vector<32x32xf32> to vector<32xf32>
    %64 = vector.shape_cast %63 : vector<32xf32> to vector<32x1xf32>
    %65 = vector.broadcast %64 : vector<32x1xf32> to vector<32x32xf32>
    %66 = arith.subf %62, %65 : vector<32x32xf32>
    %67 = math.exp %66 : vector<32x32xf32>
    %cst_42 = arith.constant dense<0.000000e+00> : vector<32x1xf32>
    %68 = tpu.matmul %67, %1, %cst_42 {dimension_numbers = #tpu.dot_dimension_numbers<[1], [0], [0], [1], [0, 0, 1, 1], [], []>} : vector<32x32xf32>, vector<32x1xf32>, vector<32x1xf32> -> vector<32x1xf32>
    %cst_43 = arith.constant dense<0.000000e+00> : vector<32x32xf32>
    %69 = tpu.matmul %8, %56, %cst_43 {dimension_numbers = #tpu.dot_dimension_numbers<[1], [0], [0], [1], [0, 0, 1, 1], [], []>} : vector<32x32xf32>, vector<32x32xf32>, vector<32x32xf32> -> vector<32x32xf32>
    %cst_44 = arith.constant dense<0.000000e+00> : vector<32x32xf32>
    %70 = tpu.matmul %67, %69, %cst_44 {dimension_numbers = #tpu.dot_dimension_numbers<[1], [0], [0], [1], [0, 0, 1, 1], [], []>} : vector<32x32xf32>, vector<32x32xf32>, vector<32x32xf32> -> vector<32x32xf32>
    %71 = tpu.reciprocal %68 {approx = true} : vector<32x1xf32> -> vector<32x1xf32>
    %72 = vector.broadcast %71 : vector<32x1xf32> to vector<32x32xf32>
    %73 = arith.mulf %70, %72 : vector<32x32xf32>
    %74 = arith.addf %54, %73 : vector<32x32xf32>
    %c176 = arith.constant 176 : index
    %c0_45 = arith.constant 0 : index
    %75 = vector.load %arg1[%c176, %c0_45] : memref<784x64xf32, #tpu.memory_space<vmem>>, vector<32x32xf32>
    %c304 = arith.constant 304 : index
    %c0_46 = arith.constant 0 : index
    %76 = vector.load %arg1[%c304, %c0_46] : memref<784x64xf32, #tpu.memory_space<vmem>>, vector<32x32xf32>
    %c3 = arith.constant 3 : index
    %c0_47 = arith.constant 0 : index
    %77 = vector.load %arg2[%c3, %c0_47] : memref<40x64xf32, #tpu.memory_space<vmem>>, vector<1x32xf32>
    %cst_48 = arith.constant dense<0.000000e+00> : vector<32x32xf32>
    %78 = tpu.matmul %8, %75, %cst_48 {dimension_numbers = #tpu.dot_dimension_numbers<[1], [0], [0], [1], [0, 0, 1, 1], [], []>} : vector<32x32xf32>, vector<32x32xf32>, vector<32x32xf32> -> vector<32x32xf32>
    %79 = vector.broadcast %77 : vector<1x32xf32> to vector<32x32xf32>
    %80 = arith.addf %78, %79 : vector<32x32xf32>
    %cst_49 = arith.constant dense<0.000000e+00> : vector<32x32xf32>
    %81 = tpu.matmul %80, %8, %cst_49 {dimension_numbers = #tpu.dot_dimension_numbers<[1], [1], [0], [0], [0, 0, 1, 0], [], []>} : vector<32x32xf32>, vector<32x32xf32>, vector<32x32xf32> -> vector<32x32xf32>
    %82 = arith.addf %81, %2 : vector<32x32xf32>
    %cst_50 = arith.constant dense<0xFF800000> : vector<32xf32>
    %83 = vector.multi_reduction <maximumf>, %82, %cst_50 [1] : vector<32x32xf32> to vector<32xf32>
    %84 = vector.shape_cast %83 : vector<32xf32> to vector<32x1xf32>
    %85 = vector.broadcast %84 : vector<32x1xf32> to vector<32x32xf32>
    %86 = arith.subf %82, %85 : vector<32x32xf32>
    %87 = math.exp %86 : vector<32x32xf32>
    %cst_51 = arith.constant dense<0.000000e+00> : vector<32x1xf32>
    %88 = tpu.matmul %87, %1, %cst_51 {dimension_numbers = #tpu.dot_dimension_numbers<[1], [0], [0], [1], [0, 0, 1, 1], [], []>} : vector<32x32xf32>, vector<32x1xf32>, vector<32x1xf32> -> vector<32x1xf32>
    %cst_52 = arith.constant dense<0.000000e+00> : vector<32x32xf32>
    %89 = tpu.matmul %8, %76, %cst_52 {dimension_numbers = #tpu.dot_dimension_numbers<[1], [0], [0], [1], [0, 0, 1, 1], [], []>} : vector<32x32xf32>, vector<32x32xf32>, vector<32x32xf32> -> vector<32x32xf32>
    %cst_53 = arith.constant dense<0.000000e+00> : vector<32x32xf32>
    %90 = tpu.matmul %87, %89, %cst_53 {dimension_numbers = #tpu.dot_dimension_numbers<[1], [0], [0], [1], [0, 0, 1, 1], [], []>} : vector<32x32xf32>, vector<32x32xf32>, vector<32x32xf32> -> vector<32x32xf32>
    %91 = tpu.reciprocal %88 {approx = true} : vector<32x1xf32> -> vector<32x1xf32>
    %92 = vector.broadcast %91 : vector<32x1xf32> to vector<32x32xf32>
    %93 = arith.mulf %90, %92 : vector<32x32xf32>
    %94 = arith.addf %74, %93 : vector<32x32xf32>
    %95 = arith.addf %8, %94 : vector<32x32xf32>
    %96 = vector.broadcast %9 : vector<1x32xf32> to vector<32x32xf32>
    %97 = arith.addf %95, %96 : vector<32x32xf32>
    %cst_54 = arith.constant dense<0.000000e+00> : vector<32x1xf32>
    %98 = tpu.matmul %97, %0, %cst_54 {dimension_numbers = #tpu.dot_dimension_numbers<[1], [0], [0], [1], [0, 0, 1, 1], [], []>} : vector<32x32xf32>, vector<32x1xf32>, vector<32x1xf32> -> vector<32x1xf32>
    %99 = vector.broadcast %98 : vector<32x1xf32> to vector<32x32xf32>
    %100 = arith.subf %97, %99 : vector<32x32xf32>
    %101 = arith.mulf %100, %100 : vector<32x32xf32>
    %cst_55 = arith.constant dense<0.000000e+00> : vector<32x1xf32>
    %102 = tpu.matmul %101, %0, %cst_55 {dimension_numbers = #tpu.dot_dimension_numbers<[1], [0], [0], [1], [0, 0, 1, 1], [], []>} : vector<32x32xf32>, vector<32x1xf32>, vector<32x1xf32> -> vector<32x1xf32>
    %cst_56 = arith.constant 9.99999974E-6 : f32
    %103 = vector.broadcast %cst_56 : f32 to vector<32x1xf32>
    %104 = arith.addf %102, %103 : vector<32x1xf32>
    %105 = math.rsqrt %104 : vector<32x1xf32>
    %106 = vector.broadcast %105 : vector<32x1xf32> to vector<32x32xf32>
    %107 = arith.mulf %100, %106 : vector<32x32xf32>
    %108 = vector.broadcast %12 : vector<1x32xf32> to vector<32x32xf32>
    %109 = arith.mulf %107, %108 : vector<32x32xf32>
    %110 = vector.broadcast %13 : vector<1x32xf32> to vector<32x32xf32>
    %111 = arith.addf %109, %110 : vector<32x32xf32>
    %c336 = arith.constant 336 : index
    %c0_57 = arith.constant 0 : index
    %112 = vector.load %arg1[%c336, %c0_57] : memref<784x64xf32, #tpu.memory_space<vmem>>, vector<32x64xf32>
    %c368 = arith.constant 368 : index
    %c0_58 = arith.constant 0 : index
    %113 = vector.load %arg1[%c368, %c0_58] : memref<784x64xf32, #tpu.memory_space<vmem>>, vector<64x32xf32>
    %cst_59 = arith.constant dense<0.000000e+00> : vector<32x64xf32>
    %114 = tpu.matmul %111, %112, %cst_59 {dimension_numbers = #tpu.dot_dimension_numbers<[1], [0], [0], [1], [0, 0, 1, 1], [], []>} : vector<32x32xf32>, vector<32x64xf32>, vector<32x64xf32> -> vector<32x64xf32>
    %115 = vector.broadcast %10 : vector<1x64xf32> to vector<32x64xf32>
    %116 = arith.addf %114, %115 : vector<32x64xf32>
    %cst_60 = arith.constant 5.000000e-01 : f32
    %117 = vector.broadcast %cst_60 : f32 to vector<32x64xf32>
    %118 = arith.mulf %117, %116 : vector<32x64xf32>
    %cst_61 = arith.constant 0.707106769 : f32
    %119 = vector.broadcast %cst_61 : f32 to vector<32x64xf32>
    %120 = arith.mulf %116, %119 : vector<32x64xf32>
    %121 = math.erf %120 : vector<32x64xf32>
    %cst_62 = arith.constant 1.000000e+00 : f32
    %122 = vector.broadcast %cst_62 : f32 to vector<32x64xf32>
    %123 = arith.addf %122, %121 : vector<32x64xf32>
    %124 = arith.mulf %118, %123 : vector<32x64xf32>
    %cst_63 = arith.constant dense<0.000000e+00> : vector<32x32xf32>
    %125 = tpu.matmul %124, %113, %cst_63 {dimension_numbers = #tpu.dot_dimension_numbers<[1], [0], [0], [1], [0, 0, 1, 1], [], []>} : vector<32x64xf32>, vector<64x32xf32>, vector<32x32xf32> -> vector<32x32xf32>
    %126 = vector.broadcast %11 : vector<1x32xf32> to vector<32x32xf32>
    %127 = arith.addf %125, %126 : vector<32x32xf32>
    %128 = arith.addf %111, %127 : vector<32x32xf32>
    %cst_64 = arith.constant dense<0.000000e+00> : vector<32x1xf32>
    %129 = tpu.matmul %128, %0, %cst_64 {dimension_numbers = #tpu.dot_dimension_numbers<[1], [0], [0], [1], [0, 0, 1, 1], [], []>} : vector<32x32xf32>, vector<32x1xf32>, vector<32x1xf32> -> vector<32x1xf32>
    %130 = vector.broadcast %129 : vector<32x1xf32> to vector<32x32xf32>
    %131 = arith.subf %128, %130 : vector<32x32xf32>
    %132 = arith.mulf %131, %131 : vector<32x32xf32>
    %cst_65 = arith.constant dense<0.000000e+00> : vector<32x1xf32>
    %133 = tpu.matmul %132, %0, %cst_65 {dimension_numbers = #tpu.dot_dimension_numbers<[1], [0], [0], [1], [0, 0, 1, 1], [], []>} : vector<32x32xf32>, vector<32x1xf32>, vector<32x1xf32> -> vector<32x1xf32>
    %cst_66 = arith.constant 9.99999974E-6 : f32
    %134 = vector.broadcast %cst_66 : f32 to vector<32x1xf32>
    %135 = arith.addf %133, %134 : vector<32x1xf32>
    %136 = math.rsqrt %135 : vector<32x1xf32>
    %137 = vector.broadcast %136 : vector<32x1xf32> to vector<32x32xf32>
    %138 = arith.mulf %131, %137 : vector<32x32xf32>
    %139 = vector.broadcast %14 : vector<1x32xf32> to vector<32x32xf32>
    %140 = arith.mulf %138, %139 : vector<32x32xf32>
    %141 = vector.broadcast %15 : vector<1x32xf32> to vector<32x32xf32>
    %142 = arith.addf %140, %141 : vector<32x32xf32>
    %c20 = arith.constant 20 : index
    %c0_67 = arith.constant 0 : index
    %143 = vector.load %arg2[%c20, %c0_67] : memref<40x64xf32, #tpu.memory_space<vmem>>, vector<1x32xf32>
    %c21 = arith.constant 21 : index
    %c0_68 = arith.constant 0 : index
    %144 = vector.load %arg2[%c21, %c0_68] : memref<40x64xf32, #tpu.memory_space<vmem>>, vector<1x64xf32>
    %c22 = arith.constant 22 : index
    %c0_69 = arith.constant 0 : index
    %145 = vector.load %arg2[%c22, %c0_69] : memref<40x64xf32, #tpu.memory_space<vmem>>, vector<1x32xf32>
    %c23 = arith.constant 23 : index
    %c0_70 = arith.constant 0 : index
    %146 = vector.load %arg2[%c23, %c0_70] : memref<40x64xf32, #tpu.memory_space<vmem>>, vector<1x32xf32>
    %c24 = arith.constant 24 : index
    %c0_71 = arith.constant 0 : index
    %147 = vector.load %arg2[%c24, %c0_71] : memref<40x64xf32, #tpu.memory_space<vmem>>, vector<1x32xf32>
    %c25 = arith.constant 25 : index
    %c0_72 = arith.constant 0 : index
    %148 = vector.load %arg2[%c25, %c0_72] : memref<40x64xf32, #tpu.memory_space<vmem>>, vector<1x32xf32>
    %c26 = arith.constant 26 : index
    %c0_73 = arith.constant 0 : index
    %149 = vector.load %arg2[%c26, %c0_73] : memref<40x64xf32, #tpu.memory_space<vmem>>, vector<1x32xf32>
    %c432 = arith.constant 432 : index
    %c0_74 = arith.constant 0 : index
    %150 = vector.load %arg1[%c432, %c0_74] : memref<784x64xf32, #tpu.memory_space<vmem>>, vector<32x32xf32>
    %c560 = arith.constant 560 : index
    %c0_75 = arith.constant 0 : index
    %151 = vector.load %arg1[%c560, %c0_75] : memref<784x64xf32, #tpu.memory_space<vmem>>, vector<32x32xf32>
    %c16 = arith.constant 16 : index
    %c0_76 = arith.constant 0 : index
    %152 = vector.load %arg2[%c16, %c0_76] : memref<40x64xf32, #tpu.memory_space<vmem>>, vector<1x32xf32>
    %cst_77 = arith.constant dense<0.000000e+00> : vector<32x32xf32>
    %153 = tpu.matmul %142, %150, %cst_77 {dimension_numbers = #tpu.dot_dimension_numbers<[1], [0], [0], [1], [0, 0, 1, 1], [], []>} : vector<32x32xf32>, vector<32x32xf32>, vector<32x32xf32> -> vector<32x32xf32>
    %154 = vector.broadcast %152 : vector<1x32xf32> to vector<32x32xf32>
    %155 = arith.addf %153, %154 : vector<32x32xf32>
    %cst_78 = arith.constant dense<0.000000e+00> : vector<32x32xf32>
    %156 = tpu.matmul %155, %142, %cst_78 {dimension_numbers = #tpu.dot_dimension_numbers<[1], [1], [0], [0], [0, 0, 1, 0], [], []>} : vector<32x32xf32>, vector<32x32xf32>, vector<32x32xf32> -> vector<32x32xf32>
    %157 = arith.addf %156, %2 : vector<32x32xf32>
    %cst_79 = arith.constant dense<0xFF800000> : vector<32xf32>
    %158 = vector.multi_reduction <maximumf>, %157, %cst_79 [1] : vector<32x32xf32> to vector<32xf32>
    %159 = vector.shape_cast %158 : vector<32xf32> to vector<32x1xf32>
    %160 = vector.broadcast %159 : vector<32x1xf32> to vector<32x32xf32>
    %161 = arith.subf %157, %160 : vector<32x32xf32>
    %162 = math.exp %161 : vector<32x32xf32>
    %cst_80 = arith.constant dense<0.000000e+00> : vector<32x1xf32>
    %163 = tpu.matmul %162, %1, %cst_80 {dimension_numbers = #tpu.dot_dimension_numbers<[1], [0], [0], [1], [0, 0, 1, 1], [], []>} : vector<32x32xf32>, vector<32x1xf32>, vector<32x1xf32> -> vector<32x1xf32>
    %cst_81 = arith.constant dense<0.000000e+00> : vector<32x32xf32>
    %164 = tpu.matmul %142, %151, %cst_81 {dimension_numbers = #tpu.dot_dimension_numbers<[1], [0], [0], [1], [0, 0, 1, 1], [], []>} : vector<32x32xf32>, vector<32x32xf32>, vector<32x32xf32> -> vector<32x32xf32>
    %cst_82 = arith.constant dense<0.000000e+00> : vector<32x32xf32>
    %165 = tpu.matmul %162, %164, %cst_82 {dimension_numbers = #tpu.dot_dimension_numbers<[1], [0], [0], [1], [0, 0, 1, 1], [], []>} : vector<32x32xf32>, vector<32x32xf32>, vector<32x32xf32> -> vector<32x32xf32>
    %166 = tpu.reciprocal %163 {approx = true} : vector<32x1xf32> -> vector<32x1xf32>
    %167 = vector.broadcast %166 : vector<32x1xf32> to vector<32x32xf32>
    %168 = arith.mulf %165, %167 : vector<32x32xf32>
    %c464 = arith.constant 464 : index
    %c0_83 = arith.constant 0 : index
    %169 = vector.load %arg1[%c464, %c0_83] : memref<784x64xf32, #tpu.memory_space<vmem>>, vector<32x32xf32>
    %c592 = arith.constant 592 : index
    %c0_84 = arith.constant 0 : index
    %170 = vector.load %arg1[%c592, %c0_84] : memref<784x64xf32, #tpu.memory_space<vmem>>, vector<32x32xf32>
    %c17 = arith.constant 17 : index
    %c0_85 = arith.constant 0 : index
    %171 = vector.load %arg2[%c17, %c0_85] : memref<40x64xf32, #tpu.memory_space<vmem>>, vector<1x32xf32>
    %cst_86 = arith.constant dense<0.000000e+00> : vector<32x32xf32>
    %172 = tpu.matmul %142, %169, %cst_86 {dimension_numbers = #tpu.dot_dimension_numbers<[1], [0], [0], [1], [0, 0, 1, 1], [], []>} : vector<32x32xf32>, vector<32x32xf32>, vector<32x32xf32> -> vector<32x32xf32>
    %173 = vector.broadcast %171 : vector<1x32xf32> to vector<32x32xf32>
    %174 = arith.addf %172, %173 : vector<32x32xf32>
    %cst_87 = arith.constant dense<0.000000e+00> : vector<32x32xf32>
    %175 = tpu.matmul %174, %142, %cst_87 {dimension_numbers = #tpu.dot_dimension_numbers<[1], [1], [0], [0], [0, 0, 1, 0], [], []>} : vector<32x32xf32>, vector<32x32xf32>, vector<32x32xf32> -> vector<32x32xf32>
    %176 = arith.addf %175, %2 : vector<32x32xf32>
    %cst_88 = arith.constant dense<0xFF800000> : vector<32xf32>
    %177 = vector.multi_reduction <maximumf>, %176, %cst_88 [1] : vector<32x32xf32> to vector<32xf32>
    %178 = vector.shape_cast %177 : vector<32xf32> to vector<32x1xf32>
    %179 = vector.broadcast %178 : vector<32x1xf32> to vector<32x32xf32>
    %180 = arith.subf %176, %179 : vector<32x32xf32>
    %181 = math.exp %180 : vector<32x32xf32>
    %cst_89 = arith.constant dense<0.000000e+00> : vector<32x1xf32>
    %182 = tpu.matmul %181, %1, %cst_89 {dimension_numbers = #tpu.dot_dimension_numbers<[1], [0], [0], [1], [0, 0, 1, 1], [], []>} : vector<32x32xf32>, vector<32x1xf32>, vector<32x1xf32> -> vector<32x1xf32>
    %cst_90 = arith.constant dense<0.000000e+00> : vector<32x32xf32>
    %183 = tpu.matmul %142, %170, %cst_90 {dimension_numbers = #tpu.dot_dimension_numbers<[1], [0], [0], [1], [0, 0, 1, 1], [], []>} : vector<32x32xf32>, vector<32x32xf32>, vector<32x32xf32> -> vector<32x32xf32>
    %cst_91 = arith.constant dense<0.000000e+00> : vector<32x32xf32>
    %184 = tpu.matmul %181, %183, %cst_91 {dimension_numbers = #tpu.dot_dimension_numbers<[1], [0], [0], [1], [0, 0, 1, 1], [], []>} : vector<32x32xf32>, vector<32x32xf32>, vector<32x32xf32> -> vector<32x32xf32>
    %185 = tpu.reciprocal %182 {approx = true} : vector<32x1xf32> -> vector<32x1xf32>
    %186 = vector.broadcast %185 : vector<32x1xf32> to vector<32x32xf32>
    %187 = arith.mulf %184, %186 : vector<32x32xf32>
    %188 = arith.addf %168, %187 : vector<32x32xf32>
    %c496 = arith.constant 496 : index
    %c0_92 = arith.constant 0 : index
    %189 = vector.load %arg1[%c496, %c0_92] : memref<784x64xf32, #tpu.memory_space<vmem>>, vector<32x32xf32>
    %c624 = arith.constant 624 : index
    %c0_93 = arith.constant 0 : index
    %190 = vector.load %arg1[%c624, %c0_93] : memref<784x64xf32, #tpu.memory_space<vmem>>, vector<32x32xf32>
    %c18 = arith.constant 18 : index
    %c0_94 = arith.constant 0 : index
    %191 = vector.load %arg2[%c18, %c0_94] : memref<40x64xf32, #tpu.memory_space<vmem>>, vector<1x32xf32>
    %cst_95 = arith.constant dense<0.000000e+00> : vector<32x32xf32>
    %192 = tpu.matmul %142, %189, %cst_95 {dimension_numbers = #tpu.dot_dimension_numbers<[1], [0], [0], [1], [0, 0, 1, 1], [], []>} : vector<32x32xf32>, vector<32x32xf32>, vector<32x32xf32> -> vector<32x32xf32>
    %193 = vector.broadcast %191 : vector<1x32xf32> to vector<32x32xf32>
    %194 = arith.addf %192, %193 : vector<32x32xf32>
    %cst_96 = arith.constant dense<0.000000e+00> : vector<32x32xf32>
    %195 = tpu.matmul %194, %142, %cst_96 {dimension_numbers = #tpu.dot_dimension_numbers<[1], [1], [0], [0], [0, 0, 1, 0], [], []>} : vector<32x32xf32>, vector<32x32xf32>, vector<32x32xf32> -> vector<32x32xf32>
    %196 = arith.addf %195, %2 : vector<32x32xf32>
    %cst_97 = arith.constant dense<0xFF800000> : vector<32xf32>
    %197 = vector.multi_reduction <maximumf>, %196, %cst_97 [1] : vector<32x32xf32> to vector<32xf32>
    %198 = vector.shape_cast %197 : vector<32xf32> to vector<32x1xf32>
    %199 = vector.broadcast %198 : vector<32x1xf32> to vector<32x32xf32>
    %200 = arith.subf %196, %199 : vector<32x32xf32>
    %201 = math.exp %200 : vector<32x32xf32>
    %cst_98 = arith.constant dense<0.000000e+00> : vector<32x1xf32>
    %202 = tpu.matmul %201, %1, %cst_98 {dimension_numbers = #tpu.dot_dimension_numbers<[1], [0], [0], [1], [0, 0, 1, 1], [], []>} : vector<32x32xf32>, vector<32x1xf32>, vector<32x1xf32> -> vector<32x1xf32>
    %cst_99 = arith.constant dense<0.000000e+00> : vector<32x32xf32>
    %203 = tpu.matmul %142, %190, %cst_99 {dimension_numbers = #tpu.dot_dimension_numbers<[1], [0], [0], [1], [0, 0, 1, 1], [], []>} : vector<32x32xf32>, vector<32x32xf32>, vector<32x32xf32> -> vector<32x32xf32>
    %cst_100 = arith.constant dense<0.000000e+00> : vector<32x32xf32>
    %204 = tpu.matmul %201, %203, %cst_100 {dimension_numbers = #tpu.dot_dimension_numbers<[1], [0], [0], [1], [0, 0, 1, 1], [], []>} : vector<32x32xf32>, vector<32x32xf32>, vector<32x32xf32> -> vector<32x32xf32>
    %205 = tpu.reciprocal %202 {approx = true} : vector<32x1xf32> -> vector<32x1xf32>
    %206 = vector.broadcast %205 : vector<32x1xf32> to vector<32x32xf32>
    %207 = arith.mulf %204, %206 : vector<32x32xf32>
    %208 = arith.addf %188, %207 : vector<32x32xf32>
    %c528 = arith.constant 528 : index
    %c0_101 = arith.constant 0 : index
    %209 = vector.load %arg1[%c528, %c0_101] : memref<784x64xf32, #tpu.memory_space<vmem>>, vector<32x32xf32>
    %c656 = arith.constant 656 : index
    %c0_102 = arith.constant 0 : index
    %210 = vector.load %arg1[%c656, %c0_102] : memref<784x64xf32, #tpu.memory_space<vmem>>, vector<32x32xf32>
    %c19 = arith.constant 19 : index
    %c0_103 = arith.constant 0 : index
    %211 = vector.load %arg2[%c19, %c0_103] : memref<40x64xf32, #tpu.memory_space<vmem>>, vector<1x32xf32>
    %cst_104 = arith.constant dense<0.000000e+00> : vector<32x32xf32>
    %212 = tpu.matmul %142, %209, %cst_104 {dimension_numbers = #tpu.dot_dimension_numbers<[1], [0], [0], [1], [0, 0, 1, 1], [], []>} : vector<32x32xf32>, vector<32x32xf32>, vector<32x32xf32> -> vector<32x32xf32>
    %213 = vector.broadcast %211 : vector<1x32xf32> to vector<32x32xf32>
    %214 = arith.addf %212, %213 : vector<32x32xf32>
    %cst_105 = arith.constant dense<0.000000e+00> : vector<32x32xf32>
    %215 = tpu.matmul %214, %142, %cst_105 {dimension_numbers = #tpu.dot_dimension_numbers<[1], [1], [0], [0], [0, 0, 1, 0], [], []>} : vector<32x32xf32>, vector<32x32xf32>, vector<32x32xf32> -> vector<32x32xf32>
    %216 = arith.addf %215, %2 : vector<32x32xf32>
    %cst_106 = arith.constant dense<0xFF800000> : vector<32xf32>
    %217 = vector.multi_reduction <maximumf>, %216, %cst_106 [1] : vector<32x32xf32> to vector<32xf32>
    %218 = vector.shape_cast %217 : vector<32xf32> to vector<32x1xf32>
    %219 = vector.broadcast %218 : vector<32x1xf32> to vector<32x32xf32>
    %220 = arith.subf %216, %219 : vector<32x32xf32>
    %221 = math.exp %220 : vector<32x32xf32>
    %cst_107 = arith.constant dense<0.000000e+00> : vector<32x1xf32>
    %222 = tpu.matmul %221, %1, %cst_107 {dimension_numbers = #tpu.dot_dimension_numbers<[1], [0], [0], [1], [0, 0, 1, 1], [], []>} : vector<32x32xf32>, vector<32x1xf32>, vector<32x1xf32> -> vector<32x1xf32>
    %cst_108 = arith.constant dense<0.000000e+00> : vector<32x32xf32>
    %223 = tpu.matmul %142, %210, %cst_108 {dimension_numbers = #tpu.dot_dimension_numbers<[1], [0], [0], [1], [0, 0, 1, 1], [], []>} : vector<32x32xf32>, vector<32x32xf32>, vector<32x32xf32> -> vector<32x32xf32>
    %cst_109 = arith.constant dense<0.000000e+00> : vector<32x32xf32>
    %224 = tpu.matmul %221, %223, %cst_109 {dimension_numbers = #tpu.dot_dimension_numbers<[1], [0], [0], [1], [0, 0, 1, 1], [], []>} : vector<32x32xf32>, vector<32x32xf32>, vector<32x32xf32> -> vector<32x32xf32>
    %225 = tpu.reciprocal %222 {approx = true} : vector<32x1xf32> -> vector<32x1xf32>
    %226 = vector.broadcast %225 : vector<32x1xf32> to vector<32x32xf32>
    %227 = arith.mulf %224, %226 : vector<32x32xf32>
    %228 = arith.addf %208, %227 : vector<32x32xf32>
    %229 = arith.addf %142, %228 : vector<32x32xf32>
    %230 = vector.broadcast %143 : vector<1x32xf32> to vector<32x32xf32>
    %231 = arith.addf %229, %230 : vector<32x32xf32>
    %cst_110 = arith.constant dense<0.000000e+00> : vector<32x1xf32>
    %232 = tpu.matmul %231, %0, %cst_110 {dimension_numbers = #tpu.dot_dimension_numbers<[1], [0], [0], [1], [0, 0, 1, 1], [], []>} : vector<32x32xf32>, vector<32x1xf32>, vector<32x1xf32> -> vector<32x1xf32>
    %233 = vector.broadcast %232 : vector<32x1xf32> to vector<32x32xf32>
    %234 = arith.subf %231, %233 : vector<32x32xf32>
    %235 = arith.mulf %234, %234 : vector<32x32xf32>
    %cst_111 = arith.constant dense<0.000000e+00> : vector<32x1xf32>
    %236 = tpu.matmul %235, %0, %cst_111 {dimension_numbers = #tpu.dot_dimension_numbers<[1], [0], [0], [1], [0, 0, 1, 1], [], []>} : vector<32x32xf32>, vector<32x1xf32>, vector<32x1xf32> -> vector<32x1xf32>
    %cst_112 = arith.constant 9.99999974E-6 : f32
    %237 = vector.broadcast %cst_112 : f32 to vector<32x1xf32>
    %238 = arith.addf %236, %237 : vector<32x1xf32>
    %239 = math.rsqrt %238 : vector<32x1xf32>
    %240 = vector.broadcast %239 : vector<32x1xf32> to vector<32x32xf32>
    %241 = arith.mulf %234, %240 : vector<32x32xf32>
    %242 = vector.broadcast %146 : vector<1x32xf32> to vector<32x32xf32>
    %243 = arith.mulf %241, %242 : vector<32x32xf32>
    %244 = vector.broadcast %147 : vector<1x32xf32> to vector<32x32xf32>
    %245 = arith.addf %243, %244 : vector<32x32xf32>
    %c688 = arith.constant 688 : index
    %c0_113 = arith.constant 0 : index
    %246 = vector.load %arg1[%c688, %c0_113] : memref<784x64xf32, #tpu.memory_space<vmem>>, vector<32x64xf32>
    %c720 = arith.constant 720 : index
    %c0_114 = arith.constant 0 : index
    %247 = vector.load %arg1[%c720, %c0_114] : memref<784x64xf32, #tpu.memory_space<vmem>>, vector<64x32xf32>
    %cst_115 = arith.constant dense<0.000000e+00> : vector<32x64xf32>
    %248 = tpu.matmul %245, %246, %cst_115 {dimension_numbers = #tpu.dot_dimension_numbers<[1], [0], [0], [1], [0, 0, 1, 1], [], []>} : vector<32x32xf32>, vector<32x64xf32>, vector<32x64xf32> -> vector<32x64xf32>
    %249 = vector.broadcast %144 : vector<1x64xf32> to vector<32x64xf32>
    %250 = arith.addf %248, %249 : vector<32x64xf32>
    %cst_116 = arith.constant 5.000000e-01 : f32
    %251 = vector.broadcast %cst_116 : f32 to vector<32x64xf32>
    %252 = arith.mulf %251, %250 : vector<32x64xf32>
    %cst_117 = arith.constant 0.707106769 : f32
    %253 = vector.broadcast %cst_117 : f32 to vector<32x64xf32>
    %254 = arith.mulf %250, %253 : vector<32x64xf32>
    %255 = math.erf %254 : vector<32x64xf32>
    %cst_118 = arith.constant 1.000000e+00 : f32
    %256 = vector.broadcast %cst_118 : f32 to vector<32x64xf32>
    %257 = arith.addf %256, %255 : vector<32x64xf32>
    %258 = arith.mulf %252, %257 : vector<32x64xf32>
    %cst_119 = arith.constant dense<0.000000e+00> : vector<32x32xf32>
    %259 = tpu.matmul %258, %247, %cst_119 {dimension_numbers = #tpu.dot_dimension_numbers<[1], [0], [0], [1], [0, 0, 1, 1], [], []>} : vector<32x64xf32>, vector<64x32xf32>, vector<32x32xf32> -> vector<32x32xf32>
    %260 = vector.broadcast %145 : vector<1x32xf32> to vector<32x32xf32>
    %261 = arith.addf %259, %260 : vector<32x32xf32>
    %262 = arith.addf %245, %261 : vector<32x32xf32>
    %cst_120 = arith.constant dense<0.000000e+00> : vector<32x1xf32>
    %263 = tpu.matmul %262, %0, %cst_120 {dimension_numbers = #tpu.dot_dimension_numbers<[1], [0], [0], [1], [0, 0, 1, 1], [], []>} : vector<32x32xf32>, vector<32x1xf32>, vector<32x1xf32> -> vector<32x1xf32>
    %264 = vector.broadcast %263 : vector<32x1xf32> to vector<32x32xf32>
    %265 = arith.subf %262, %264 : vector<32x32xf32>
    %266 = arith.mulf %265, %265 : vector<32x32xf32>
    %cst_121 = arith.constant dense<0.000000e+00> : vector<32x1xf32>
    %267 = tpu.matmul %266, %0, %cst_121 {dimension_numbers = #tpu.dot_dimension_numbers<[1], [0], [0], [1], [0, 0, 1, 1], [], []>} : vector<32x32xf32>, vector<32x1xf32>, vector<32x1xf32> -> vector<32x1xf32>
    %cst_122 = arith.constant 9.99999974E-6 : f32
    %268 = vector.broadcast %cst_122 : f32 to vector<32x1xf32>
    %269 = arith.addf %267, %268 : vector<32x1xf32>
    %270 = math.rsqrt %269 : vector<32x1xf32>
    %271 = vector.broadcast %270 : vector<32x1xf32> to vector<32x32xf32>
    %272 = arith.mulf %265, %271 : vector<32x32xf32>
    %273 = vector.broadcast %148 : vector<1x32xf32> to vector<32x32xf32>
    %274 = arith.mulf %272, %273 : vector<32x32xf32>
    %275 = vector.broadcast %149 : vector<1x32xf32> to vector<32x32xf32>
    %276 = arith.addf %274, %275 : vector<32x32xf32>
    %cst_123 = arith.constant dense<0.000000e+00> : vector<8x32xf32>
    %277 = tpu.matmul %3, %276, %cst_123 {dimension_numbers = #tpu.dot_dimension_numbers<[1], [0], [0], [1], [0, 0, 1, 1], [], []>} : vector<8x32xf32>, vector<32x32xf32>, vector<8x32xf32> -> vector<8x32xf32>
    %cst_124 = arith.constant dense<0.000000e+00> : vector<8x64xf32>
    %278 = tpu.matmul %277, %5, %cst_124 {dimension_numbers = #tpu.dot_dimension_numbers<[1], [0], [0], [1], [0, 0, 1, 1], [], []>} : vector<8x32xf32>, vector<32x64xf32>, vector<8x64xf32> -> vector<8x64xf32>
    %279 = vector.broadcast %6 : vector<1x64xf32> to vector<8x64xf32>
    %280 = arith.addf %278, %279 : vector<8x64xf32>
    %c0_125 = arith.constant 0 : index
    %c0_126 = arith.constant 0 : index
    %281 = vector.load %arg3[%c0_125, %c0_126] : memref<8x64xf32, #tpu.memory_space<vmem>>, vector<8x64xf32>
    tpu.vector_store %arg3[%c0_125, %c0_126], %280 {strides = array<i32>} : memref<8x64xf32, #tpu.memory_space<vmem>>, vector<8x64xf32>,
    return
  }
}

</mosaic_0001>

<bundles_post_ra>
// kernel: tpu_custom_call.1
= control target key start
LH: loop header
LB: loop body
LE: loop exit
PB: predicated region body
PF: predicated region fallthrough
CT: control target
= control target key end

     0   :  { %vm30_vm0 = vcmask 64512   ;;  %s5125_s0 = inlined_call_operand.vmem [shape: f32[32,8], index: 0, kind: input, shape index: {}]   ;;  %s5126_s1 = inlined_call_operand.vmem [shape: f32[784,64], index: 1, kind: input, shape index: {}]   ;;  %s5127_s2 = inlined_call_operand.vmem [shape: f32[40,64], index: 2, kind: input, shape index: {}]   ;;  %s5128_s3 = inlined_call_operand.hbm [shape: f32[8,64], index: 3, kind: output, shape index: {}]  }
   0x1   :  { %v20_v0 = vld [vmem:[%s5126_s1 + $0x28] sm:$0xff]  ;;  %v26_v1 = vld [vmem:[%s5125_s0] sm:$0xff]  ;;  %v28_v2 = vld [vmem:[%s5125_s0 + $0x10] sm:$0xff] }
   0x2   :  { %58 = vmatpush.msra.mxu0 %v20_v0  ;;  %3609 = vmatpush.msra.mxu2 %v20_v0  ;;  %v27_v3 = vld [vmem:[%s5125_s0 + $0x8] sm:$0xff]  ;;  %v85_v6 = vld [vmem:[%s5126_s1 + $0xe0] sm:$0xff]  ;;  %v84_v8 = vld [vmem:[%s5126_s1 + $0xd8] sm:$0xff] }
   0x3   :  { %3354 = vmatmul.msk.f32.vlgmr.msra.gmra.mxu0 %vm30_vm0, %v26_v1  ;;  %3356 = vmatmul.msk.f32.vlgmr.msra.gmra.mxu2 %vm30_vm0, %v28_v2  ;;  %v82_v4 = vld [vmem:[%s5126_s1 + $0x68] sm:$0xff]  ;;  %v81_v7 = vld [vmem:[%s5126_s1 + $0x60] sm:$0xff]  ;;  %v80_v9 = vld [vmem:[%s5126_s1 + $0x58] sm:$0xff] }
   0x4   :  { %v86_v5 = vld [vmem:[%s5126_s1 + $0xe8] sm:$0xff]  ;;  %3608 = vmatpush.msra.mxu1 %v20_v0  ;;  %v29_v10 = vld [vmem:[%s5125_s0 + $0x18] sm:$0xff] }
   0x5   :  { %249 = vmatpush.msrb.mxu0 %v86_v5  ;;  %3355 = vmatmul.msk.f32.vlgmr.msra.gmra.mxu1 %vm30_vm0, %v27_v3 }
   0x6   :  { %114 = vmatpush.msrb.mxu1 %v82_v4 }
   0x7   :  { %250 = vmatpush.msrb.mxu0 %v85_v6 }
   0x8   :  { %115 = vmatpush.msrb.mxu1 %v81_v7 }
   0x9   :  { %251 = vmatpush.msrb.mxu0 %v84_v8 }
   0xa   :  { %116 = vmatpush.msrb.mxu1 %v80_v9 }
   0xb   :  { %3357 = vmatmul.msk.f32.gmra.mxu2 %vm30_vm0, %v29_v10 }
   0xc   :  { %8 = vsyncpa [#allocation3], 0  ;;  %v79_v11 = vld [vmem:[%s5126_s1 + $0x50] sm:$0xff]  ;;  %v3846_v13 = vmov 1.0   ;;  %vm89_vm1 = vcmask 261120   ;;  %v3979_v31 = vld [vmem:[%s5126_s1] sm:$0xff] }
   0xd   :  { %v83_v12 = vld [vmem:[%s5126_s1 + $0xd0] sm:$0xff]  ;;  %117 = vmatpush.msrb.mxu1 %v79_v11  ;;  %220 = vmatpush.msra.mxu3 %v3846_v13  ;;  %v3617_v18 = vld [vmem:[%s5127_s2] ss:$0 sm:$0xff]  ;;  %v3986_v35 = vld [vmem:[%s5126_s1 + $0x8] sm:$0xff]  ;;  %s3849_s18 = smov [#allocation2]   ;;  %s3345_s22 = sshll.u32 %s5128_s3, 4  ;;  %s3346_s22 = int_to_ptr.hbm [resolvable:$true] %s3345_s22 }
   0xe   :  { %252 = vmatpush.msrb.mxu0 %v83_v12  ;;  %v3993_v39 = vld [vmem:[%s5126_s1 + $0x10] sm:$0xff]  ;;  %v4000_v43 = vld [vmem:[%s5126_s1 + $0x18] sm:$0xff]  ;;  %v330_v47 = vld [vmem:[%s5126_s1 + $0x108] sm:$0xff]  ;;  %s3343_s19 = sshll.u32 %s3849_s18, 4  ;;  %s3344_s19 = int_to_ptr.vmem [resolvable:$true] %s3343_s19 }
   0xf   :  { %221 = vmatpush.msra.mxu3 %v3846_v13  ;;  %v326_v48 = vld [vmem:[%s5126_s1 + $0x88] sm:$0xff]  ;;  %v329_v49 = vld [vmem:[%s5126_s1 + $0x100] sm:$0xff]  ;;  %v328_v50 = vld [vmem:[%s5126_s1 + $0xf8] sm:$0xff] }
  0x10   :  { %451 = vmatpush.msra.mxu0 %v3846_v13  ;;  %v327_v54 = vld [vmem:[%s5126_s1 + $0xf0] sm:$0xff]  ;;  %v325_v55 = vld [vmem:[%s5126_s1 + $0x80] sm:$0xff]  ;;  %v324_v56 = vld [vmem:[%s5126_s1 + $0x78] sm:$0xff] }
  0x11   :  { %222 = vmatpush.msra.mxu3 %v3846_v13  ;;  %v323_v57 = vld [vmem:[%s5126_s1 + $0x70] sm:$0xff] }
  0x12   :  { %452 = vmatpush.msra.mxu0 %v3846_v13 }
  0x13   :  { %223 = vmatpush.msra.mxu3 %v3846_v13 }
  0x14   :  { %453 = vmatpush.msra.mxu0 %v3846_v13 }
  0x15   :  { %345 = vmatpush.msrb.mxu3 %v326_v48 }
  0x16   :  { %454 = vmatpush.msra.mxu0 %v3846_v13 }
  0x17   :  { %346 = vmatpush.msrb.mxu3 %v325_v55 }
  0x19   :  { %347 = vmatpush.msrb.mxu3 %v324_v56  ;;  %v565_v56 = vld [vmem:[%s5126_s1 + $0x128] sm:$0xff] }
  0x1b   :  { %348 = vmatpush.msrb.mxu3 %v323_v57  ;;  %v564_v57 = vld [vmem:[%s5126_s1 + $0x120] sm:$0xff] }
  0x80   :  { %v3921_v14 = vpop.f32.mrf.mxu0 }
  0x81   :  { %3358 = vmatmul.msk.f32.vlgmr.msrb.gmra.mxu1 %vm89_vm1, %v3921_v14  ;;  %3374 = vmatmul.msk.f32.vlgmr.msrb.gmra.mxu0 %vm89_vm1, %v3921_v14 }
  0x82   :  { %v3929_v16 = vpop.f32.mrf.mxu1 }
  0x86   :  { %v3927_v15 = vpop.f32.mrf.mxu2 }
  0x89   :  { %3359 = vmatmul.msk.f32.gmra.mxu1 %vm89_vm1, %v3929_v16  ;;  %3375 = vmatmul.msk.f32.gmra.mxu0 %vm89_vm1, %v3929_v16 }
  0x8e   :  { %v3935_v17 = vpop.f32.mrf.mxu2 }
  0x8f   :  { %3362 = vmatpush.xpose.msk.msrb.mxu2 %vm89_vm1, %v3935_v17  ;;  %3410 = vmatpush.xpose.msk.msrb.mxu0 %vm89_vm1, %v3935_v17 }
  0x91   :  { %3360 = vmatmul.msk.f32.gmra.mxu1 %vm89_vm1, %v3927_v15  ;;  %3376 = vmatmul.msk.f32.gmra.mxu0 %vm89_vm1, %v3927_v15 }
  0x93   :  { %3363 = vmatpush.xpose.msk.msrb.mxu2 %vm89_vm1, %v3927_v15  ;;  %3411 = vmatpush.xpose.msk.msrb.mxu0 %vm89_vm1, %v3927_v15 }
  0x97   :  { %3364 = vmatpush.xpose.msk.msrb.mxu2 %vm89_vm1, %v3929_v16  ;;  %3412 = vmatpush.xpose.msk.msrb.mxu0 %vm89_vm1, %v3929_v16 }
  0x99   :  { %3361 = vmatmul.msk.f32.gmra.mxu1 %vm89_vm1, %v3935_v17  ;;  %3377 = vmatmul.msk.f32.gmra.mxu0 %vm89_vm1, %v3935_v17 }
  0x9b   :  { %3365 = vmatpush.xpose.msk.msrb.mxu2 %vm89_vm1, %v3921_v14  ;;  %3413 = vmatpush.xpose.msk.msrb.mxu0 %vm89_vm1, %v3921_v14 }
  0x9f   :  { %3386 = vmatpush.xpose.msk.msra.mxu2 %vm89_vm1, %v3935_v17 }
  0xa3   :  { %3387 = vmatpush.xpose.msk.msra.mxu2 %vm89_vm1, %v3927_v15 }
  0xa7   :  { %3388 = vmatpush.xpose.msk.msra.mxu2 %vm89_vm1, %v3929_v16 }
  0xab   :  { %3389 = vmatpush.xpose.msk.msra.mxu2 %vm89_vm1, %v3921_v14 }
  0xfe   :  { %v119_v19 = vpop.f32.mrf.mxu1  ;;  %v254_v20 = vpop.f32.mrf.mxu0 }
  0xff   :  { %v120_v21 = vadd.f32 %v3617_v18, %v119_v19 }
 0x101   :  { %3366 = vmatmul.msk.f32.vlgmr.msrb.gmra.mxu2 %vm89_vm1, %v120_v21  ;;  %v561_v21 = vld [vmem:[%s5126_s1 + $0xa8] sm:$0xff] }
 0x102   :  { %580 = vmatpush.msrb.mxu2 %v561_v21 }
 0x106   :  { %v122_v22 = vpop.f32.mrf.mxu1  ;;  %v257_v23 = vpop.f32.mrf.mxu0 }
 0x107   :  { %v123_v24 = vadd.f32 %v3617_v18, %v122_v22  ;;  %v560_v22 = vld [vmem:[%s5126_s1 + $0xa0] sm:$0xff] }
 0x108   :  { %581 = vmatpush.msrb.mxu2 %v560_v22 }
 0x109   :  { %3367 = vmatmul.msk.f32.gmra.mxu2 %vm89_vm1, %v123_v24  ;;  %v559_v24 = vld [vmem:[%s5126_s1 + $0x98] sm:$0xff] }
 0x10a   :  { %582 = vmatpush.msrb.mxu2 %v559_v24  ;;  %v795_v24 = vld [vmem:[%s5126_s1 + $0xc0] sm:$0xff] }
 0x10e   :  { %v125_v25 = vpop.f32.mrf.mxu1  ;;  %v260_v26 = vpop.f32.mrf.mxu0 }
 0x10f   :  { %v126_v27 = vadd.f32 %v3617_v18, %v125_v25  ;;  %v558_v25 = vld [vmem:[%s5126_s1 + $0x90] sm:$0xff] }
 0x110   :  { %583 = vmatpush.msrb.mxu2 %v558_v25  ;;  %v3619_v25 = vld [vmem:[%s5127_s2 + $0x2] ss:$0 sm:$0xff] }
 0x111   :  { %3368 = vmatmul.msk.f32.gmra.mxu2 %vm89_vm1, %v126_v27 }
 0x116   :  { %v128_v28 = vpop.f32.mrf.mxu1  ;;  %v263_v29 = vpop.f32.mrf.mxu0 }
 0x117   :  { %v129_v30 = vadd.f32 %v3617_v18, %v128_v28  ;;  %278 = vmatpush.msra.mxu1 %v263_v29 }
 0x119   :  { %3369 = vmatmul.msk.f32.gmra.mxu2 %vm89_vm1, %v129_v30  ;;  %279 = vmatpush.msra.mxu1 %v260_v26 }
 0x11b   :  { %280 = vmatpush.msra.mxu1 %v257_v23  ;;  %v3618_v23 = vld [vmem:[%s5127_s2 + $0x1] ss:$0 sm:$0xff] }
 0x11d   :  { %281 = vmatpush.msra.mxu1 %v254_v20 }
 0x11f   :  { %480 = vmatpush.msrb.mxu1 %v330_v47 }
 0x121   :  { %481 = vmatpush.msrb.mxu1 %v329_v49 }
 0x123   :  { %482 = vmatpush.msrb.mxu1 %v328_v50 }
 0x125   :  { %483 = vmatpush.msrb.mxu1 %v327_v54 }
 0x184   :  { %v160_v32 = vpop.f32.mrf.mxu2 }
 0x185   :  { %v161_v33 = vadd.f32 %v160_v32, %v3979_v31 }
 0x187   :  { %v172_v34 = vsel %vm89_vm1, %v161_v33, -inf }
 0x188   :  { %173 = vmax.xlane.f32.xlu0 %v172_v34 }
 0x18c   :  { %v163_v36 = vpop.f32.mrf.mxu2 }
 0x18d   :  { %v164_v37 = vadd.f32 %v163_v36, %v3986_v35 }
 0x18f   :  { %v175_v38 = vsel %vm89_vm1, %v164_v37, -inf }
 0x190   :  { %176 = vmax.xlane.f32.xlu0 %v175_v38 }
 0x194   :  { %v166_v40 = vpop.f32.mrf.mxu2 }
 0x195   :  { %v167_v41 = vadd.f32 %v166_v40, %v3993_v39 }
 0x197   :  { %v178_v42 = vsel %vm89_vm1, %v167_v41, -inf }
 0x198   :  { %179 = vmax.xlane.f32.xlu1 %v178_v42 }
 0x19c   :  { %v169_v44 = vpop.f32.mrf.mxu2 }
 0x19d   :  { %v170_v45 = vadd.f32 %v169_v44, %v4000_v43 }
 0x19f   :  { %v181_v46 = vsel %vm89_vm1, %v170_v45, -inf }
 0x1a0   :  { %182 = vmax.xlane.f32.xlu1 %v181_v46 }
 0x1fb   :  { %v174_v51 = vpop.xlane.xlu0 %173 }
 0x1fc   :  { %v184_v52 = vsub.f32 %v161_v33, %v174_v51 }
 0x1fe   :  { %v188_v53 = vmul.f32 1.442695, %v184_v52 }
 0x200   :  { %3640 = vpow2.f32 %v188_v53 }
 0x203   :  { %v177_v58 = vpop.xlane.xlu0 %176 }
 0x204   :  { %v185_v59 = vsub.f32 %v164_v37, %v177_v58  ;;  %v563_v58 = vld [vmem:[%s5126_s1 + $0x118] sm:$0xff] }
 0x206   :  { %v3641_v60 = vpop.eup %3640  ;;  %v190_v61 = vmul.f32 1.442695, %v185_v59 }
 0x207   :  { %3370 = vmatmul.msk.f32.vlgmr.msra.gmra.mxu3 %vm89_vm1, %v3641_v60  ;;  %3378 = vmatmul.msk.f32.vlgmr.msra.gmra.mxu1 %vm89_vm1, %v3641_v60  ;;  %v562_v60 = vld [vmem:[%s5126_s1 + $0x110] sm:$0xff] }
 0x208   :  { %3642 = vpow2.f32 %v190_v61  ;;  %686 = vmatpush.msra.mxu1 %v3846_v13 }
 0x20a   :  { %687 = vmatpush.msra.mxu1 %v3846_v13 }
 0x20b   :  { %v180_v62 = vpop.xlane.xlu1 %179 }
 0x20c   :  { %v186_v63 = vsub.f32 %v167_v41, %v180_v62  ;;  %688 = vmatpush.msra.mxu1 %v3846_v13 }
 0x20e   :  { %v3643_v0 = vpop.eup %3642  ;;  %v192_v1 = vmul.f32 1.442695, %v186_v63  ;;  %689 = vmatpush.msra.mxu1 %v3846_v13 }
 0x20f   :  { %3371 = vmatmul.msk.f32.gmra.mxu3 %vm89_vm1, %v3643_v0  ;;  %3379 = vmatmul.msk.f32.gmra.mxu1 %vm89_vm1, %v3643_v0 }
 0x210   :  { %3644 = vpow2.f32 %v192_v1 }
 0x213   :  { %v183_v2 = vpop.xlane.xlu1 %182 }
 0x214   :  { %v187_v3 = vsub.f32 %v170_v45, %v183_v2 }
 0x216   :  { %v3645_v4 = vpop.eup %3644  ;;  %v194_v5 = vmul.f32 1.442695, %v187_v3 }
 0x217   :  { %3372 = vmatmul.msk.f32.gmra.mxu3 %vm89_vm1, %v3645_v4  ;;  %3380 = vmatmul.msk.f32.gmra.mxu1 %vm89_vm1, %v3645_v4 }
 0x218   :  { %3646 = vpow2.f32 %v194_v5 }
 0x21e   :  { %v3647_v6 = vpop.eup %3646 }
 0x21f   :  { %3373 = vmatmul.msk.f32.gmra.mxu3 %vm89_vm1, %v3647_v6  ;;  %3381 = vmatmul.msk.f32.gmra.mxu1 %vm89_vm1, %v3647_v6 }
 0x227   :  { %3382 = vmatmul.msk.f32.vlgmr.msrb.gmra.mxu3 %vm89_vm1, %v3921_v14  ;;  %3398 = vmatmul.msk.f32.vlgmr.msrb.gmra.mxu1 %vm89_vm1, %v3921_v14 }
 0x228   :  { %3434 = vmatpush.xpose.msk.msrb.mxu1 %vm89_vm1, %v3935_v17 }
 0x22c   :  { %3435 = vmatpush.xpose.msk.msrb.mxu1 %vm89_vm1, %v3927_v15 }
 0x22f   :  { %3383 = vmatmul.msk.f32.gmra.mxu3 %vm89_vm1, %v3929_v16  ;;  %3399 = vmatmul.msk.f32.gmra.mxu1 %vm89_vm1, %v3929_v16 }
 0x230   :  { %3436 = vmatpush.xpose.msk.msrb.mxu1 %vm89_vm1, %v3929_v16 }
 0x234   :  { %3437 = vmatpush.xpose.msk.msrb.mxu1 %vm89_vm1, %v3921_v14 }
 0x237   :  { %3384 = vmatmul.msk.f32.gmra.mxu3 %vm89_vm1, %v3927_v15  ;;  %3400 = vmatmul.msk.f32.gmra.mxu1 %vm89_vm1, %v3927_v15 }
 0x23f   :  { %3385 = vmatmul.msk.f32.gmra.mxu3 %vm89_vm1, %v3935_v17  ;;  %3401 = vmatmul.msk.f32.gmra.mxu1 %vm89_vm1, %v3935_v17 }
 0x284   :  { %v4064_v7 = vpop.f32.mrf.mxu1 }
 0x28a   :  { %v4066_v8 = vpop.f32.mrf.mxu3 }
 0x28c   :  { %v4068_v9 = vpop.f32.mrf.mxu1 }
 0x292   :  { %v4070_v10 = vpop.f32.mrf.mxu3 }
 0x294   :  { %v4072_v11 = vpop.f32.mrf.mxu1 }
 0x29a   :  { %v4074_v12 = vpop.f32.mrf.mxu3 }
 0x29c   :  { %v4076_v18 = vpop.f32.mrf.mxu1 }
 0x2a2   :  { %v4078_v19 = vpop.f32.mrf.mxu3 }
 0x2a4   :  { %v485_v20 = vpop.f32.mrf.mxu1 }
 0x2aa   :  { %v350_v26 = vpop.f32.mrf.mxu3 }
 0x2ab   :  { %v351_v27 = vadd.f32 %v3618_v23, %v350_v26  ;;  %v794_v26 = vld [vmem:[%s5126_s1 + $0xb8] sm:$0xff] }
 0x2ac   :  { %v488_v28 = vpop.f32.mrf.mxu1 }
 0x2ad   :  { %3390 = vmatmul.msk.f32.vlgmr.msra.gmra.mxu2 %vm89_vm1, %v351_v27  ;;  %v793_v27 = vld [vmem:[%s5126_s1 + $0xb0] sm:$0xff] }
 0x2b2   :  { %v353_v29 = vpop.f32.mrf.mxu3 }
 0x2b3   :  { %v354_v30 = vadd.f32 %v3618_v23, %v353_v29 }
 0x2b4   :  { %v491_v32 = vpop.f32.mrf.mxu1 }
 0x2b5   :  { %3391 = vmatmul.msk.f32.gmra.mxu2 %vm89_vm1, %v354_v30 }
 0x2ba   :  { %v356_v33 = vpop.f32.mrf.mxu3 }
 0x2bb   :  { %v357_v34 = vadd.f32 %v3618_v23, %v356_v33 }
 0x2bc   :  { %v494_v36 = vpop.f32.mrf.mxu1 }
 0x2bd   :  { %3392 = vmatmul.msk.f32.gmra.mxu2 %vm89_vm1, %v357_v34  ;;  %509 = vmatpush.msra.mxu3 %v494_v36 }
 0x2bf   :  { %510 = vmatpush.msra.mxu3 %v491_v32 }
 0x2c1   :  { %511 = vmatpush.msra.mxu3 %v488_v28 }
 0x2c2   :  { %v359_v37 = vpop.f32.mrf.mxu3 }
 0x2c3   :  { %v360_v38 = vadd.f32 %v3618_v23, %v359_v37  ;;  %512 = vmatpush.msra.mxu3 %v485_v20  ;;  %v796_v23 = vld [vmem:[%s5126_s1 + $0xc8] sm:$0xff] }
 0x2c5   :  { %3393 = vmatmul.msk.f32.gmra.mxu2 %vm89_vm1, %v360_v38  ;;  %715 = vmatpush.msrb.mxu3 %v565_v56 }
 0x2c7   :  { %716 = vmatpush.msrb.mxu3 %v564_v57 }
 0x2c9   :  { %717 = vmatpush.msrb.mxu3 %v563_v58 }
 0x2cb   :  { %718 = vmatpush.msrb.mxu3 %v562_v60 }
 0x2cd   :  { %3406 = vmatmul.msk.f32.vlgmr.msrb.gmra.mxu2 %vm89_vm1, %v3921_v14 }
 0x2d5   :  { %3407 = vmatmul.msk.f32.gmra.mxu2 %vm89_vm1, %v3929_v16 }
 0x2dd   :  { %3408 = vmatmul.msk.f32.gmra.mxu2 %vm89_vm1, %v3927_v15 }
 0x2e5   :  { %3409 = vmatmul.msk.f32.gmra.mxu2 %vm89_vm1, %v3935_v17 }
 0x330   :  { %v391_v40 = vpop.f32.mrf.mxu2 }
 0x331   :  { %v392_v41 = vadd.f32 %v391_v40, %v3979_v31 }
 0x333   :  { %v403_v42 = vsel %vm89_vm1, %v392_v41, -inf }
 0x334   :  { %404 = vmax.xlane.f32.xlu2 %v403_v42 }
 0x338   :  { %v394_v44 = vpop.f32.mrf.mxu2 }
 0x339   :  { %v395_v45 = vadd.f32 %v394_v44, %v3986_v35 }
 0x33b   :  { %v406_v46 = vsel %vm89_vm1, %v395_v45, -inf }
 0x33c   :  { %407 = vmax.xlane.f32.xlu2 %v406_v46 }
 0x340   :  { %v397_v47 = vpop.f32.mrf.mxu2 }
 0x341   :  { %v398_v48 = vadd.f32 %v397_v47, %v3993_v39 }
 0x343   :  { %v409_v49 = vsel %vm89_vm1, %v398_v48, -inf }
 0x344   :  { %410 = vmax.xlane.f32.xlu0 %v409_v49 }
 0x348   :  { %v400_v50 = vpop.f32.mrf.mxu2 }
 0x349   :  { %v401_v51 = vadd.f32 %v400_v50, %v4000_v43 }
 0x34b   :  { %v412_v52 = vsel %vm89_vm1, %v401_v51, -inf }
 0x34c   :  { %413 = vmax.xlane.f32.xlu1 %v412_v52 }
 0x350   :  { %v585_v21 = vpop.f32.mrf.mxu2 }
 0x351   :  { %v586_v28 = vadd.f32 %v3619_v25, %v585_v21 }
 0x358   :  { %v588_v29 = vpop.f32.mrf.mxu2 }
 0x359   :  { %v589_v30 = vadd.f32 %v3619_v25, %v588_v29 }
 0x360   :  { %v591_v32 = vpop.f32.mrf.mxu2 }
 0x361   :  { %v592_v33 = vadd.f32 %v3619_v25, %v591_v32 }
 0x368   :  { %v594_v34 = vpop.f32.mrf.mxu2 }
 0x369   :  { %v595_v36 = vadd.f32 %v3619_v25, %v594_v34  ;;  %v3620_v34 = vld [vmem:[%s5127_s2 + $0x3] ss:$0 sm:$0xff] }
 0x3a7   :  { %v405_v53 = vpop.xlane.xlu2 %404 }
 0x3a8   :  { %v415_v54 = vsub.f32 %v392_v41, %v405_v53 }
 0x3aa   :  { %v419_v55 = vmul.f32 1.442695, %v415_v54 }
 0x3ac   :  { %3648 = vpow2.f32 %v419_v55 }
 0x3af   :  { %v408_v59 = vpop.xlane.xlu2 %407 }
 0x3b0   :  { %v416_v61 = vsub.f32 %v395_v45, %v408_v59 }
 0x3b2   :  { %v3649_v62 = vpop.eup %3648  ;;  %v421_v63 = vmul.f32 1.442695, %v416_v61 }
 0x3b3   :  { %3394 = vmatmul.msk.f32.vlgmr.msra.gmra.mxu0 %vm89_vm1, %v3649_v62  ;;  %3402 = vmatmul.msk.f32.vlgmr.msra.gmra.mxu3 %vm89_vm1, %v3649_v62 }
 0x3b4   :  { %3650 = vpow2.f32 %v421_v63  ;;  %921 = vmatpush.msra.mxu3 %v3846_v13  ;;  %815 = vmatpush.msra.mxu0 %v796_v23 }
 0x3b6   :  { %922 = vmatpush.msra.mxu3 %v3846_v13  ;;  %816 = vmatpush.msra.mxu0 %v795_v24 }
 0x3b7   :  { %v411_v0 = vpop.xlane.xlu0 %410 }
 0x3b8   :  { %v417_v1 = vsub.f32 %v398_v48, %v411_v0  ;;  %923 = vmatpush.msra.mxu3 %v3846_v13  ;;  %817 = vmatpush.msra.mxu0 %v794_v26 }
 0x3ba   :  { %v3651_v2 = vpop.eup %3650  ;;  %v423_v3 = vmul.f32 1.442695, %v417_v1  ;;  %924 = vmatpush.msra.mxu3 %v3846_v13  ;;  %818 = vmatpush.msra.mxu0 %v793_v27 }
 0x3bb   :  { %3395 = vmatmul.msk.f32.gmra.mxu0 %vm89_vm1, %v3651_v2  ;;  %3403 = vmatmul.msk.f32.gmra.mxu3 %vm89_vm1, %v3651_v2  ;;  %v800_v2 = vld [vmem:[%s5126_s1 + $0x148] sm:$0xff] }
 0x3bc   :  { %3652 = vpow2.f32 %v423_v3  ;;  %v799_v3 = vld [vmem:[%s5126_s1 + $0x140] sm:$0xff] }
 0x3bf   :  { %v414_v4 = vpop.xlane.xlu1 %413 }
 0x3c0   :  { %v418_v5 = vsub.f32 %v401_v51, %v414_v4  ;;  %v798_v4 = vld [vmem:[%s5126_s1 + $0x138] sm:$0xff] }
 0x3c2   :  { %v3653_v6 = vpop.eup %3652  ;;  %v425_v20 = vmul.f32 1.442695, %v418_v5 }
 0x3c3   :  { %3396 = vmatmul.msk.f32.gmra.mxu0 %vm89_vm1, %v3653_v6  ;;  %3404 = vmatmul.msk.f32.gmra.mxu3 %vm89_vm1, %v3653_v6  ;;  %v797_v6 = vld [vmem:[%s5126_s1 + $0x130] sm:$0xff] }
 0x3c4   :  { %3654 = vpow2.f32 %v425_v20 }
 0x3ca   :  { %v3655_v22 = vpop.eup %3654 }
 0x3cb   :  { %3397 = vmatmul.msk.f32.gmra.mxu0 %vm89_vm1, %v3655_v22  ;;  %3405 = vmatmul.msk.f32.gmra.mxu3 %vm89_vm1, %v3655_v22 }
 0x3d3   :  { %3414 = vmatmul.msk.f32.vlgmr.msrb.gmra.mxu0 %vm89_vm1, %v586_v28  ;;  %3422 = vmatmul.msk.f32.vlgmr.msrb.gmra.mxu3 %vm89_vm1, %v3921_v14 }
 0x3db   :  { %3415 = vmatmul.msk.f32.gmra.mxu0 %vm89_vm1, %v589_v30  ;;  %3423 = vmatmul.msk.f32.gmra.mxu3 %vm89_vm1, %v3929_v16 }
 0x3e3   :  { %3416 = vmatmul.msk.f32.gmra.mxu0 %vm89_vm1, %v592_v33  ;;  %3424 = vmatmul.msk.f32.gmra.mxu3 %vm89_vm1, %v3927_v15 }
 0x3eb   :  { %3417 = vmatmul.msk.f32.gmra.mxu0 %vm89_vm1, %v595_v36  ;;  %3425 = vmatmul.msk.f32.gmra.mxu3 %vm89_vm1, %v3935_v17 }
 0x3f3   :  { %3430 = vmatmul.msk.f32.vlgmr.msra.gmra.mxu0 %vm89_vm1, %v3921_v14 }
 0x3fb   :  { %3431 = vmatmul.msk.f32.gmra.mxu0 %vm89_vm1, %v3929_v16 }
 0x403   :  { %3432 = vmatmul.msk.f32.gmra.mxu0 %vm89_vm1, %v3927_v15 }
 0x40b   :  { %3433 = vmatmul.msk.f32.gmra.mxu0 %vm89_vm1, %v3935_v17 }
 0x430   :  { %v4174_v37 = vpop.f32.mrf.mxu0 }
 0x436   :  { %v4176_v38 = vpop.f32.mrf.mxu3 }
 0x438   :  { %v4178_v40 = vpop.f32.mrf.mxu0 }
 0x43e   :  { %v4180_v41 = vpop.f32.mrf.mxu3 }
 0x440   :  { %v4182_v42 = vpop.f32.mrf.mxu0 }
 0x446   :  { %v4184_v44 = vpop.f32.mrf.mxu3 }
 0x448   :  { %v4186_v45 = vpop.f32.mrf.mxu0 }
 0x44e   :  { %v4188_v46 = vpop.f32.mrf.mxu3 }
 0x450   :  { %v626_v47 = vpop.f32.mrf.mxu0 }
 0x451   :  { %v627_v48 = vadd.f32 %v626_v47, %v3979_v31 }
 0x453   :  { %v638_v49 = vsel %vm89_vm1, %v627_v48, -inf }
 0x454   :  { %639 = vmax.xlane.f32.xlu2 %v638_v49 }
 0x456   :  { %v720_v50 = vpop.f32.mrf.mxu3 }
 0x458   :  { %v629_v51 = vpop.f32.mrf.mxu0 }
 0x459   :  { %v630_v52 = vadd.f32 %v629_v51, %v3986_v35 }
 0x45b   :  { %v641_v53 = vsel %vm89_vm1, %v630_v52, -inf }
 0x45c   :  { %642 = vmax.xlane.f32.xlu0 %v641_v53 }
 0x45e   :  { %v723_v54 = vpop.f32.mrf.mxu3 }
 0x460   :  { %v632_v55 = vpop.f32.mrf.mxu0 }
 0x461   :  { %v633_v56 = vadd.f32 %v632_v55, %v3993_v39 }
 0x463   :  { %v644_v57 = vsel %vm89_vm1, %v633_v56, -inf }
 0x464   :  { %645 = vmax.xlane.f32.xlu1 %v644_v57 }
 0x466   :  { %v726_v58 = vpop.f32.mrf.mxu3 }
 0x468   :  { %v635_v59 = vpop.f32.mrf.mxu0 }
 0x469   :  { %v636_v60 = vadd.f32 %v635_v59, %v4000_v43 }
 0x46b   :  { %v647_v61 = vsel %vm89_vm1, %v636_v60, -inf }
 0x46c   :  { %648 = vmax.xlane.f32.xlu2 %v647_v61 }
 0x46e   :  { %v729_v62 = vpop.f32.mrf.mxu3 }
 0x46f   :  { %744 = vmatpush.msra.mxu2 %v729_v62 }
 0x470   :  { %v820_v32 = vpop.f32.mrf.mxu0 }
 0x471   :  { %745 = vmatpush.msra.mxu2 %v726_v58  ;;  %v821_v36 = vadd.f32 %v3620_v34, %v820_v32 }
 0x473   :  { %746 = vmatpush.msra.mxu2 %v723_v54 }
 0x475   :  { %747 = vmatpush.msra.mxu2 %v720_v50 }
 0x477   :  { %950 = vmatpush.msrb.mxu2 %v800_v2 }
 0x478   :  { %v823_v47 = vpop.f32.mrf.mxu0 }
 0x479   :  { %951 = vmatpush.msrb.mxu2 %v799_v3 }
 0x47b   :  { %952 = vmatpush.msrb.mxu2 %v798_v4 }
 0x47d   :  { %953 = vmatpush.msrb.mxu2 %v797_v6 }
 0x480   :  { %v826_v49 = vpop.f32.mrf.mxu0 }
 0x481   :  { %v827_v50 = vadd.f32 %v3620_v34, %v826_v49 }
 0x488   :  { %v829_v51 = vpop.f32.mrf.mxu0 }
 0x4c7   :  { %v640_v63 = vpop.xlane.xlu2 %639 }
 0x4c8   :  { %v650_v0 = vsub.f32 %v627_v48, %v640_v63  ;;  %v824_v48 = vadd.f32 %v3620_v34, %v823_v47 }
 0x4ca   :  { %v654_v1 = vmul.f32 1.442695, %v650_v0  ;;  %v3847_v0 = vmov 0  }
 0x4cb   :  { %3614 = vset.pattern.permute.xlu1 %v3847_v0  ;;  %3615 = vset.pattern.permute.xlu2 %v3847_v0 }
 0x4cc   :  { %3656 = vpow2.f32 %v654_v1  ;;  %3616 = vset.pattern.permute.xlu0 %v3847_v0 }
 0x4cf   :  { %v643_v5 = vpop.xlane.xlu0 %642 }
 0x4d0   :  { %v651_v20 = vsub.f32 %v630_v52, %v643_v5  ;;  %v830_v52 = vadd.f32 %v3620_v34, %v829_v51 }
 0x4d2   :  { %v3657_v21 = vpop.eup %3656  ;;  %v656_v22 = vmul.f32 1.442695, %v651_v20 }
 0x4d3   :  { %3418 = vmatmul.msk.f32.vlgmr.msra.gmra.mxu1 %vm89_vm1, %v3657_v21  ;;  %3426 = vmatmul.msk.f32.vlgmr.msra.gmra.mxu2 %vm89_vm1, %v3657_v21 }
 0x4d4   :  { %3658 = vpow2.f32 %v656_v22 }
 0x4d7   :  { %v646_v23 = vpop.xlane.xlu1 %645 }
 0x4d8   :  { %v652_v24 = vsub.f32 %v633_v56, %v646_v23 }
 0x4da   :  { %v3659_v25 = vpop.eup %3658  ;;  %v658_v26 = vmul.f32 1.442695, %v652_v24 }
 0x4db   :  { %3419 = vmatmul.msk.f32.gmra.mxu1 %vm89_vm1, %v3659_v25  ;;  %3427 = vmatmul.msk.f32.gmra.mxu2 %vm89_vm1, %v3659_v25 }
 0x4dc   :  { %3660 = vpow2.f32 %v658_v26 }
 0x4df   :  { %v649_v27 = vpop.xlane.xlu2 %648 }
 0x4e0   :  { %v653_v28 = vsub.f32 %v636_v60, %v649_v27 }
 0x4e2   :  { %v3661_v29 = vpop.eup %3660  ;;  %v660_v30 = vmul.f32 1.442695, %v653_v28 }
 0x4e3   :  { %3420 = vmatmul.msk.f32.gmra.mxu1 %vm89_vm1, %v3661_v29  ;;  %3428 = vmatmul.msk.f32.gmra.mxu2 %vm89_vm1, %v3661_v29 }
 0x4e4   :  { %3662 = vpow2.f32 %v660_v30 }
 0x4e5   :  { %3664 = vrcp.f32 %v4066_v8 }
 0x4e6   :  { %3666 = vrcp.f32 %v4174_v37 }
 0x4e7   :  { %3668 = vrcp.f32 %v4070_v10 }
 0x4ea   :  { %v3663_v33 = vpop.eup %3662 }
 0x4eb   :  { %3421 = vmatmul.msk.f32.gmra.mxu1 %vm89_vm1, %v3663_v33  ;;  %3429 = vmatmul.msk.f32.gmra.mxu2 %vm89_vm1, %v3663_v33  ;;  %v3665_v25 = vpop.eup %3664 }
 0x4f3   :  { %3438 = vmatmul.msk.f32.vlgmr.msrb.gmra.mxu1 %vm89_vm1, %v821_v36  ;;  %3446 = vmatmul.msk.f32.vlgmr.msrb.gmra.mxu2 %vm89_vm1, %v3921_v14 }
 0x4fb   :  { %3439 = vmatmul.msk.f32.gmra.mxu1 %vm89_vm1, %v824_v48  ;;  %3447 = vmatmul.msk.f32.gmra.mxu2 %vm89_vm1, %v3929_v16 }
 0x503   :  { %3440 = vmatmul.msk.f32.gmra.mxu1 %vm89_vm1, %v827_v50  ;;  %3448 = vmatmul.msk.f32.gmra.mxu2 %vm89_vm1, %v3927_v15 }
 0x50b   :  { %3441 = vmatmul.msk.f32.gmra.mxu1 %vm89_vm1, %v830_v52  ;;  %3449 = vmatmul.msk.f32.gmra.mxu2 %vm89_vm1, %v3935_v17 }
 0x550   :  { %v691_v53 = vpop.f32.mrf.mxu1 }
 0x551   :  { %3670 = vrcp.f32 %v691_v53 }
 0x552   :  { %3672 = vrcp.f32 %v4178_v40 }
 0x556   :  { %v4233_v54 = vpop.f32.mrf.mxu2 }
 0x558   :  { %v694_v55 = vpop.f32.mrf.mxu1 }
 0x559   :  { %3674 = vrcp.f32 %v694_v55  ;;  %v3848_v55 = vmov 0.03125  }
 0x55a   :  { %3676 = vrcp.f32 %v4182_v42  ;;  %1061 = vmatpush.msra.mxu1 %v3848_v55  ;;  %1130 = vmatpush.msrb.mxu3 %v3848_v55 }
 0x55b   :  { %3678 = vrcp.f32 %v4074_v12 }
 0x55c   :  { %3680 = vrcp.f32 %v4078_v19  ;;  %1062 = vmatpush.msra.mxu1 %v3848_v55  ;;  %1131 = vmatpush.msrb.mxu3 %v3848_v55 }
 0x55e   :  { %v4235_v56 = vpop.f32.mrf.mxu2  ;;  %1063 = vmatpush.msra.mxu1 %v3848_v55  ;;  %1132 = vmatpush.msrb.mxu3 %v3848_v55 }
 0x560   :  { %v4237_v57 = vpop.f32.mrf.mxu1  ;;  %1064 = vmatpush.msra.mxu1 %v3848_v55  ;;  %1133 = vmatpush.msrb.mxu3 %v3848_v55 }
 0x562   :  { %1522 = vmatpush.msrb.mxu1 %v3848_v55 }
 0x564   :  { %1523 = vmatpush.msrb.mxu1 %v3848_v55 }
 0x566   :  { %v4239_v58 = vpop.f32.mrf.mxu2  ;;  %1524 = vmatpush.msrb.mxu1 %v3848_v55 }
 0x568   :  { %v4241_v59 = vpop.f32.mrf.mxu1  ;;  %1525 = vmatpush.msrb.mxu1 %v3848_v55 }
 0x56e   :  { %v4243_v60 = vpop.f32.mrf.mxu2 }
 0x570   :  { %v861_v61 = vpop.f32.mrf.mxu1 }
 0x571   :  { %v862_v62 = vadd.f32 %v861_v61, %v3979_v31 }
 0x573   :  { %v873_v63 = vsel %vm89_vm1, %v862_v62, -inf }
 0x574   :  { %874 = vmax.xlane.f32.xlu0 %v873_v63 }
 0x576   :  { %v955_v1 = vpop.f32.mrf.mxu2 }
 0x578   :  { %v864_v2 = vpop.f32.mrf.mxu1 }
 0x579   :  { %v865_v3 = vadd.f32 %v864_v2, %v3986_v35 }
 0x57b   :  { %v876_v4 = vsel %vm89_vm1, %v865_v3, -inf }
 0x57c   :  { %877 = vmax.xlane.f32.xlu1 %v876_v4 }
 0x57e   :  { %v958_v5 = vpop.f32.mrf.mxu2 }
 0x580   :  { %v867_v6 = vpop.f32.mrf.mxu1 }
 0x581   :  { %v868_v20 = vadd.f32 %v867_v6, %v3993_v39  ;;  %v3667_v39 = vpop.eup %3666 }
 0x582   :  { %v3669_v26 = vpop.eup %3668 }
 0x583   :  { %v879_v31 = vsel %vm89_vm1, %v868_v20, -inf }
 0x584   :  { %880 = vmax.xlane.f32.xlu2 %v879_v31 }
 0x586   :  { %v961_v21 = vpop.f32.mrf.mxu2 }
 0x588   :  { %v870_v22 = vpop.f32.mrf.mxu1 }
 0x589   :  { %v871_v23 = vadd.f32 %v870_v22, %v4000_v43  ;;  %v3671_v43 = vpop.eup %3670 }
 0x58a   :  { %v3673_v8 = vpop.eup %3672 }
 0x58b   :  { %v882_v24 = vsel %vm89_vm1, %v871_v23, -inf  ;;  %v3675_v27 = vpop.eup %3674 }
 0x58c   :  { %883 = vmax.xlane.f32.xlu0 %v882_v24  ;;  %v3677_v37 = vpop.eup %3676 }
 0x58d   :  { %v3679_v10 = vpop.eup %3678 }
 0x58e   :  { %v964_v35 = vpop.f32.mrf.mxu2  ;;  %v3681_v28 = vpop.eup %3680 }
 0x58f   :  { %979 = vmatpush.msrb.mxu0 %v964_v35 }
 0x591   :  { %980 = vmatpush.msrb.mxu0 %v961_v21 }
 0x593   :  { %981 = vmatpush.msrb.mxu0 %v958_v5 }
 0x595   :  { %982 = vmatpush.msrb.mxu0 %v955_v1  ;;  %301 = vperm.xlu1 %3614, %v3665_v25  }
 0x59c   :  { %532 = vperm.xlu2 %3615, %v3667_v39  }
 0x59d   :  { %306 = vperm.xlu1 %3614, %v3669_v26  }
 0x5a0   :  { %767 = vperm.xlu0 %3616, %v3671_v43  }
 0x5a4   :  { %537 = vperm.xlu2 %3615, %v3673_v8  }
 0x5a5   :  { %772 = vperm.xlu1 %3614, %v3675_v27   ;;  %v3621_v27 = vld [vmem:[%s5127_s2 + $0x4] ss:$0 sm:$0xff] }
 0x5a8   :  { %542 = vperm.xlu0 %3616, %v3677_v37  }
 0x5ad   :  { %311 = vperm.xlu1 %3614, %v3679_v10  }
 0x5b0   :  { %316 = vperm.xlu0 %3616, %v3681_v28  }
 0x5e7   :  { %v875_v40 = vpop.xlane.xlu0 %874 }
 0x5e8   :  { %v885_v29 = vsub.f32 %v862_v62, %v875_v40 }
 0x5ea   :  { %v889_v30 = vmul.f32 1.442695, %v885_v29 }
 0x5ec   :  { %3682 = vpow2.f32 %v889_v30 }
 0x5ef   :  { %v878_v32 = vpop.xlane.xlu1 %877 }
 0x5f0   :  { %v886_v42 = vsub.f32 %v865_v3, %v878_v32 }
 0x5f2   :  { %v3683_v33 = vpop.eup %3682  ;;  %v891_v34 = vmul.f32 1.442695, %v886_v42 }
 0x5f3   :  { %3442 = vmatmul.msk.f32.vlgmr.msra.gmra.mxu3 %vm89_vm1, %v3683_v33  ;;  %3450 = vmatmul.msk.f32.vlgmr.msrb.gmra.mxu0 %vm89_vm1, %v3683_v33 }
 0x5f4   :  { %3684 = vpow2.f32 %v891_v34  ;;  %1591 = vmatpush.msra.mxu3 %v3848_v55 }
 0x5f6   :  { %1592 = vmatpush.msra.mxu3 %v3848_v55 }
 0x5f7   :  { %v881_v12 = vpop.xlane.xlu2 %880 }
 0x5f8   :  { %v887_v36 = vsub.f32 %v868_v20, %v881_v12  ;;  %1593 = vmatpush.msra.mxu3 %v3848_v55 }
 0x5fa   :  { %v3685_v19 = vpop.eup %3684  ;;  %v893_v47 = vmul.f32 1.442695, %v887_v36  ;;  %1594 = vmatpush.msra.mxu3 %v3848_v55 }
 0x5fb   :  { %3443 = vmatmul.msk.f32.gmra.mxu3 %vm89_vm1, %v3685_v19  ;;  %3451 = vmatmul.msk.f32.gmra.mxu0 %vm89_vm1, %v3685_v19 }
 0x5fc   :  { %3686 = vpow2.f32 %v893_v47 }
 0x5ff   :  { %v884_v48 = vpop.xlane.xlu0 %883 }
 0x600   :  { %v888_v49 = vsub.f32 %v871_v23, %v884_v48 }
 0x602   :  { %v3687_v50 = vpop.eup %3686  ;;  %v895_v51 = vmul.f32 1.442695, %v888_v49 }
 0x603   :  { %3444 = vmatmul.msk.f32.gmra.mxu3 %vm89_vm1, %v3687_v50  ;;  %3452 = vmatmul.msk.f32.gmra.mxu0 %vm89_vm1, %v3687_v50 }
 0x604   :  { %3688 = vpow2.f32 %v895_v51 }
 0x607   :  { %v302_v20 = vpop.permute.xlu1 %301 }
 0x608   :  { %v319_v23 = vmul.f32 %v302_v20, %v4064_v7 }
 0x60a   :  { %v3689_v52 = vpop.eup %3688 }
 0x60b   :  { %3445 = vmatmul.msk.f32.gmra.mxu3 %vm89_vm1, %v3689_v52  ;;  %3453 = vmatmul.msk.f32.gmra.mxu0 %vm89_vm1, %v3689_v52 }
 0x60f   :  { %v307_v21 = vpop.permute.xlu1 %306 }
 0x610   :  { %v320_v8 = vmul.f32 %v307_v21, %v4068_v9 }
 0x612   :  { %v768_v22 = vpop.permute.xlu0 %767 }
 0x617   :  { %v773_v43 = vpop.permute.xlu1 %772 }
 0x618   :  { %v786_v7 = vmul.f32 %v773_v43, %v4235_v56 }
 0x61f   :  { %v312_v56 = vpop.permute.xlu1 %311 }
 0x620   :  { %v321_v34 = vmul.f32 %v312_v56, %v4072_v11 }
 0x670   :  { %v984_v24 = vpop.f32.mrf.mxu0 }
 0x676   :  { %v926_v53 = vpop.f32.mrf.mxu3 }
 0x677   :  { %3690 = vrcp.f32 %v926_v53 }
 0x678   :  { %v987_v40 = vpop.f32.mrf.mxu0 }
 0x67d   :  { %v3691_v61 = vpop.eup %3690 }
 0x67e   :  { %1002 = vperm.xlu2 %3615, %v3691_v61   ;;  %v929_v62 = vpop.f32.mrf.mxu3 }
 0x67f   :  { %3692 = vrcp.f32 %v929_v62 }
 0x680   :  { %3694 = vrcp.f32 %v4237_v57  ;;  %v533_v57 = vpop.permute.xlu2 %532  ;;  %v990_v47 = vpop.f32.mrf.mxu0 }
 0x685   :  { %v3693_v63 = vpop.eup %3692 }
 0x686   :  { %1007 = vperm.xlu2 %3615, %v3693_v63   ;;  %v932_v0 = vpop.f32.mrf.mxu3  ;;  %v3695_v1 = vpop.eup %3694 }
 0x687   :  { %3696 = vrcp.f32 %v932_v0 }
 0x688   :  { %3698 = vrcp.f32 %v4186_v45  ;;  %v538_v31 = vpop.permute.xlu2 %537  ;;  %v550_v45 = vmul.f32 %v533_v57, %v4176_v38 }
 0x689   :  { %3700 = vrcp.f32 %v4241_v59  ;;  %v785_v59 = vmul.f32 %v768_v22, %v4233_v54  ;;  %v551_v10 = vmul.f32 %v538_v31, %v4180_v41 }
 0x68a   :  { %v554_v35 = vadd.f32 %v550_v45, %v319_v23 }
 0x68b   :  { %v555_v54 = vadd.f32 %v551_v10, %v320_v8 }
 0x68c   :  { %v789_v39 = vadd.f32 %v785_v59, %v554_v35 }
 0x68d   :  { %v3697_v2 = vpop.eup %3696  ;;  %v790_v30 = vadd.f32 %v786_v7, %v555_v54 }
 0x68e   :  { %777 = vperm.xlu2 %3615, %v3695_v1   ;;  %1012 = vperm.xlu1 %3614, %v3697_v2   ;;  %v935_v3 = vpop.f32.mrf.mxu3  ;;  %v3699_v4 = vpop.eup %3698 }
 0x68f   :  { %3702 = vrcp.f32 %v935_v3  ;;  %v3701_v5 = vpop.eup %3700  ;;  %v993_v1 = vpop.f32.mrf.mxu0 }
 0x695   :  { %v3703_v6 = vpop.eup %3702 }
 0x696   :  { %782 = vperm.xlu1 %3614, %v3701_v5   ;;  %547 = vperm.xlu2 %3615, %v3699_v4  }
 0x697   :  { %1017 = vperm.xlu0 %3616, %v3703_v6  }
 0x6d8   :  { %v1003_v25 = vpop.permute.xlu2 %1002 }
 0x6d9   :  { %v1020_v26 = vmul.f32 %v1003_v25, %v984_v24 }
 0x6db   :  { %v1024_v37 = vadd.f32 %v1020_v26, %v789_v39 }
 0x6dd   :  { %v1028_v38 = vadd.f32 %v1024_v37, %v3921_v14  ;;  %v543_v14 = vpop.permute.xlu0 %542 }
 0x6de   :  { %v552_v12 = vmul.f32 %v543_v14, %v4184_v44  ;;  %v1224_v14 = vld [vmem:[%s5126_s1 + $0x168] sm:$0xff] }
 0x6df   :  { %v1033_v28 = vadd.f32 %v3621_v27, %v1028_v38  ;;  %1258 = vmatpush.msra.mxu2 %v1224_v14  ;;  %v1226_v14 = vld [vmem:[%s5126_s1 + $0x178] sm:$0xff] }
 0x6e0   :  { %v1008_v29 = vpop.permute.xlu2 %1007  ;;  %v556_v19 = vadd.f32 %v552_v12, %v321_v34 }
 0x6e1   :  { %v1021_v32 = vmul.f32 %v1008_v29, %v987_v40  ;;  %3454 = vmatmul.msk.f32.vlgmr.msra.gmra.mxu1 %vm89_vm1, %v1033_v28 }
 0x6e2   :  { %1829 = vmatpush.msra.mxu1 %v3846_v13 }
 0x6e3   :  { %v1025_v9 = vadd.f32 %v1021_v32, %v790_v30 }
 0x6e4   :  { %1830 = vmatpush.msra.mxu1 %v3846_v13 }
 0x6e5   :  { %v1029_v42 = vadd.f32 %v1025_v9, %v3929_v16  ;;  %v317_v16 = vpop.permute.xlu0 %316 }
 0x6e6   :  { %1831 = vmatpush.msra.mxu1 %v3846_v13  ;;  %v322_v62 = vmul.f32 %v317_v16, %v4076_v18 }
 0x6e7   :  { %v1034_v41 = vadd.f32 %v3621_v27, %v1029_v42 }
 0x6e8   :  { %1832 = vmatpush.msra.mxu1 %v3846_v13  ;;  %v778_v33 = vpop.permute.xlu2 %777 }
 0x6e9   :  { %3455 = vmatmul.msk.f32.gmra.mxu1 %vm89_vm1, %v1034_v41  ;;  %v787_v36 = vmul.f32 %v778_v33, %v4239_v58 }
 0x6eb   :  { %v791_v49 = vadd.f32 %v787_v36, %v556_v19 }
 0x6f0   :  { %v548_v51 = vpop.permute.xlu2 %547 }
 0x6f1   :  { %v553_v53 = vmul.f32 %v548_v51, %v4188_v46 }
 0x6f3   :  { %v557_v0 = vadd.f32 %v553_v53, %v322_v62 }
 0x700   :  { %v1013_v48 = vpop.permute.xlu1 %1012 }
 0x701   :  { %v1022_v50 = vmul.f32 %v1013_v48, %v990_v47 }
 0x703   :  { %v1026_v52 = vadd.f32 %v1022_v50, %v791_v49 }
 0x705   :  { %v1030_v61 = vadd.f32 %v1026_v52, %v3927_v15 }
 0x707   :  { %v1035_v63 = vadd.f32 %v3621_v27, %v1030_v61 }
 0x708   :  { %v783_v11 = vpop.permute.xlu1 %782 }
 0x709   :  { %v788_v44 = vmul.f32 %v783_v11, %v4243_v60  ;;  %v1018_v58 = vpop.permute.xlu0 %1017  ;;  %3456 = vmatmul.msk.f32.gmra.mxu1 %vm89_vm1, %v1035_v63 }
 0x70a   :  { %v1023_v3 = vmul.f32 %v1018_v58, %v993_v1  ;;  %v1221_v58 = vld [vmem:[%s5126_s1 + $0x150] sm:$0xff]  ;;  %v3622_v1 = vld [vmem:[%s5127_s2 + $0x7] ss:$0 sm:$0xff] }
 0x70b   :  { %v792_v2 = vadd.f32 %v788_v44, %v557_v0  ;;  %v1223_v0 = vld [vmem:[%s5126_s1 + $0x160] sm:$0xff]  ;;  %v1222_v44 = vld [vmem:[%s5126_s1 + $0x158] sm:$0xff] }
 0x70c   :  { %1259 = vmatpush.msra.mxu2 %v1223_v0 }
 0x70d   :  { %v1027_v4 = vadd.f32 %v1023_v3, %v792_v2  ;;  %v3623_v3 = vld [vmem:[%s5127_s2 + $0x8] ss:$0 sm:$0xff] }
 0x70e   :  { %1260 = vmatpush.msra.mxu2 %v1222_v44 }
 0x70f   :  { %v1031_v5 = vadd.f32 %v1027_v4, %v3935_v17 }
 0x710   :  { %1261 = vmatpush.msra.mxu2 %v1221_v58 }
 0x711   :  { %v1036_v6 = vadd.f32 %v3621_v27, %v1031_v5 }
 0x713   :  { %3457 = vmatmul.msk.f32.gmra.mxu1 %vm89_vm1, %v1036_v6 }
 0x75e   :  { %v1066_v15 = vpop.f32.mrf.mxu1 }
 0x75f   :  { %1080 = vperm.xlu2 %3615, %v1066_v15  }
 0x766   :  { %v1069_v18 = vpop.f32.mrf.mxu1 }
 0x767   :  { %1085 = vperm.xlu1 %3614, %v1069_v18  }
 0x786   :  { %v1072_v46 = vpop.f32.mrf.mxu1 }
 0x787   :  { %1090 = vperm.xlu0 %3616, %v1072_v46  }
 0x790   :  { %v1075_v57 = vpop.f32.mrf.mxu1 }
 0x791   :  { %1095 = vperm.xlu2 %3615, %v1075_v57  }
 0x7b9   :  { %v1081_v60 = vpop.permute.xlu2 %1080 }
 0x7ba   :  { %v4314_v20 = vsub.f32 %v1033_v28, %v1081_v60 }
 0x7bc   :  { %v1102_v31 = vmul.f32 %v4314_v20, %v4314_v20 }
 0x7be   :  { %3458 = vmatmul.msk.f32.vlgmr.msrb.gmra.mxu3 %vm89_vm1, %v1102_v31 }
 0x7d9   :  { %v1086_v17 = vpop.permute.xlu1 %1085 }
 0x7da   :  { %v4319_v21 = vsub.f32 %v1034_v41, %v1086_v17 }
 0x7dc   :  { %v1103_v22 = vmul.f32 %v4319_v21, %v4319_v21 }
 0x7de   :  { %3459 = vmatmul.msk.f32.gmra.mxu3 %vm89_vm1, %v1103_v22 }
 0x7eb   :  { %v1096_v24 = vpop.permute.xlu2 %1095 }
 0x7ec   :  { %v4329_v35 = vsub.f32 %v1036_v6, %v1096_v24  ;;  %v4375_v24 = vld [vmem:[%s5127_s2 + $0x5] ss:$0 sm:$0xff] }
 0x7ee   :  { %v1105_v25 = vmul.f32 %v4329_v35, %v4329_v35 }
 0x7f9   :  { %v1091_v23 = vpop.permute.xlu0 %1090 }
 0x7fa   :  { %v4324_v45 = vsub.f32 %v1035_v63, %v1091_v23 }
 0x7fc   :  { %v1104_v59 = vmul.f32 %v4324_v45, %v4324_v45 }
 0x7fe   :  { %3460 = vmatmul.msk.f32.gmra.mxu3 %vm89_vm1, %v1104_v59 }
 0x806   :  { %3461 = vmatmul.msk.f32.gmra.mxu3 %vm89_vm1, %v1105_v25 }
 0x841   :  { %v1135_v39 = vpop.f32.mrf.mxu3 }
 0x842   :  { %v1136_v26 = vadd.f32 1e-05, %v1135_v39 }
 0x844   :  { %3704 = vrsqrt.f32 %v1136_v26  ;;  %vm1153_vm3 = vweird.f32 %v1136_v26 }
 0x84a   :  { %v3705_v43 = vpop.eup %3704 }
 0x84b   :  { %v1148_v8 = vmul.f32 %v3705_v43, %v1136_v26  ;;  %vm1154_vm2 = vweird.f32 %v3705_v43 }
 0x84c   :  { %vm1155_vm4 = vmor %vm1153_vm3, %vm1154_vm2  ;;  %vm1452_vm3 = vcmask 523264  }
 0x84d   :  { %v1149_v27 = vmul.f32 %v3705_v43, %v1148_v8 }
 0x84f   :  { %v1150_v37 = vmul.f32 0.5, %v1149_v27 }
 0x851   :  { %v1151_v10 = vsub.f32 1.5, %v1150_v37  ;;  %v1231_v37 = vld [vmem:[%s5126_s1 + $0x1a0] sm:$0xff] }
 0x853   :  { %v1152_v7 = vmul.f32 %v3705_v43, %v1151_v10 }
 0x855   :  { %v1156_v38 = vsel %vm1155_vm4, %v3705_v43, %v1152_v7 }
 0x856   :  { %1189 = vperm.xlu1 %3614, %v1156_v38   ;;  %v1230_v38 = vld [vmem:[%s5126_s1 + $0x198] sm:$0xff] }
 0x861   :  { %v1138_v54 = vpop.f32.mrf.mxu3 }
 0x862   :  { %v1139_v28 = vadd.f32 1e-05, %v1138_v54 }
 0x864   :  { %3706 = vrsqrt.f32 %v1139_v28  ;;  %vm1163_vm6 = vweird.f32 %v1139_v28 }
 0x86a   :  { %v3707_v40 = vpop.eup %3706 }
 0x86b   :  { %v1158_v29 = vmul.f32 %v3707_v40, %v1139_v28  ;;  %vm1164_vm5 = vweird.f32 %v3707_v40 }
 0x86c   :  { %vm1165_vm7 = vmor %vm1163_vm6, %vm1164_vm5 }
 0x86d   :  { %v1159_v30 = vmul.f32 %v3707_v40, %v1158_v29 }
 0x86f   :  { %v1160_v32 = vmul.f32 0.5, %v1159_v30  ;;  %v1228_v30 = vld [vmem:[%s5126_s1 + $0x188] sm:$0xff] }
 0x871   :  { %v1161_v9 = vsub.f32 1.5, %v1160_v32 }
 0x873   :  { %v1162_v42 = vmul.f32 %v3707_v40, %v1161_v9 }
 0x875   :  { %v1166_v41 = vsel %vm1165_vm7, %v3707_v40, %v1162_v42  ;;  %v1229_v40 = vld [vmem:[%s5126_s1 + $0x190] sm:$0xff]  ;;  %v1227_v42 = vld [vmem:[%s5126_s1 + $0x180] sm:$0xff] }
 0x876   :  { %1194 = vperm.xlu0 %3616, %v1166_v41  }
 0x881   :  { %v1141_v56 = vpop.f32.mrf.mxu3 }
 0x882   :  { %v1142_v33 = vadd.f32 1e-05, %v1141_v56 }
 0x884   :  { %3708 = vrsqrt.f32 %v1142_v33  ;;  %vm1173_vm9 = vweird.f32 %v1142_v33 }
 0x889   :  { %v1144_v34 = vpop.f32.mrf.mxu3 }
 0x88a   :  { %v3709_v12 = vpop.eup %3708  ;;  %v1145_v36 = vadd.f32 1e-05, %v1144_v34  ;;  %v1225_v34 = vld [vmem:[%s5126_s1 + $0x170] sm:$0xff] }
 0x88b   :  { %v1168_v19 = vmul.f32 %v3709_v12, %v1142_v33  ;;  %vm1174_vm8 = vweird.f32 %v3709_v12 }
 0x88c   :  { %3710 = vrsqrt.f32 %v1145_v36  ;;  %vm1175_vm10 = vmor %vm1173_vm9, %vm1174_vm8  ;;  %vm1183_vm12 = vweird.f32 %v1145_v36 }
 0x88d   :  { %v1169_v47 = vmul.f32 %v3709_v12, %v1168_v19 }
 0x88f   :  { %v1170_v48 = vmul.f32 0.5, %v1169_v47 }
 0x891   :  { %v1171_v16 = vsub.f32 1.5, %v1170_v48 }
 0x892   :  { %v3711_v49 = vpop.eup %3710 }
 0x893   :  { %v1178_v50 = vmul.f32 %v3711_v49, %v1145_v36  ;;  %v1172_v51 = vmul.f32 %v3709_v12, %v1171_v16  ;;  %vm1184_vm11 = vweird.f32 %v3711_v49 }
 0x894   :  { %vm1185_vm13 = vmor %vm1183_vm12, %vm1184_vm11 }
 0x895   :  { %v1179_v52 = vmul.f32 %v3711_v49, %v1178_v50  ;;  %v1176_v53 = vsel %vm1175_vm10, %v3709_v12, %v1172_v51 }
 0x896   :  { %1199 = vperm.xlu2 %3615, %v1176_v53  }
 0x897   :  { %v1180_v61 = vmul.f32 0.5, %v1179_v52 }
 0x899   :  { %v1181_v62 = vsub.f32 1.5, %v1180_v61 }
 0x89b   :  { %v1182_v63 = vmul.f32 %v3711_v49, %v1181_v62 }
 0x89d   :  { %v1186_v11 = vsel %vm1185_vm13, %v3711_v49, %v1182_v63 }
 0x89e   :  { %1204 = vperm.xlu1 %3614, %v1186_v11  }
 0x8c8   :  { %v1190_v2 = vpop.permute.xlu1 %1189 }
 0x8c9   :  { %v1207_v4 = vmul.f32 %v1190_v2, %v4314_v20 }
 0x8cb   :  { %v1212_v5 = vmul.f32 %v3622_v1, %v1207_v4 }
 0x8cd   :  { %v4353_v6 = vadd.f32 %v3623_v3, %v1212_v5 }
 0x8cf   :  { %3462 = vmatmul.msk.f32.vlgmr.msra.gmra.mxu2 %vm89_vm1, %v4353_v6 }
 0x8e8   :  { %v1195_v15 = vpop.permute.xlu0 %1194 }
 0x8e9   :  { %v1208_v18 = vmul.f32 %v1195_v15, %v4319_v21 }
 0x8eb   :  { %v1213_v46 = vmul.f32 %v3622_v1, %v1208_v18 }
 0x8ed   :  { %v4358_v57 = vadd.f32 %v3623_v3, %v1213_v46 }
 0x8ef   :  { %3463 = vmatmul.msk.f32.gmra.mxu2 %vm89_vm1, %v4358_v57 }
 0x8f0   :  { %v1200_v60 = vpop.permute.xlu2 %1199 }
 0x8f1   :  { %v1209_v31 = vmul.f32 %v1200_v60, %v4324_v45 }
 0x8f3   :  { %v1214_v17 = vmul.f32 %v3622_v1, %v1209_v31 }
 0x8f5   :  { %v4363_v20 = vadd.f32 %v3623_v3, %v1214_v17 }
 0x8f7   :  { %3464 = vmatmul.msk.f32.gmra.mxu2 %vm89_vm1, %v4363_v20 }
 0x910   :  { %v1205_v22 = vpop.permute.xlu1 %1204 }
 0x911   :  { %v1210_v23 = vmul.f32 %v1205_v22, %v4329_v35  ;;  %v1232_v35 = vld [vmem:[%s5126_s1 + $0x1a8] sm:$0xff] }
 0x912   :  { %1473 = vmatpush.msra.mxu0 %v1232_v35 }
 0x913   :  { %v1215_v59 = vmul.f32 %v3622_v1, %v1210_v23 }
 0x914   :  { %1474 = vmatpush.msra.mxu0 %v1231_v37 }
 0x915   :  { %v4368_v21 = vadd.f32 %v3623_v3, %v1215_v59 }
 0x916   :  { %1475 = vmatpush.msra.mxu0 %v1230_v38 }
 0x917   :  { %3465 = vmatmul.msk.f32.gmra.mxu2 %vm89_vm1, %v4368_v21 }
 0x918   :  { %1476 = vmatpush.msra.mxu0 %v1229_v40 }
 0x91a   :  { %1477 = vmatpush.msra.mxu0 %v1228_v30 }
 0x91c   :  { %1478 = vmatpush.msra.mxu0 %v1227_v42 }
 0x91e   :  { %1479 = vmatpush.msra.mxu0 %v1226_v14 }
 0x920   :  { %1480 = vmatpush.msra.mxu0 %v1225_v34 }
 0x952   :  { %v1263_v45 = vpop.f32.mrf.mxu2 }
 0x953   :  { %v4378_v25 = vadd.f32 %v4375_v24, %v1263_v45 }
 0x955   :  { %v1279_v39 = vmul.f32 0.70710677, %v4378_v25  ;;  %v1275_v38 = vmul.f32 0.5, %v4378_v25 }
 0x957   :  { %v1283_v26 = vmul.f32 %v1279_v39, %v1279_v39 }
 0x959   :  { %v1284_v43 = vmin.f32 %v1283_v26, 16.0 }
 0x95b   :  { %v1285_v8 = vmul.f32 2.1237322e-06, %v1284_v43  ;;  %v1296_v27 = vmul.f32 3.8918573e-05, %v1284_v43 }
 0x95d   :  { %v1286_v10 = vadd.f32 0.00028619796, %v1285_v8  ;;  %v1297_v7 = vadd.f32 0.001143296, %v1296_v27 }
 0x95f   :  { %v1287_v54 = vmul.f32 %v1286_v10, %v1284_v43  ;;  %v1298_v28 = vmul.f32 %v1297_v7, %v1284_v43 }
 0x961   :  { %v1299_v29 = vadd.f32 0.014752088, %v1298_v28  ;;  %v1288_v32 = vadd.f32 0.0036580483, %v1287_v54 }
 0x963   :  { %v1300_v9 = vmul.f32 %v1299_v29, %v1284_v43  ;;  %v1289_v56 = vmul.f32 %v1288_v32, %v1284_v43 }
 0x965   :  { %v1301_v41 = vadd.f32 0.112945676, %v1300_v9  ;;  %v1290_v36 = vadd.f32 0.05243302, %v1289_v56 }
 0x967   :  { %v1302_v33 = vmul.f32 %v1301_v41, %v1284_v43  ;;  %v1291_v48 = vmul.f32 %v1290_v36, %v1284_v43 }
 0x969   :  { %v1303_v12 = vadd.f32 0.4994258, %v1302_v33  ;;  %v1292_v16 = vadd.f32 0.18741608, %v1291_v48 }
 0x96b   :  { %v1304_v19 = vmul.f32 %v1303_v12, %v1284_v43  ;;  %v1293_v53 = vmul.f32 %v1292_v16, %v1284_v43 }
 0x96d   :  { %v1305_v47 = vadd.f32 1.0, %v1304_v19  ;;  %v1294_v44 = vadd.f32 1.1283791, %v1293_v53 }
 0x96f   :  { %3712 = vrcp.f32 %v1305_v47  ;;  %v1317_v11 = vand.u32 2147483648, %v1305_v47  ;;  %v1315_v1 = vand.u32 2147483647, %v1305_v47  ;;  %vm1311_vm15 = vweird.f32 %v1305_v47 }
 0x970   :  { %v1295_v31 = vmul.f32 %v1294_v44, %v1279_v39 }
 0x971   :  { %v1318_v18 = vor.u32 1.1754944e-38, %v1317_v11  ;;  %vm1316_vm2 = vcmp.eq.f32.partialorder %v1315_v1, 8.507059e+37 }
 0x972   :  { %v1266_v49 = vpop.f32.mrf.mxu2 }
 0x973   :  { %v4406_v50 = vadd.f32 %v4375_v24, %v1266_v49 }
 0x975   :  { %v3713_v51 = vpop.eup %3712  ;;  %v4409_v52 = vmul.f32 0.70710677, %v4406_v50 }
 0x976   :  { %v1307_v61 = vmul.f32 %v3713_v51, %v1305_v47  ;;  %vm1312_vm14 = vweird.f32 %v3713_v51 }
 0x977   :  { %v1323_v62 = vmul.f32 %v4409_v52, %v4409_v52  ;;  %vm1313_vm0 = vmor %vm1311_vm15, %vm1312_vm14 }
 0x978   :  { %v1308_v63 = vsub.f32 1.0, %v1307_v61 }
 0x979   :  { %v1324_v0 = vmin.f32 %v1323_v62, 16.0 }
 0x97a   :  { %v1309_v58 = vmul.f32 %v3713_v51, %v1308_v63  ;;  %v1269_v2 = vpop.f32.mrf.mxu2 }
 0x97b   :  { %v1325_v3 = vmul.f32 2.1237322e-06, %v1324_v0  ;;  %v4414_v4 = vadd.f32 %v4375_v24, %v1269_v2  ;;  %v1336_v5 = vmul.f32 3.8918573e-05, %v1324_v0 }
 0x97c   :  { %v1310_v15 = vadd.f32 %v3713_v51, %v1309_v58 }
 0x97d   :  { %v1326_v46 = vadd.f32 0.00028619796, %v1325_v3  ;;  %v4417_v60 = vmul.f32 0.70710677, %v4414_v4  ;;  %v1337_v22 = vadd.f32 0.001143296, %v1336_v5 }
 0x97e   :  { %v1314_v17 = vsel %vm1313_vm0, %v3713_v51, %v1310_v15 }
 0x97f   :  { %v1319_v23 = vsel %vm1316_vm2, %v1318_v18, %v1314_v17  ;;  %v1327_v59 = vmul.f32 %v1326_v46, %v1324_v0  ;;  %v1363_v45 = vmul.f32 %v4417_v60, %v4417_v60  ;;  %v1338_v43 = vmul.f32 %v1337_v22, %v1324_v0 }
 0x980   :  { %v1320_v26 = vmul.f32 %v1319_v23, %v1295_v31 }
 0x981   :  { %v1364_v35 = vmin.f32 %v1363_v45, 16.0  ;;  %v1328_v27 = vadd.f32 0.0036580483, %v1327_v59  ;;  %v1339_v37 = vadd.f32 0.014752088, %v1338_v43 }
 0x982   :  { %v3466_v8 = vclamps-f32 %v1320_v26, 1.0 }
 0x983   :  { %v1365_v10 = vmul.f32 2.1237322e-06, %v1364_v35  ;;  %v1376_v7 = vmul.f32 3.8918573e-05, %v1364_v35  ;;  %v1340_v39 = vmul.f32 %v1339_v37, %v1324_v0  ;;  %v1329_v30 = vmul.f32 %v1328_v27, %v1324_v0 }
 0x984   :  { %v1443_v54 = vadd.f32 1.0, %v3466_v8 }
 0x985   :  { %v1366_v28 = vadd.f32 0.00028619796, %v1365_v10  ;;  %v1377_v40 = vadd.f32 0.001143296, %v1376_v7  ;;  %v1341_v32 = vadd.f32 0.112945676, %v1340_v39 }
 0x986   :  { %v1447_v29 = vmul.f32 %v1443_v54, %v1275_v38  ;;  %v1330_v56 = vadd.f32 0.05243302, %v1329_v30 }
 0x987   :  { %v1367_v9 = vmul.f32 %v1366_v28, %v1364_v35  ;;  %v1378_v42 = vmul.f32 %v1377_v40, %v1364_v35  ;;  %v1342_v41 = vmul.f32 %v1341_v32, %v1324_v0 }
 0x988   :  { %3470 = vmatmul.msk.f32.vlgmr.msra.gmra.mxu0 %vm1452_vm3, %v1447_v29  ;;  %v1331_v19 = vmul.f32 %v1330_v56, %v1324_v0  ;;  %v1276_v29 = vmul.f32 0.5, %v4406_v50 }
 0x989   :  { %v1379_v14 = vadd.f32 0.014752088, %v1378_v42  ;;  %v1368_v33 = vadd.f32 0.0036580483, %v1367_v9  ;;  %v1343_v34 = vadd.f32 0.4994258, %v1342_v41 }
 0x98a   :  { %v1332_v51 = vadd.f32 0.18741608, %v1331_v19 }
 0x98b   :  { %v1380_v12 = vmul.f32 %v1379_v14, %v1364_v35  ;;  %v1344_v36 = vmul.f32 %v1343_v34, %v1324_v0  ;;  %v1369_v47 = vmul.f32 %v1368_v33, %v1364_v35 }
 0x98c   :  { %v1333_v11 = vmul.f32 %v1332_v51, %v1324_v0 }
 0x98d   :  { %v1381_v25 = vadd.f32 0.112945676, %v1380_v12  ;;  %v1345_v48 = vadd.f32 1.0, %v1344_v36  ;;  %v1370_v53 = vadd.f32 0.05243302, %v1369_v47 }
 0x98e   :  { %v1334_v2 = vadd.f32 1.1283791, %v1333_v11 }
 0x98f   :  { %v1382_v16 = vmul.f32 %v1381_v25, %v1364_v35  ;;  %3714 = vrcp.f32 %v1345_v48  ;;  %v1371_v44 = vmul.f32 %v1370_v53, %v1364_v35  ;;  %v1357_v15 = vand.u32 2147483648, %v1345_v48 }
 0x990   :  { %v1355_v31 = vand.u32 2147483647, %v1345_v48  ;;  %vm1351_vm5 = vweird.f32 %v1345_v48  ;;  %v1335_v26 = vmul.f32 %v1334_v2, %v4409_v52 }
 0x991   :  { %v1383_v49 = vadd.f32 0.4994258, %v1382_v16  ;;  %v1372_v3 = vadd.f32 0.18741608, %v1371_v44  ;;  %v1358_v59 = vor.u32 1.1754944e-38, %v1357_v15 }
 0x992   :  { %vm1356_vm7 = vcmp.eq.f32.partialorder %v1355_v31, 8.507059e+37 }
 0x993   :  { %v1384_v61 = vmul.f32 %v1383_v49, %v1364_v35  ;;  %v1373_v0 = vmul.f32 %v1372_v3, %v1364_v35 }
 0x995   :  { %v1385_v62 = vadd.f32 1.0, %v1384_v61  ;;  %v3715_v63 = vpop.eup %3714  ;;  %v1374_v38 = vadd.f32 1.1283791, %v1373_v0 }
 0x996   :  { %v1347_v58 = vmul.f32 %v3715_v63, %v1345_v48  ;;  %vm1352_vm4 = vweird.f32 %v3715_v63  ;;  %v1277_v48 = vmul.f32 0.5, %v4414_v4 }
 0x997   :  { %3716 = vrcp.f32 %v1385_v62  ;;  %vm1353_vm6 = vmor %vm1351_vm5, %vm1352_vm4  ;;  %v1397_v7 = vand.u32 2147483648, %v1385_v62  ;;  %v1395_v39 = vand.u32 2147483647, %v1385_v62  ;;  %vm1391_vm9 = vweird.f32 %v1385_v62 }
 0x998   :  { %v1348_v1 = vsub.f32 1.0, %v1347_v58  ;;  %v1375_v41 = vmul.f32 %v1374_v38, %v4417_v60 }
 0x999   :  { %v1398_v42 = vor.u32 1.1754944e-38, %v1397_v7  ;;  %vm1396_vm11 = vcmp.eq.f32.partialorder %v1395_v39, 8.507059e+37 }
 0x99a   :  { %v1272_v5 = vpop.f32.mrf.mxu2  ;;  %v1349_v46 = vmul.f32 %v3715_v63, %v1348_v1 }
 0x99b   :  { %v4424_v18 = vadd.f32 %v4375_v24, %v1272_v5 }
 0x99c   :  { %v1350_v23 = vadd.f32 %v3715_v63, %v1349_v46 }
 0x99d   :  { %v3717_v17 = vpop.eup %3716  ;;  %v4427_v22 = vmul.f32 0.70710677, %v4424_v18 }
 0x99e   :  { %v1387_v45 = vmul.f32 %v3717_v17, %v1385_v62  ;;  %v1354_v24 = vsel %vm1353_vm6, %v3715_v63, %v1350_v23  ;;  %vm1392_vm8 = vweird.f32 %v3717_v17 }
 0x99f   :  { %v1403_v43 = vmul.f32 %v4427_v22, %v4427_v22  ;;  %v1359_v8 = vsel %vm1356_vm7, %v1358_v59, %v1354_v24  ;;  %vm1393_vm10 = vmor %vm1391_vm9, %vm1392_vm8  ;;  %v1278_v24 = vmul.f32 0.5, %v4424_v18 }
 0x9a0   :  { %v1388_v27 = vsub.f32 1.0, %v1387_v45  ;;  %v1360_v10 = vmul.f32 %v1359_v8, %v1335_v26 }
 0x9a1   :  { %v1404_v37 = vmin.f32 %v1403_v43, 16.0 }
 0x9a2   :  { %v1389_v54 = vmul.f32 %v3717_v17, %v1388_v27  ;;  %v3467_v40 = vclamps-f32 %v1360_v10, 1.0 }
 0x9a3   :  { %v1405_v35 = vmul.f32 2.1237322e-06, %v1404_v37  ;;  %v1416_v28 = vmul.f32 3.8918573e-05, %v1404_v37 }
 0x9a4   :  { %v1390_v52 = vadd.f32 %v3717_v17, %v1389_v54  ;;  %v1444_v9 = vadd.f32 1.0, %v3467_v40 }
 0x9a5   :  { %v1406_v30 = vadd.f32 0.00028619796, %v1405_v35  ;;  %v1417_v32 = vadd.f32 0.001143296, %v1416_v28 }
 0x9a6   :  { %v1394_v14 = vsel %vm1393_vm10, %v3717_v17, %v1390_v52  ;;  %v1448_v34 = vmul.f32 %v1444_v9, %v1276_v29 }
 0x9a7   :  { %v1407_v56 = vmul.f32 %v1406_v30, %v1404_v37  ;;  %v1418_v33 = vmul.f32 %v1417_v32, %v1404_v37  ;;  %v1399_v12 = vsel %vm1396_vm11, %v1398_v42, %v1394_v14 }
 0x9a8   :  { %v1400_v36 = vmul.f32 %v1399_v12, %v1375_v41  ;;  %3471 = vmatmul.msk.f32.gmra.mxu0 %vm1452_vm3, %v1448_v34 }
 0x9a9   :  { %v1419_v25 = vadd.f32 0.014752088, %v1418_v33  ;;  %v1408_v50 = vadd.f32 0.0036580483, %v1407_v56 }
 0x9aa   :  { %v3468_v19 = vclamps-f32 %v1400_v36, 1.0 }
 0x9ab   :  { %v1420_v47 = vmul.f32 %v1419_v25, %v1404_v37  ;;  %v1409_v51 = vmul.f32 %v1408_v50, %v1404_v37 }
 0x9ac   :  { %v1445_v16 = vadd.f32 1.0, %v3468_v19 }
 0x9ad   :  { %v1421_v49 = vadd.f32 0.112945676, %v1420_v47  ;;  %v1410_v62 = vadd.f32 0.05243302, %v1409_v51 }
 0x9ae   :  { %v1449_v53 = vmul.f32 %v1445_v16, %v1277_v48 }
 0x9af   :  { %v1422_v60 = vmul.f32 %v1421_v49, %v1404_v37  ;;  %v1411_v44 = vmul.f32 %v1410_v62, %v1404_v37 }
 0x9b0   :  { %3472 = vmatmul.msk.f32.gmra.mxu0 %vm1452_vm3, %v1449_v53 }
 0x9b1   :  { %v1423_v61 = vadd.f32 0.4994258, %v1422_v60  ;;  %v1412_v58 = vadd.f32 0.18741608, %v1411_v44 }
 0x9b3   :  { %v1424_v63 = vmul.f32 %v1423_v61, %v1404_v37  ;;  %v1413_v2 = vmul.f32 %v1412_v58, %v1404_v37  ;;  %v3625_v37 = vld [vmem:[%s5127_s2 + $0x6] ss:$0 sm:$0xff] }
 0x9b5   :  { %v1425_v11 = vadd.f32 1.0, %v1424_v63  ;;  %v1414_v4 = vadd.f32 1.1283791, %v1413_v2 }
 0x9b7   :  { %3718 = vrcp.f32 %v1425_v11  ;;  %v1437_v15 = vand.u32 2147483648, %v1425_v11  ;;  %v1435_v31 = vand.u32 2147483647, %v1425_v11  ;;  %vm1431_vm13 = vweird.f32 %v1425_v11 }
 0x9b8   :  { %v1415_v0 = vmul.f32 %v1414_v4, %v4427_v22 }
 0x9b9   :  { %v1438_v23 = vor.u32 1.1754944e-38, %v1437_v15  ;;  %vm1436_vm15 = vcmp.eq.f32.partialorder %v1435_v31, 8.507059e+37 }
 0x9bd   :  { %v3719_v1 = vpop.eup %3718 }
 0x9be   :  { %v1427_v3 = vmul.f32 %v3719_v1, %v1425_v11  ;;  %vm1432_vm12 = vweird.f32 %v3719_v1 }
 0x9bf   :  { %vm1433_vm14 = vmor %vm1431_vm13, %vm1432_vm12 }
 0x9c0   :  { %v1428_v5 = vsub.f32 1.0, %v1427_v3 }
 0x9c2   :  { %v1429_v46 = vmul.f32 %v3719_v1, %v1428_v5 }
 0x9c4   :  { %v1430_v17 = vadd.f32 %v3719_v1, %v1429_v46 }
 0x9c6   :  { %v1434_v59 = vsel %vm1433_vm14, %v3719_v1, %v1430_v17 }
 0x9c7   :  { %v1439_v45 = vsel %vm1436_vm15, %v1438_v23, %v1434_v59 }
 0x9c8   :  { %v1440_v26 = vmul.f32 %v1439_v45, %v1415_v0  ;;  %v1692_v45 = vld [vmem:[%s5126_s1 + $0x1c8] sm:$0xff] }
 0x9c9   :  { %1723 = vmatpush.msrb.mxu2 %v1692_v45 }
 0x9ca   :  { %v3469_v43 = vclamps-f32 %v1440_v26, 1.0  ;;  %v1696_v26 = vld [vmem:[%s5126_s1 + $0x248] sm:$0xff] }
 0x9cb   :  { %1858 = vmatpush.msrb.mxu3 %v1696_v26 }
 0x9cc   :  { %v1446_v8 = vadd.f32 1.0, %v3469_v43 }
 0x9ce   :  { %v1450_v27 = vmul.f32 %v1446_v8, %v1278_v24 }
 0x9d0   :  { %3473 = vmatmul.msk.f32.gmra.mxu0 %vm1452_vm3, %v1450_v27  ;;  %v1691_v27 = vld [vmem:[%s5126_s1 + $0x1c0] sm:$0xff] }
 0x9d1   :  { %1724 = vmatpush.msrb.mxu2 %v1691_v27 }
 0xa05   :  { %v1482_v10 = vpop.f32.mrf.mxu0 }
 0xa06   :  { %v1483_v7 = vadd.f32 %v3625_v37, %v1482_v10 }
 0xa08   :  { %v1494_v38 = vadd.f32 %v1483_v7, %v4353_v6  ;;  %v1690_v7 = vld [vmem:[%s5126_s1 + $0x1b8] sm:$0xff] }
 0xa09   :  { %1725 = vmatpush.msrb.mxu2 %v1690_v7 }
 0xa0a   :  { %3474 = vmatmul.msk.f32.vlgmr.msrb.gmra.mxu1 %vm89_vm1, %v1494_v38 }
 0xa25   :  { %v1485_v22 = vpop.f32.mrf.mxu0 }
 0xa26   :  { %v1486_v54 = vadd.f32 %v3625_v37, %v1485_v22 }
 0xa28   :  { %v1495_v39 = vadd.f32 %v1486_v54, %v4358_v57  ;;  %v1689_v54 = vld [vmem:[%s5126_s1 + $0x1b0] sm:$0xff] }
 0xa29   :  { %1726 = vmatpush.msrb.mxu2 %v1689_v54 }
 0xa2a   :  { %3475 = vmatmul.msk.f32.gmra.mxu1 %vm89_vm1, %v1495_v39 }
 0xa2d   :  { %v1488_v18 = vpop.f32.mrf.mxu0 }
 0xa2e   :  { %v1489_v35 = vadd.f32 %v3625_v37, %v1488_v18 }
 0xa30   :  { %v1496_v28 = vadd.f32 %v1489_v35, %v4363_v20 }
 0xa32   :  { %3476 = vmatmul.msk.f32.gmra.mxu1 %vm89_vm1, %v1496_v28 }
 0xa4d   :  { %v1491_v40 = vpop.f32.mrf.mxu0 }
 0xa4e   :  { %v1492_v29 = vadd.f32 %v3625_v37, %v1491_v40  ;;  %v1695_v37 = vld [vmem:[%s5126_s1 + $0x240] sm:$0xff] }
 0xa4f   :  { %1859 = vmatpush.msrb.mxu3 %v1695_v37 }
 0xa50   :  { %v1497_v52 = vadd.f32 %v1492_v29, %v4368_v21  ;;  %v3626_v29 = vld [vmem:[%s5127_s2 + $0x9] ss:$0 sm:$0xff] }
 0xa52   :  { %3477 = vmatmul.msk.f32.gmra.mxu1 %vm89_vm1, %v1497_v52 }
 0xa87   :  { %v1527_v6 = vpop.f32.mrf.mxu1 }
 0xa88   :  { %1541 = vperm.xlu0 %3616, %v1527_v6   ;;  %v3627_v6 = vld [vmem:[%s5127_s2 + $0xa] ss:$0 sm:$0xff] }
 0xaa7   :  { %v1530_v30 = vpop.f32.mrf.mxu1 }
 0xaa8   :  { %1546 = vperm.xlu2 %3615, %v1530_v30  }
 0xaaf   :  { %v1533_v32 = vpop.f32.mrf.mxu1 }
 0xab0   :  { %1551 = vperm.xlu1 %3614, %v1533_v32  }
 0xacf   :  { %v1536_v57 = vpop.f32.mrf.mxu1 }
 0xad0   :  { %1556 = vperm.xlu0 %3616, %v1536_v57  }
 0xafa   :  { %v1542_v9 = vpop.permute.xlu0 %1541 }
 0xafb   :  { %v4451_v42 = vsub.f32 %v1494_v38, %v1542_v9  ;;  %v1694_v38 = vld [vmem:[%s5126_s1 + $0x238] sm:$0xff] }
 0xafc   :  { %1860 = vmatpush.msrb.mxu3 %v1694_v38 }
 0xafd   :  { %v1563_v20 = vmul.f32 %v4451_v42, %v4451_v42 }
 0xaff   :  { %3478 = vmatmul.msk.f32.vlgmr.msra.gmra.mxu3 %vm89_vm1, %v1563_v20 }
 0xb02   :  { %v1547_v41 = vpop.permute.xlu2 %1546 }
 0xb03   :  { %v4456_v21 = vsub.f32 %v1495_v39, %v1547_v41  ;;  %v1693_v39 = vld [vmem:[%s5126_s1 + $0x230] sm:$0xff] }
 0xb04   :  { %1861 = vmatpush.msrb.mxu3 %v1693_v39 }
 0xb05   :  { %v1564_v14 = vmul.f32 %v4456_v21, %v4456_v21 }
 0xb06   :  { %2060 = vmatpush.msra.mxu3 %v3846_v13 }
 0xb07   :  { %3479 = vmatmul.msk.f32.gmra.mxu3 %vm89_vm1, %v1564_v14 }
 0xb08   :  { %2061 = vmatpush.msra.mxu3 %v3846_v13 }
 0xb0a   :  { %2062 = vmatpush.msra.mxu3 %v3846_v13 }
 0xb0c   :  { %2063 = vmatpush.msra.mxu3 %v3846_v13 }
 0xb22   :  { %v1552_v56 = vpop.permute.xlu1 %1551 }
 0xb23   :  { %v4461_v33 = vsub.f32 %v1496_v28, %v1552_v56 }
 0xb25   :  { %v1565_v34 = vmul.f32 %v4461_v33, %v4461_v33 }
 0xb27   :  { %3480 = vmatmul.msk.f32.gmra.mxu3 %vm89_vm1, %v1565_v34 }
 0xb42   :  { %v1557_v12 = vpop.permute.xlu0 %1556 }
 0xb43   :  { %v4466_v36 = vsub.f32 %v1497_v52, %v1557_v12 }
 0xb45   :  { %v1566_v25 = vmul.f32 %v4466_v36, %v4466_v36 }
 0xb47   :  { %3481 = vmatmul.msk.f32.gmra.mxu3 %vm89_vm1, %v1566_v25 }
 0xb82   :  { %v1596_v50 = vpop.f32.mrf.mxu3 }
 0xb83   :  { %v1597_v19 = vadd.f32 1e-05, %v1596_v50 }
 0xb85   :  { %3720 = vrsqrt.f32 %v1597_v19  ;;  %vm1614_vm2 = vweird.f32 %v1597_v19 }
 0xb8a   :  { %v1599_v48 = vpop.f32.mrf.mxu3 }
 0xb8b   :  { %v3721_v47 = vpop.eup %3720  ;;  %v1600_v49 = vadd.f32 1e-05, %v1599_v48 }
 0xb8c   :  { %v1609_v16 = vmul.f32 %v3721_v47, %v1597_v19  ;;  %vm1615_vm0 = vweird.f32 %v3721_v47 }
 0xb8d   :  { %3722 = vrsqrt.f32 %v1600_v49  ;;  %vm1616_vm4 = vmor %vm1614_vm2, %vm1615_vm0  ;;  %vm1624_vm6 = vweird.f32 %v1600_v49 }
 0xb8e   :  { %v1610_v51 = vmul.f32 %v3721_v47, %v1609_v16 }
 0xb90   :  { %v1611_v53 = vmul.f32 0.5, %v1610_v51  ;;  %v1934_v51 = vld [vmem:[%s5126_s1 + $0x1e0] sm:$0xff] }
 0xb92   :  { %v1612_v60 = vsub.f32 1.5, %v1611_v53  ;;  %v1933_v53 = vld [vmem:[%s5126_s1 + $0x1d8] sm:$0xff] }
 0xb93   :  { %v3723_v61 = vpop.eup %3722 }
 0xb94   :  { %v1613_v62 = vmul.f32 %v3721_v47, %v1612_v60  ;;  %v1619_v63 = vmul.f32 %v3723_v61, %v1600_v49  ;;  %vm1625_vm5 = vweird.f32 %v3723_v61  ;;  %v1935_v49 = vld [vmem:[%s5126_s1 + $0x1e8] sm:$0xff]  ;;  %v1932_v60 = vld [vmem:[%s5126_s1 + $0x1d0] sm:$0xff] }
 0xb95   :  { %vm1626_vm7 = vmor %vm1624_vm6, %vm1625_vm5 }
 0xb96   :  { %v1617_v11 = vsel %vm1616_vm4, %v3721_v47, %v1613_v62  ;;  %v1620_v44 = vmul.f32 %v3723_v61, %v1619_v63 }
 0xb97   :  { %1650 = vperm.xlu2 %3615, %v1617_v11  }
 0xb98   :  { %v1621_v58 = vmul.f32 0.5, %v1620_v44 }
 0xb9a   :  { %v1622_v1 = vsub.f32 1.5, %v1621_v58 }
 0xb9c   :  { %v1623_v2 = vmul.f32 %v3723_v61, %v1622_v1 }
 0xb9e   :  { %v1627_v3 = vsel %vm1626_vm7, %v3723_v61, %v1623_v2 }
 0xb9f   :  { %1655 = vperm.xlu1 %3614, %v1627_v3  }
 0xbaa   :  { %v1602_v5 = vpop.f32.mrf.mxu3 }
 0xbab   :  { %v1603_v15 = vadd.f32 1e-05, %v1602_v5  ;;  %v4587_v5 = vld [vmem:[%s5126_s1] sm:$0xff] }
 0xbad   :  { %3724 = vrsqrt.f32 %v1603_v15  ;;  %vm1634_vm9 = vweird.f32 %v1603_v15 }
 0xbb3   :  { %v3725_v4 = vpop.eup %3724 }
 0xbb4   :  { %v1629_v46 = vmul.f32 %v3725_v4, %v1603_v15  ;;  %vm1635_vm8 = vweird.f32 %v3725_v4 }
 0xbb5   :  { %vm1636_vm10 = vmor %vm1634_vm9, %vm1635_vm8 }
 0xbb6   :  { %v1630_v31 = vmul.f32 %v3725_v4, %v1629_v46 }
 0xbb8   :  { %v1631_v17 = vmul.f32 0.5, %v1630_v31  ;;  %v4594_v31 = vld [vmem:[%s5126_s1 + $0x8] sm:$0xff] }
 0xbba   :  { %v1632_v23 = vsub.f32 1.5, %v1631_v17 }
 0xbbc   :  { %v1633_v0 = vmul.f32 %v3725_v4, %v1632_v23 }
 0xbbe   :  { %v1637_v59 = vsel %vm1636_vm10, %v3725_v4, %v1633_v0 }
 0xbbf   :  { %1660 = vperm.xlu0 %3616, %v1637_v59   ;;  %v4601_v59 = vld [vmem:[%s5126_s1 + $0x10] sm:$0xff] }
 0xbca   :  { %v1605_v43 = vpop.f32.mrf.mxu3 }
 0xbcb   :  { %v1606_v24 = vadd.f32 1e-05, %v1605_v43 }
 0xbcd   :  { %3726 = vrsqrt.f32 %v1606_v24  ;;  %vm1644_vm12 = vweird.f32 %v1606_v24 }
 0xbd3   :  { %v3727_v8 = vpop.eup %3726 }
 0xbd4   :  { %v1639_v10 = vmul.f32 %v3727_v8, %v1606_v24  ;;  %vm1645_vm11 = vweird.f32 %v3727_v8  ;;  %v4608_v24 = vld [vmem:[%s5126_s1 + $0x18] sm:$0xff] }
 0xbd5   :  { %vm1646_vm13 = vmor %vm1644_vm12, %vm1645_vm11 }
 0xbd6   :  { %v1640_v22 = vmul.f32 %v3727_v8, %v1639_v10 }
 0xbd8   :  { %v1641_v18 = vmul.f32 0.5, %v1640_v22 }
 0xbda   :  { %v1642_v35 = vsub.f32 1.5, %v1641_v18 }
 0xbdc   :  { %v1643_v28 = vmul.f32 %v3727_v8, %v1642_v35  ;;  %v1939_v35 = vld [vmem:[%s5126_s1 + $0x268] sm:$0xff] }
 0xbde   :  { %v1647_v40 = vsel %vm1646_vm13, %v3727_v8, %v1643_v28  ;;  %v1938_v28 = vld [vmem:[%s5126_s1 + $0x260] sm:$0xff] }
 0xbdf   :  { %1665 = vperm.xlu2 %3615, %v1647_v40   ;;  %v1937_v40 = vld [vmem:[%s5126_s1 + $0x258] sm:$0xff] }
 0xbf1   :  { %v1651_v52 = vpop.permute.xlu2 %1650 }
 0xbf2   :  { %v1668_v30 = vmul.f32 %v1651_v52, %v4451_v42 }
 0xbf4   :  { %v1673_v32 = vmul.f32 %v3626_v29, %v1668_v30 }
 0xbf6   :  { %v4506_v57 = vadd.f32 %v3627_v6, %v1673_v32 }
 0xbf8   :  { %3482 = vmatmul.msk.f32.vlgmr.msrb.gmra.mxu2 %vm89_vm1, %v4506_v57  ;;  %3498 = vmatmul.msk.f32.vlgmr.msrb.gmra.mxu3 %vm89_vm1, %v4506_v57 }
 0xc11   :  { %v1656_v9 = vpop.permute.xlu1 %1655 }
 0xc12   :  { %v1669_v20 = vmul.f32 %v1656_v9, %v4456_v21 }
 0xc14   :  { %v1674_v41 = vmul.f32 %v3626_v29, %v1669_v20 }
 0xc16   :  { %v4513_v14 = vadd.f32 %v3627_v6, %v1674_v41 }
 0xc18   :  { %3483 = vmatmul.msk.f32.gmra.mxu2 %vm89_vm1, %v4513_v14  ;;  %3499 = vmatmul.msk.f32.gmra.mxu3 %vm89_vm1, %v4513_v14 }
 0xc31   :  { %v1661_v42 = vpop.permute.xlu0 %1660 }
 0xc32   :  { %v1670_v56 = vmul.f32 %v1661_v42, %v4461_v33  ;;  %v3628_v33 = vld [vmem:[%s5127_s2 + $0x10] ss:$0 sm:$0xff] }
 0xc34   :  { %v1675_v34 = vmul.f32 %v3626_v29, %v1670_v56 }
 0xc36   :  { %v4520_v12 = vadd.f32 %v3627_v6, %v1675_v34  ;;  %v2170_v34 = vld [vmem:[%s5126_s1 + $0x208] sm:$0xff] }
 0xc38   :  { %3484 = vmatmul.msk.f32.gmra.mxu2 %vm89_vm1, %v4520_v12  ;;  %3500 = vmatmul.msk.f32.gmra.mxu3 %vm89_vm1, %v4520_v12 }
 0xc39   :  { %v1666_v21 = vpop.permute.xlu2 %1665 }
 0xc3a   :  { %v1671_v25 = vmul.f32 %v1666_v21, %v4466_v36  ;;  %v2169_v21 = vld [vmem:[%s5126_s1 + $0x200] sm:$0xff] }
 0xc3c   :  { %v1676_v50 = vmul.f32 %v3626_v29, %v1671_v25  ;;  %v1936_v29 = vld [vmem:[%s5126_s1 + $0x250] sm:$0xff] }
 0xc3d   :  { %v3629_v25 = vld [vmem:[%s5127_s2 + $0x11] ss:$0 sm:$0xff] }
 0xc3e   :  { %v4527_v19 = vadd.f32 %v3627_v6, %v1676_v50  ;;  %v2168_v50 = vld [vmem:[%s5126_s1 + $0x1f8] sm:$0xff] }
 0xc40   :  { %3486 = vmatpush.xpose.msk.msrb.mxu0 %vm89_vm1, %v4527_v19  ;;  %3510 = vmatpush.xpose.msk.msrb.mxu1 %vm89_vm1, %v4527_v19 }
 0xc41   :  { %3485 = vmatmul.msk.f32.gmra.mxu2 %vm89_vm1, %v4527_v19  ;;  %3501 = vmatmul.msk.f32.gmra.mxu3 %vm89_vm1, %v4527_v19 }
 0xc42   :  { %3534 = vmatpush.xpose.msk.msrb.mxu3 %vm89_vm1, %v4527_v19 }
 0xc44   :  { %3487 = vmatpush.xpose.msk.msrb.mxu0 %vm89_vm1, %v4520_v12  ;;  %3511 = vmatpush.xpose.msk.msrb.mxu1 %vm89_vm1, %v4520_v12 }
 0xc46   :  { %3535 = vmatpush.xpose.msk.msrb.mxu3 %vm89_vm1, %v4520_v12 }
 0xc48   :  { %3488 = vmatpush.xpose.msk.msrb.mxu0 %vm89_vm1, %v4513_v14  ;;  %3512 = vmatpush.xpose.msk.msrb.mxu1 %vm89_vm1, %v4513_v14 }
 0xc4a   :  { %3536 = vmatpush.xpose.msk.msrb.mxu3 %vm89_vm1, %v4513_v14 }
 0xc4c   :  { %3489 = vmatpush.xpose.msk.msrb.mxu0 %vm89_vm1, %v4506_v57  ;;  %3513 = vmatpush.xpose.msk.msrb.mxu1 %vm89_vm1, %v4506_v57 }
 0xc4e   :  { %3537 = vmatpush.xpose.msk.msrb.mxu3 %vm89_vm1, %v4506_v57 }
 0xc50   :  { %1954 = vmatpush.msra.mxu0 %v1935_v49 }
 0xc52   :  { %1955 = vmatpush.msra.mxu0 %v1934_v51 }
 0xc54   :  { %1956 = vmatpush.msra.mxu0 %v1933_v53 }
 0xc56   :  { %1957 = vmatpush.msra.mxu0 %v1932_v60 }
 0xc7b   :  { %v1728_v36 = vpop.f32.mrf.mxu2  ;;  %v1863_v61 = vpop.f32.mrf.mxu3 }
 0xc7c   :  { %v1729_v47 = vadd.f32 %v3628_v33, %v1728_v36 }
 0xc7e   :  { %3490 = vmatmul.msk.f32.vlgmr.msrb.gmra.mxu0 %vm89_vm1, %v1729_v47 }
 0xc9b   :  { %v1731_v48 = vpop.f32.mrf.mxu2  ;;  %v1866_v62 = vpop.f32.mrf.mxu3 }
 0xc9c   :  { %v1732_v16 = vadd.f32 %v3628_v33, %v1731_v48 }
 0xc9e   :  { %3491 = vmatmul.msk.f32.gmra.mxu0 %vm89_vm1, %v1732_v16 }
 0xcbb   :  { %v1734_v63 = vpop.f32.mrf.mxu2  ;;  %v1869_v11 = vpop.f32.mrf.mxu3 }
 0xcbc   :  { %v1735_v44 = vadd.f32 %v3628_v33, %v1734_v63 }
 0xcbe   :  { %3492 = vmatmul.msk.f32.gmra.mxu0 %vm89_vm1, %v1735_v44 }
 0xcc4   :  { %v1737_v58 = vpop.f32.mrf.mxu2  ;;  %v1872_v1 = vpop.f32.mrf.mxu3 }
 0xcc5   :  { %v1738_v2 = vadd.f32 %v3628_v33, %v1737_v58  ;;  %1887 = vmatpush.msra.mxu2 %v1872_v1  ;;  %v2167_v33 = vld [vmem:[%s5126_s1 + $0x1f0] sm:$0xff] }
 0xcc7   :  { %3493 = vmatmul.msk.f32.gmra.mxu0 %vm89_vm1, %v1738_v2  ;;  %1888 = vmatpush.msra.mxu2 %v1869_v11 }
 0xcc9   :  { %1889 = vmatpush.msra.mxu2 %v1866_v62 }
 0xccb   :  { %1890 = vmatpush.msra.mxu2 %v1863_v61 }
 0xccd   :  { %2089 = vmatpush.msrb.mxu2 %v1939_v35  ;;  %v2172_v35 = vld [vmem:[%s5126_s1 + $0x278] sm:$0xff] }
 0xccf   :  { %3506 = vmatmul.msk.f32.vlgmr.msra.gmra.mxu0 %vm89_vm1, %v4506_v57  ;;  %2090 = vmatpush.msrb.mxu2 %v1938_v28 }
 0xcd1   :  { %2091 = vmatpush.msrb.mxu2 %v1937_v40  ;;  %v2171_v40 = vld [vmem:[%s5126_s1 + $0x270] sm:$0xff] }
 0xcd3   :  { %2092 = vmatpush.msrb.mxu2 %v1936_v29 }
 0xcd7   :  { %3507 = vmatmul.msk.f32.gmra.mxu0 %vm89_vm1, %v4513_v14 }
 0xcdf   :  { %3508 = vmatmul.msk.f32.gmra.mxu0 %vm89_vm1, %v4520_v12 }
 0xce7   :  { %3509 = vmatmul.msk.f32.gmra.mxu0 %vm89_vm1, %v4527_v19 }
 0xcfb   :  { %v1769_v3 = vpop.f32.mrf.mxu0 }
 0xcfc   :  { %v1770_v15 = vadd.f32 %v4587_v5, %v1769_v3 }
 0xcfe   :  { %v1781_v4 = vsel %vm89_vm1, %v1770_v15, -inf }
 0xcff   :  { %1782 = vmax.xlane.f32.xlu1 %v1781_v4 }
 0xd1b   :  { %v1772_v46 = vpop.f32.mrf.mxu0 }
 0xd1c   :  { %v1773_v17 = vadd.f32 %v4594_v31, %v1772_v46 }
 0xd1e   :  { %v1784_v23 = vsel %vm89_vm1, %v1773_v17, -inf }
 0xd1f   :  { %1785 = vmax.xlane.f32.xlu0 %v1784_v23 }
 0xd3b   :  { %v1775_v0 = vpop.f32.mrf.mxu0 }
 0xd3c   :  { %v1776_v45 = vadd.f32 %v4601_v59, %v1775_v0 }
 0xd3e   :  { %v1787_v26 = vsel %vm89_vm1, %v1776_v45, -inf }
 0xd3f   :  { %1788 = vmax.xlane.f32.xlu2 %v1787_v26 }
 0xd44   :  { %v1778_v43 = vpop.f32.mrf.mxu0 }
 0xd45   :  { %v1779_v8 = vadd.f32 %v4608_v24, %v1778_v43 }
 0xd47   :  { %v1790_v27 = vsel %vm89_vm1, %v1779_v8, -inf }
 0xd48   :  { %1791 = vmax.xlane.f32.xlu1 %v1790_v27 }
 0xd4c   :  { %v1959_v42 = vpop.f32.mrf.mxu0 }
 0xd4d   :  { %v1960_v36 = vadd.f32 %v3629_v25, %v1959_v42 }
 0xd54   :  { %v1962_v47 = vpop.f32.mrf.mxu0 }
 0xd55   :  { %v1963_v48 = vadd.f32 %v3629_v25, %v1962_v47  ;;  %v2402_v47 = vld [vmem:[%s5126_s1 + $0x210] sm:$0xff] }
 0xd5c   :  { %v1965_v16 = vpop.f32.mrf.mxu0 }
 0xd5d   :  { %v1966_v49 = vadd.f32 %v3629_v25, %v1965_v16 }
 0xd64   :  { %v1968_v51 = vpop.f32.mrf.mxu0 }
 0xd65   :  { %v1969_v53 = vadd.f32 %v3629_v25, %v1968_v51 }
 0xd72   :  { %v1783_v37 = vpop.xlane.xlu1 %1782 }
 0xd73   :  { %v1793_v10 = vsub.f32 %v1770_v15, %v1783_v37 }
 0xd75   :  { %v1797_v7 = vmul.f32 1.442695, %v1793_v10 }
 0xd77   :  { %3728 = vpow2.f32 %v1797_v7 }
 0xd7d   :  { %v3729_v38 = vpop.eup %3728 }
 0xd7e   :  { %3494 = vmatmul.msk.f32.vlgmr.msra.gmra.mxu1 %vm89_vm1, %v3729_v38  ;;  %3502 = vmatmul.msk.f32.vlgmr.msra.gmra.mxu2 %vm89_vm1, %v3729_v38 }
 0xd7f   :  { %2295 = vmatpush.msra.mxu2 %v3846_v13  ;;  %2189 = vmatpush.msra.mxu1 %v2170_v34 }
 0xd81   :  { %2296 = vmatpush.msra.mxu2 %v3846_v13  ;;  %2190 = vmatpush.msra.mxu1 %v2169_v21 }
 0xd83   :  { %2297 = vmatpush.msra.mxu2 %v3846_v13  ;;  %2191 = vmatpush.msra.mxu1 %v2168_v50  ;;  %v2404_v50 = vld [vmem:[%s5126_s1 + $0x220] sm:$0xff] }
 0xd85   :  { %2298 = vmatpush.msra.mxu2 %v3846_v13  ;;  %2192 = vmatpush.msra.mxu1 %v2167_v33  ;;  %v3630_v33 = vld [vmem:[%s5127_s2 + $0x12] ss:$0 sm:$0xff] }
 0xd92   :  { %v1786_v22 = vpop.xlane.xlu0 %1785 }
 0xd93   :  { %v1794_v54 = vsub.f32 %v1773_v17, %v1786_v22 }
 0xd95   :  { %v1799_v39 = vmul.f32 1.442695, %v1794_v54 }
 0xd97   :  { %3730 = vpow2.f32 %v1799_v39  ;;  %v2174_v39 = vld [vmem:[%s5126_s1 + $0x288] sm:$0xff] }
 0xd9d   :  { %v3731_v18 = vpop.eup %3730 }
 0xd9e   :  { %3495 = vmatmul.msk.f32.gmra.mxu1 %vm89_vm1, %v3731_v18  ;;  %3503 = vmatmul.msk.f32.gmra.mxu2 %vm89_vm1, %v3731_v18  ;;  %v2173_v18 = vld [vmem:[%s5126_s1 + $0x280] sm:$0xff] }
 0xdb2   :  { %v1789_v52 = vpop.xlane.xlu2 %1788 }
 0xdb3   :  { %v1795_v6 = vsub.f32 %v1776_v45, %v1789_v52 }
 0xdb5   :  { %v1801_v30 = vmul.f32 1.442695, %v1795_v6 }
 0xdb7   :  { %3732 = vpow2.f32 %v1801_v30 }
 0xdbb   :  { %v1792_v32 = vpop.xlane.xlu1 %1791 }
 0xdbc   :  { %v1796_v9 = vsub.f32 %v1779_v8, %v1792_v32 }
 0xdbd   :  { %v3733_v20 = vpop.eup %3732 }
 0xdbe   :  { %v1803_v41 = vmul.f32 1.442695, %v1796_v9  ;;  %3496 = vmatmul.msk.f32.gmra.mxu1 %vm89_vm1, %v3733_v20  ;;  %3504 = vmatmul.msk.f32.gmra.mxu2 %vm89_vm1, %v3733_v20 }
 0xdc0   :  { %3734 = vpow2.f32 %v1803_v41 }
 0xdc6   :  { %v3735_v56 = vpop.eup %3734 }
 0xdc7   :  { %3497 = vmatmul.msk.f32.gmra.mxu1 %vm89_vm1, %v3735_v56  ;;  %3505 = vmatmul.msk.f32.gmra.mxu2 %vm89_vm1, %v3735_v56 }
 0xdcf   :  { %3514 = vmatmul.msk.f32.vlgmr.msrb.gmra.mxu1 %vm89_vm1, %v1960_v36  ;;  %3522 = vmatmul.msk.f32.vlgmr.msrb.gmra.mxu2 %vm89_vm1, %v4506_v57  ;;  %v2403_v36 = vld [vmem:[%s5126_s1 + $0x218] sm:$0xff] }
 0xdd0   :  { %3558 = vmatpush.xpose.msk.msrb.mxu2 %vm89_vm1, %v4527_v19 }
 0xdd4   :  { %3559 = vmatpush.xpose.msk.msrb.mxu2 %vm89_vm1, %v4520_v12 }
 0xdd7   :  { %3515 = vmatmul.msk.f32.gmra.mxu1 %vm89_vm1, %v1963_v48  ;;  %3523 = vmatmul.msk.f32.gmra.mxu2 %vm89_vm1, %v4513_v14 }
 0xdd8   :  { %3560 = vmatpush.xpose.msk.msrb.mxu2 %vm89_vm1, %v4513_v14 }
 0xddc   :  { %3561 = vmatpush.xpose.msk.msrb.mxu2 %vm89_vm1, %v4506_v57 }
 0xddf   :  { %3516 = vmatmul.msk.f32.gmra.mxu1 %vm89_vm1, %v1966_v49  ;;  %3524 = vmatmul.msk.f32.gmra.mxu2 %vm89_vm1, %v4520_v12 }
 0xde7   :  { %3517 = vmatmul.msk.f32.gmra.mxu1 %vm89_vm1, %v1969_v53  ;;  %3525 = vmatmul.msk.f32.gmra.mxu2 %vm89_vm1, %v4527_v19 }
 0xdef   :  { %3530 = vmatmul.msk.f32.vlgmr.msra.gmra.mxu1 %vm89_vm1, %v4506_v57 }
 0xdf7   :  { %3531 = vmatmul.msk.f32.gmra.mxu1 %vm89_vm1, %v4513_v14 }
 0xdfb   :  { %v4679_v60 = vpop.f32.mrf.mxu1 }
 0xdff   :  { %3532 = vmatmul.msk.f32.gmra.mxu1 %vm89_vm1, %v4520_v12 }
 0xe01   :  { %v4681_v61 = vpop.f32.mrf.mxu2 }
 0xe07   :  { %3533 = vmatmul.msk.f32.gmra.mxu1 %vm89_vm1, %v4527_v19 }
 0xe1b   :  { %v4683_v62 = vpop.f32.mrf.mxu1 }
 0xe21   :  { %v4685_v63 = vpop.f32.mrf.mxu2 }
 0xe3b   :  { %v4687_v11 = vpop.f32.mrf.mxu1 }
 0xe41   :  { %v4689_v44 = vpop.f32.mrf.mxu2 }
 0xe44   :  { %v4691_v58 = vpop.f32.mrf.mxu1 }
 0xe4a   :  { %v4693_v1 = vpop.f32.mrf.mxu2 }
 0xe4c   :  { %v2000_v2 = vpop.f32.mrf.mxu1 }
 0xe4d   :  { %v2001_v3 = vadd.f32 %v4587_v5, %v2000_v2 }
 0xe4f   :  { %v2012_v15 = vsel %vm89_vm1, %v2001_v3, -inf }
 0xe50   :  { %2013 = vmax.xlane.f32.xlu2 %v2012_v15 }
 0xe52   :  { %v2094_v4 = vpop.f32.mrf.mxu2 }
 0xe54   :  { %v2003_v46 = vpop.f32.mrf.mxu1 }
 0xe55   :  { %v2004_v17 = vadd.f32 %v4594_v31, %v2003_v46 }
 0xe57   :  { %v2015_v23 = vsel %vm89_vm1, %v2004_v17, -inf }
 0xe58   :  { %2016 = vmax.xlane.f32.xlu0 %v2015_v23 }
 0xe5a   :  { %v2097_v0 = vpop.f32.mrf.mxu2 }
 0xe5c   :  { %v2006_v45 = vpop.f32.mrf.mxu1 }
 0xe5d   :  { %v2007_v26 = vadd.f32 %v4601_v59, %v2006_v45 }
 0xe5f   :  { %v2018_v43 = vsel %vm89_vm1, %v2007_v26, -inf }
 0xe60   :  { %2019 = vmax.xlane.f32.xlu1 %v2018_v43 }
 0xe62   :  { %v2100_v8 = vpop.f32.mrf.mxu2 }
 0xe64   :  { %v2009_v27 = vpop.f32.mrf.mxu1 }
 0xe65   :  { %v2010_v37 = vadd.f32 %v4608_v24, %v2009_v27 }
 0xe67   :  { %v2021_v10 = vsel %vm89_vm1, %v2010_v37, -inf }
 0xe68   :  { %2022 = vmax.xlane.f32.xlu2 %v2021_v10 }
 0xe6a   :  { %v2103_v7 = vpop.f32.mrf.mxu2 }
 0xe6b   :  { %2118 = vmatpush.msrb.mxu0 %v2103_v7 }
 0xe6c   :  { %v2194_v21 = vpop.f32.mrf.mxu1 }
 0xe6d   :  { %2119 = vmatpush.msrb.mxu0 %v2100_v8  ;;  %v2195_v48 = vadd.f32 %v3630_v33, %v2194_v21 }
 0xe6f   :  { %2120 = vmatpush.msrb.mxu0 %v2097_v0 }
 0xe71   :  { %2121 = vmatpush.msrb.mxu0 %v2094_v4 }
 0xe73   :  { %2324 = vmatpush.msra.mxu0 %v2174_v39 }
 0xe74   :  { %v2197_v16 = vpop.f32.mrf.mxu1 }
 0xe75   :  { %2325 = vmatpush.msra.mxu0 %v2173_v18  ;;  %v2198_v49 = vadd.f32 %v3630_v33, %v2197_v16 }
 0xe77   :  { %2326 = vmatpush.msra.mxu0 %v2172_v35 }
 0xe79   :  { %2327 = vmatpush.msra.mxu0 %v2171_v40 }
 0xe7c   :  { %v2200_v51 = vpop.f32.mrf.mxu1 }
 0xe7d   :  { %v2201_v53 = vadd.f32 %v3630_v33, %v2200_v51 }
 0xe84   :  { %v2203_v2 = vpop.f32.mrf.mxu1 }
 0xec3   :  { %v2014_v38 = vpop.xlane.xlu2 %2013 }
 0xec4   :  { %v2024_v22 = vsub.f32 %v2001_v3, %v2014_v38  ;;  %v2204_v3 = vadd.f32 %v3630_v33, %v2203_v2  ;;  %v3631_v2 = vld [vmem:[%s5127_s2 + $0x13] ss:$0 sm:$0xff] }
 0xec6   :  { %v2028_v54 = vmul.f32 1.442695, %v2024_v22 }
 0xec8   :  { %3736 = vpow2.f32 %v2028_v54 }
 0xecb   :  { %v2017_v28 = vpop.xlane.xlu0 %2016 }
 0xecc   :  { %v2025_v29 = vsub.f32 %v2004_v17, %v2017_v28 }
 0xece   :  { %v3737_v52 = vpop.eup %3736  ;;  %v2030_v6 = vmul.f32 1.442695, %v2025_v29 }
 0xecf   :  { %3518 = vmatmul.msk.f32.vlgmr.msra.gmra.mxu3 %vm89_vm1, %v3737_v52  ;;  %3526 = vmatmul.msk.f32.vlgmr.msrb.gmra.mxu0 %vm89_vm1, %v3737_v52 }
 0xed0   :  { %3738 = vpow2.f32 %v2030_v6  ;;  %2530 = vmatpush.msrb.mxu0 %v3846_v13 }
 0xed2   :  { %2531 = vmatpush.msrb.mxu0 %v3846_v13 }
 0xed3   :  { %v2020_v30 = vpop.xlane.xlu1 %2019 }
 0xed4   :  { %v2026_v32 = vsub.f32 %v2007_v26, %v2020_v30  ;;  %2532 = vmatpush.msrb.mxu0 %v3846_v13 }
 0xed6   :  { %v3739_v9 = vpop.eup %3738  ;;  %v2032_v20 = vmul.f32 1.442695, %v2026_v32  ;;  %2533 = vmatpush.msrb.mxu0 %v3846_v13  ;;  %v2405_v13 = vld [vmem:[%s5126_s1 + $0x228] sm:$0xff] }
 0xed7   :  { %3519 = vmatmul.msk.f32.gmra.mxu3 %vm89_vm1, %v3739_v9  ;;  %3527 = vmatmul.msk.f32.gmra.mxu0 %vm89_vm1, %v3739_v9  ;;  %v2409_v9 = vld [vmem:[%s5126_s1 + $0x2a8] sm:$0xff] }
 0xed8   :  { %3740 = vpow2.f32 %v2032_v20  ;;  %2424 = vmatpush.msra.mxu3 %v2405_v13  ;;  %v2408_v20 = vld [vmem:[%s5126_s1 + $0x2a0] sm:$0xff] }
 0xeda   :  { %2425 = vmatpush.msra.mxu3 %v2404_v50 }
 0xedb   :  { %v2023_v41 = vpop.xlane.xlu2 %2022 }
 0xedc   :  { %v2027_v42 = vsub.f32 %v2010_v37, %v2023_v41  ;;  %2426 = vmatpush.msra.mxu3 %v2403_v36  ;;  %v2407_v41 = vld [vmem:[%s5126_s1 + $0x298] sm:$0xff] }
 0xede   :  { %v3741_v56 = vpop.eup %3740  ;;  %v2034_v34 = vmul.f32 1.442695, %v2027_v42  ;;  %2427 = vmatpush.msra.mxu3 %v2402_v47 }
 0xedf   :  { %3520 = vmatmul.msk.f32.gmra.mxu3 %vm89_vm1, %v3741_v56  ;;  %3528 = vmatmul.msk.f32.gmra.mxu0 %vm89_vm1, %v3741_v56  ;;  %v2406_v56 = vld [vmem:[%s5126_s1 + $0x290] sm:$0xff] }
 0xee0   :  { %3742 = vpow2.f32 %v2034_v34 }
 0xee6   :  { %v3743_v25 = vpop.eup %3742 }
 0xee7   :  { %3521 = vmatmul.msk.f32.gmra.mxu3 %vm89_vm1, %v3743_v25  ;;  %3529 = vmatmul.msk.f32.gmra.mxu0 %vm89_vm1, %v3743_v25 }
 0xeef   :  { %3538 = vmatmul.msk.f32.vlgmr.msrb.gmra.mxu3 %vm89_vm1, %v2195_v48  ;;  %3546 = vmatmul.msk.f32.vlgmr.msra.gmra.mxu0 %vm89_vm1, %v4506_v57 }
 0xef0   :  { %2739 = vmatpush.msra.mxu0 %v3848_v55 }
 0xef2   :  { %2740 = vmatpush.msra.mxu0 %v3848_v55 }
 0xef4   :  { %2741 = vmatpush.msra.mxu0 %v3848_v55 }
 0xef6   :  { %2742 = vmatpush.msra.mxu0 %v3848_v55 }
 0xef7   :  { %3539 = vmatmul.msk.f32.gmra.mxu3 %vm89_vm1, %v2198_v49  ;;  %3547 = vmatmul.msk.f32.gmra.mxu0 %vm89_vm1, %v4513_v14 }
 0xeff   :  { %3540 = vmatmul.msk.f32.gmra.mxu3 %vm89_vm1, %v2201_v53  ;;  %3548 = vmatmul.msk.f32.gmra.mxu0 %vm89_vm1, %v4520_v12 }
 0xf07   :  { %3541 = vmatmul.msk.f32.gmra.mxu3 %vm89_vm1, %v2204_v3  ;;  %3549 = vmatmul.msk.f32.gmra.mxu0 %vm89_vm1, %v4527_v19 }
 0xf0f   :  { %3554 = vmatmul.msk.f32.vlgmr.msra.gmra.mxu3 %vm89_vm1, %v4506_v57 }
 0xf17   :  { %3555 = vmatmul.msk.f32.gmra.mxu3 %vm89_vm1, %v4513_v14 }
 0xf1f   :  { %3556 = vmatmul.msk.f32.gmra.mxu3 %vm89_vm1, %v4520_v12 }
 0xf27   :  { %3557 = vmatmul.msk.f32.gmra.mxu3 %vm89_vm1, %v4527_v19 }
 0xf4c   :  { %v4766_v15 = vpop.f32.mrf.mxu0 }
 0xf52   :  { %v4768_v4 = vpop.f32.mrf.mxu3 }
 0xf54   :  { %v4770_v46 = vpop.f32.mrf.mxu0 }
 0xf5a   :  { %v4772_v17 = vpop.f32.mrf.mxu3 }
 0xf5c   :  { %v4774_v23 = vpop.f32.mrf.mxu0 }
 0xf62   :  { %v4776_v0 = vpop.f32.mrf.mxu3 }
 0xf64   :  { %v4778_v45 = vpop.f32.mrf.mxu0 }
 0xf6a   :  { %v4780_v26 = vpop.f32.mrf.mxu3 }
 0xf6c   :  { %v2329_v43 = vpop.f32.mrf.mxu0 }
 0xf72   :  { %v2235_v8 = vpop.f32.mrf.mxu3 }
 0xf73   :  { %v2236_v27 = vadd.f32 %v4587_v5, %v2235_v8 }
 0xf74   :  { %v2332_v37 = vpop.f32.mrf.mxu0 }
 0xf75   :  { %v2247_v10 = vsel %vm89_vm1, %v2236_v27, -inf }
 0xf76   :  { %2248 = vmax.xlane.f32.xlu0 %v2247_v10 }
 0xf7a   :  { %v2238_v7 = vpop.f32.mrf.mxu3 }
 0xf7b   :  { %v2239_v38 = vadd.f32 %v4594_v31, %v2238_v7 }
 0xf7c   :  { %v2335_v22 = vpop.f32.mrf.mxu0 }
 0xf7d   :  { %v2250_v54 = vsel %vm89_vm1, %v2239_v38, -inf }
 0xf7e   :  { %2251 = vmax.xlane.f32.xlu1 %v2250_v54 }
 0xf82   :  { %v2241_v39 = vpop.f32.mrf.mxu3 }
 0xf83   :  { %v2242_v18 = vadd.f32 %v4601_v59, %v2241_v39 }
 0xf84   :  { %v2338_v35 = vpop.f32.mrf.mxu0 }
 0xf85   :  { %2353 = vmatpush.msrb.mxu1 %v2338_v35  ;;  %v2253_v28 = vsel %vm89_vm1, %v2242_v18, -inf }
 0xf86   :  { %2254 = vmax.xlane.f32.xlu2 %v2253_v28 }
 0xf87   :  { %2354 = vmatpush.msrb.mxu1 %v2335_v22 }
 0xf89   :  { %2355 = vmatpush.msrb.mxu1 %v2332_v37 }
 0xf8a   :  { %v2244_v40 = vpop.f32.mrf.mxu3 }
 0xf8b   :  { %v2245_v29 = vadd.f32 %v4608_v24, %v2244_v40  ;;  %2356 = vmatpush.msrb.mxu1 %v2329_v43 }
 0xf8d   :  { %v2256_v52 = vsel %vm89_vm1, %v2245_v29, -inf  ;;  %2559 = vmatpush.msra.mxu1 %v2409_v9 }
 0xf8e   :  { %2257 = vmax.xlane.f32.xlu0 %v2256_v52 }
 0xf8f   :  { %2560 = vmatpush.msra.mxu1 %v2408_v20 }
 0xf91   :  { %2561 = vmatpush.msra.mxu1 %v2407_v41 }
 0xf92   :  { %v2429_v51 = vpop.f32.mrf.mxu3 }
 0xf93   :  { %2562 = vmatpush.msra.mxu1 %v2406_v56  ;;  %v2430_v3 = vadd.f32 %v3631_v2, %v2429_v51 }
 0xf9a   :  { %v2432_v43 = vpop.f32.mrf.mxu3 }
 0xf9b   :  { %v2433_v8 = vadd.f32 %v3631_v2, %v2432_v43 }
 0xfe9   :  { %v2249_v6 = vpop.xlane.xlu0 %2248 }
 0xfea   :  { %v2259_v30 = vsub.f32 %v2236_v27, %v2249_v6  ;;  %v2435_v27 = vpop.f32.mrf.mxu3 }
 0xfeb   :  { %v2436_v37 = vadd.f32 %v3631_v2, %v2435_v27 }
 0xfec   :  { %v2263_v32 = vmul.f32 1.442695, %v2259_v30 }
 0xfee   :  { %3744 = vpow2.f32 %v2263_v32 }
 0xff1   :  { %v2252_v42 = vpop.xlane.xlu1 %2251 }
 0xff2   :  { %v2260_v34 = vsub.f32 %v2239_v38, %v2252_v42  ;;  %v2438_v10 = vpop.f32.mrf.mxu3 }
 0xff3   :  { %v2439_v7 = vadd.f32 %v3631_v2, %v2438_v10 }
 0xff4   :  { %v3745_v21 = vpop.eup %3744  ;;  %v2265_v25 = vmul.f32 1.442695, %v2260_v34 }
 0xff5   :  { %3542 = vmatmul.msk.f32.vlgmr.msra.gmra.mxu2 %vm89_vm1, %v3745_v21  ;;  %3550 = vmatmul.msk.f32.vlgmr.msrb.gmra.mxu1 %vm89_vm1, %v3745_v21 }
 0xff6   :  { %3746 = vpow2.f32 %v2265_v25  ;;  %2670 = vmatpush.msra.mxu2 %v3848_v55 }
 0xff8   :  { %2671 = vmatpush.msra.mxu2 %v3848_v55 }
 0xff9   :  { %v2255_v13 = vpop.xlane.xlu2 %2254 }
 0xffa   :  { %v2261_v50 = vsub.f32 %v2242_v18, %v2255_v13  ;;  %2672 = vmatpush.msra.mxu2 %v3848_v55 }
 0xffc   :  { %v3747_v33 = vpop.eup %3746  ;;  %v2267_v36 = vmul.f32 1.442695, %v2261_v50  ;;  %2673 = vmatpush.msra.mxu2 %v3848_v55 }
 0xffd   :  { %3543 = vmatmul.msk.f32.gmra.mxu2 %vm89_vm1, %v3747_v33  ;;  %3551 = vmatmul.msk.f32.gmra.mxu1 %vm89_vm1, %v3747_v33 }
 0xffe   :  { %3748 = vpow2.f32 %v2267_v36 }
0x1001   :  { %v2258_v47 = vpop.xlane.xlu0 %2257 }
0x1002   :  { %v2262_v48 = vsub.f32 %v2245_v29, %v2258_v47 }
0x1004   :  { %v3749_v16 = vpop.eup %3748  ;;  %v2269_v49 = vmul.f32 1.442695, %v2262_v48 }
0x1005   :  { %3544 = vmatmul.msk.f32.gmra.mxu2 %vm89_vm1, %v3749_v16  ;;  %3552 = vmatmul.msk.f32.gmra.mxu1 %vm89_vm1, %v3749_v16 }
0x1006   :  { %3750 = vpow2.f32 %v2269_v49 }
0x1007   :  { %3752 = vrcp.f32 %v4679_v60 }
0x1008   :  { %3754 = vrcp.f32 %v4768_v4 }
0x1009   :  { %3756 = vrcp.f32 %v4683_v62 }
0x100c   :  { %v3751_v53 = vpop.eup %3750 }
0x100d   :  { %3545 = vmatmul.msk.f32.gmra.mxu2 %vm89_vm1, %v3751_v53  ;;  %3553 = vmatmul.msk.f32.gmra.mxu1 %vm89_vm1, %v3751_v53  ;;  %v3753_v50 = vpop.eup %3752 }
0x1015   :  { %3562 = vmatmul.msk.f32.vlgmr.msrb.gmra.mxu2 %vm89_vm1, %v2430_v3  ;;  %3570 = vmatmul.msk.f32.vlgmr.msra.gmra.mxu1 %vm89_vm1, %v4506_v57 }
0x1016   :  { %3130 = vmatpush.msrb.mxu2 %v3848_v55 }
0x1018   :  { %3131 = vmatpush.msrb.mxu2 %v3848_v55 }
0x101a   :  { %3132 = vmatpush.msrb.mxu2 %v3848_v55 }
0x101c   :  { %3133 = vmatpush.msrb.mxu2 %v3848_v55 }
0x101d   :  { %3563 = vmatmul.msk.f32.gmra.mxu2 %vm89_vm1, %v2433_v8  ;;  %3571 = vmatmul.msk.f32.gmra.mxu1 %vm89_vm1, %v4513_v14 }
0x1025   :  { %3564 = vmatmul.msk.f32.gmra.mxu2 %vm89_vm1, %v2436_v37  ;;  %3572 = vmatmul.msk.f32.gmra.mxu1 %vm89_vm1, %v4520_v12 }
0x102d   :  { %3565 = vmatmul.msk.f32.gmra.mxu2 %vm89_vm1, %v2439_v7  ;;  %3573 = vmatmul.msk.f32.gmra.mxu1 %vm89_vm1, %v4527_v19 }
0x1072   :  { %v4833_v38 = vpop.f32.mrf.mxu1 }
0x1078   :  { %v2300_v22 = vpop.f32.mrf.mxu2 }
0x107a   :  { %v4835_v54 = vpop.f32.mrf.mxu1 }
0x1080   :  { %v2303_v39 = vpop.f32.mrf.mxu2 }
0x1081   :  { %3758 = vrcp.f32 %v2303_v39 }
0x1082   :  { %v4837_v18 = vpop.f32.mrf.mxu1  ;;  %3760 = vrcp.f32 %v2300_v22 }
0x1083   :  { %3762 = vrcp.f32 %v4772_v17 }
0x1084   :  { %3764 = vrcp.f32 %v4687_v11 }
0x1088   :  { %v4839_v35 = vpop.f32.mrf.mxu2 }
0x108a   :  { %v4841_v28 = vpop.f32.mrf.mxu1 }
0x1090   :  { %v4843_v40 = vpop.f32.mrf.mxu2 }
0x1092   :  { %v2564_v29 = vpop.f32.mrf.mxu1 }
0x1098   :  { %v2470_v52 = vpop.f32.mrf.mxu2 }
0x1099   :  { %v2471_v6 = vadd.f32 %v4587_v5, %v2470_v52 }
0x109a   :  { %v2567_v30 = vpop.f32.mrf.mxu1 }
0x109b   :  { %v2482_v32 = vsel %vm89_vm1, %v2471_v6, -inf }
0x109c   :  { %2483 = vmax.xlane.f32.xlu1 %v2482_v32 }
0x10a0   :  { %v2473_v9 = vpop.f32.mrf.mxu2 }
0x10a1   :  { %v2474_v20 = vadd.f32 %v4594_v31, %v2473_v9 }
0x10a2   :  { %v2570_v41 = vpop.f32.mrf.mxu1 }
0x10a3   :  { %v2485_v42 = vsel %vm89_vm1, %v2474_v20, -inf }
0x10a4   :  { %2486 = vmax.xlane.f32.xlu2 %v2485_v42 }
0x10a8   :  { %v2476_v56 = vpop.f32.mrf.mxu2 }
0x10a9   :  { %v2477_v34 = vadd.f32 %v4601_v59, %v2476_v56  ;;  %v3755_v59 = vpop.eup %3754 }
0x10aa   :  { %v2573_v21 = vpop.f32.mrf.mxu1  ;;  %v3757_v33 = vpop.eup %3756 }
0x10ab   :  { %2588 = vmatpush.msrb.mxu3 %v2573_v21  ;;  %v2488_v25 = vsel %vm89_vm1, %v2477_v34, -inf  ;;  %v3759_v36 = vpop.eup %3758 }
0x10ac   :  { %2489 = vmax.xlane.f32.xlu0 %v2488_v25 }
0x10ad   :  { %2589 = vmatpush.msrb.mxu3 %v2570_v41 }
0x10af   :  { %2590 = vmatpush.msrb.mxu3 %v2567_v30 }
0x10b0   :  { %v2479_v5 = vpop.f32.mrf.mxu2 }
0x10b1   :  { %v2480_v13 = vadd.f32 %v4608_v24, %v2479_v5  ;;  %2591 = vmatpush.msrb.mxu3 %v2564_v29  ;;  %v3761_v24 = vpop.eup %3760 }
0x10b2   :  { %v3763_v47 = vpop.eup %3762 }
0x10b3   :  { %v2491_v31 = vsel %vm89_vm1, %v2480_v13, -inf  ;;  %v3765_v60 = vpop.eup %3764 }
0x10b4   :  { %2492 = vmax.xlane.f32.xlu1 %v2491_v31 }
0x10bc   :  { %1910 = vperm.xlu2 %3615, %v3753_v50  }
0x10c0   :  { %2141 = vperm.xlu0 %3616, %v3755_v59  }
0x10c4   :  { %1915 = vperm.xlu2 %3615, %v3757_v33  }
0x10c8   :  { %2381 = vperm.xlu0 %3616, %v3759_v36  }
0x10cd   :  { %2376 = vperm.xlu1 %3614, %v3761_v24  }
0x10d5   :  { %2146 = vperm.xlu1 %3614, %v3763_v47  }
0x10dd   :  { %1920 = vperm.xlu1 %3614, %v3765_v60  }
0x110f   :  { %v2484_v4 = vpop.xlane.xlu1 %2483 }
0x1110   :  { %v2494_v62 = vsub.f32 %v2471_v6, %v2484_v4 }
0x1112   :  { %v2498_v48 = vmul.f32 1.442695, %v2494_v62 }
0x1114   :  { %3766 = vpow2.f32 %v2498_v48 }
0x1117   :  { %v2487_v16 = vpop.xlane.xlu2 %2486 }
0x1118   :  { %v2495_v49 = vsub.f32 %v2474_v20, %v2487_v16 }
0x111a   :  { %v3767_v51 = vpop.eup %3766  ;;  %v2500_v53 = vmul.f32 1.442695, %v2495_v49 }
0x111b   :  { %3566 = vmatmul.msk.f32.vlgmr.msrb.gmra.mxu0 %vm89_vm1, %v3767_v51  ;;  %3574 = vmatmul.msk.f32.vlgmr.msrb.gmra.mxu3 %vm89_vm1, %v3767_v51 }
0x111c   :  { %3768 = vpow2.f32 %v2500_v53  ;;  %3199 = vmatpush.msrb.mxu0 %v3848_v55 }
0x111e   :  { %3200 = vmatpush.msrb.mxu0 %v3848_v55 }
0x111f   :  { %v2490_v11 = vpop.xlane.xlu0 %2489  ;;  %v1911_v41 = vpop.permute.xlu2 %1910 }
0x1120   :  { %v2496_v17 = vsub.f32 %v2477_v34, %v2490_v11  ;;  %3201 = vmatpush.msrb.mxu0 %v3848_v55  ;;  %v1928_v25 = vmul.f32 %v1911_v41, %v4681_v61  ;;  %v3632_v61 = vld [vmem:[%s5127_s2 + $0x14] ss:$0 sm:$0xff] }
0x1122   :  { %v3769_v2 = vpop.eup %3768  ;;  %v2502_v3 = vmul.f32 1.442695, %v2496_v17  ;;  %3202 = vmatpush.msrb.mxu0 %v3848_v55 }
0x1123   :  { %3567 = vmatmul.msk.f32.gmra.mxu0 %vm89_vm1, %v3769_v2  ;;  %3575 = vmatmul.msk.f32.gmra.mxu3 %vm89_vm1, %v3769_v2 }
0x1124   :  { %3770 = vpow2.f32 %v2502_v3 }
0x1127   :  { %v2493_v43 = vpop.xlane.xlu1 %2492  ;;  %v1916_v56 = vpop.permute.xlu2 %1915 }
0x1128   :  { %v2497_v8 = vsub.f32 %v2480_v13, %v2493_v43  ;;  %v1929_v31 = vmul.f32 %v1916_v56, %v4685_v63 }
0x112a   :  { %v3771_v27 = vpop.eup %3770  ;;  %v2504_v37 = vmul.f32 1.442695, %v2497_v8 }
0x112b   :  { %3568 = vmatmul.msk.f32.gmra.mxu0 %vm89_vm1, %v3771_v27  ;;  %3576 = vmatmul.msk.f32.gmra.mxu3 %vm89_vm1, %v3771_v27 }
0x112c   :  { %3772 = vpow2.f32 %v2504_v37 }
0x1132   :  { %v3773_v10 = vpop.eup %3772 }
0x1133   :  { %3569 = vmatmul.msk.f32.gmra.mxu0 %vm89_vm1, %v3773_v10  ;;  %3577 = vmatmul.msk.f32.gmra.mxu3 %vm89_vm1, %v3773_v10 }
0x113f   :  { %v2377_v42 = vpop.permute.xlu1 %2376 }
0x1140   :  { %v2394_v5 = vmul.f32 %v2377_v42, %v4833_v38 }
0x1147   :  { %v2147_v21 = vpop.permute.xlu1 %2146 }
0x1148   :  { %v2160_v13 = vmul.f32 %v2147_v21, %v4770_v46 }
0x114a   :  { %v2164_v24 = vadd.f32 %v2160_v13, %v1929_v31 }
0x114f   :  { %v1921_v16 = vpop.permute.xlu1 %1920 }
0x1198   :  { %v2535_v55 = vpop.f32.mrf.mxu0 }
0x1199   :  { %3774 = vrcp.f32 %v2535_v55 }
0x119a   :  { %3776 = vrcp.f32 %v4776_v0 }
0x119f   :  { %v3775_v7 = vpop.eup %3774 }
0x11a0   :  { %2611 = vperm.xlu0 %3616, %v3775_v7   ;;  %v2538_v22 = vpop.f32.mrf.mxu0  ;;  %v3777_v39 = vpop.eup %3776 }
0x11a1   :  { %3778 = vrcp.f32 %v2538_v22 }
0x11a2   :  { %3780 = vrcp.f32 %v4839_v35 }
0x11a7   :  { %v3779_v29 = vpop.eup %3778 }
0x11a8   :  { %2151 = vperm.xlu0 %3616, %v3777_v39   ;;  %2616 = vperm.xlu2 %3615, %v3779_v29   ;;  %v2541_v52 = vpop.f32.mrf.mxu0  ;;  %v3781_v6 = vpop.eup %3780 }
0x11a9   :  { %3782 = vrcp.f32 %v2541_v52 }
0x11aa   :  { %3784 = vrcp.f32 %v4691_v58  ;;  %v2142_v58 = vpop.permute.xlu0 %2141 }
0x11ab   :  { %3786 = vrcp.f32 %v4780_v26  ;;  %v2593_v26 = vpop.f32.mrf.mxu3 }
0x11ac   :  { %3788 = vrcp.f32 %v4843_v40  ;;  %v2159_v40 = vmul.f32 %v2142_v58, %v4766_v15 }
0x11ae   :  { %v2163_v50 = vadd.f32 %v2159_v40, %v1928_v25 }
0x11af   :  { %v3783_v30 = vpop.eup %3782 }
0x11b0   :  { %v3785_v32 = vpop.eup %3784  ;;  %2386 = vperm.xlu2 %3615, %v3781_v6   ;;  %2621 = vperm.xlu1 %3614, %v3783_v30   ;;  %v2544_v0 = vpop.f32.mrf.mxu0  ;;  %v2398_v36 = vadd.f32 %v2394_v5, %v2163_v50 }
0x11b1   :  { %3790 = vrcp.f32 %v2544_v0  ;;  %1925 = vperm.xlu0 %3616, %v3785_v32   ;;  %v3787_v9 = vpop.eup %3786 }
0x11b2   :  { %v3789_v35 = vpop.eup %3788  ;;  %v2382_v34 = vpop.permute.xlu0 %2381 }
0x11b3   :  { %v2596_v60 = vpop.f32.mrf.mxu3  ;;  %v2395_v4 = vmul.f32 %v2382_v34, %v4835_v54  ;;  %v1930_v54 = vmul.f32 %v1921_v16, %v4689_v44 }
0x11b5   :  { %v2399_v15 = vadd.f32 %v2395_v4, %v2164_v24 }
0x11b7   :  { %v3791_v20 = vpop.eup %3790 }
0x11b8   :  { %2391 = vperm.xlu1 %3614, %v3789_v35   ;;  %2156 = vperm.xlu2 %3615, %v3787_v9  }
0x11b9   :  { %2626 = vperm.xlu0 %3616, %v3791_v20  }
0x11bb   :  { %v2599_v43 = vpop.f32.mrf.mxu3 }
0x11c3   :  { %v2602_v52 = vpop.f32.mrf.mxu3 }
0x1202   :  { %v2617_v59 = vpop.permute.xlu2 %2616 }
0x1203   :  { %v2630_v62 = vmul.f32 %v2617_v59, %v2596_v60 }
0x1205   :  { %v2634_v38 = vadd.f32 %v2630_v62, %v2399_v15  ;;  %v2833_v62 = vld [vmem:[%s5126_s1 + $0x2c8] sm:$0xff] }
0x1206   :  { %2867 = vmatpush.msrb.mxu1 %v2833_v62 }
0x1207   :  { %v2638_v11 = vadd.f32 %v2634_v38, %v4513_v14 }
0x1209   :  { %v2643_v2 = vadd.f32 %v3632_v61, %v2638_v11 }
0x120a   :  { %v2387_v53 = vpop.permute.xlu2 %2386 }
0x120b   :  { %v2396_v3 = vmul.f32 %v2387_v53, %v4837_v18 }
0x1212   :  { %v2612_v33 = vpop.permute.xlu0 %2611 }
0x1213   :  { %v2629_v47 = vmul.f32 %v2612_v33, %v2593_v26 }
0x1215   :  { %v2633_v48 = vadd.f32 %v2629_v47, %v2398_v36 }
0x1217   :  { %v2637_v46 = vadd.f32 %v2633_v48, %v4506_v57 }
0x1219   :  { %v2642_v63 = vadd.f32 %v3632_v61, %v2637_v46 }
0x121a   :  { %v2152_v49 = vpop.permute.xlu0 %2151 }
0x121b   :  { %v2161_v51 = vmul.f32 %v2152_v49, %v4774_v23  ;;  %3578 = vmatmul.msk.f32.vlgmr.msra.gmra.mxu2 %vm89_vm1, %v2642_v63  ;;  %v2157_v23 = vpop.permute.xlu2 %2156 }
0x121c   :  { %v2162_v44 = vmul.f32 %v2157_v23, %v4778_v45 }
0x121d   :  { %v2165_v17 = vadd.f32 %v2161_v51, %v1930_v54 }
0x121f   :  { %v2400_v57 = vadd.f32 %v2396_v3, %v2165_v17 }
0x1222   :  { %v2622_v8 = vpop.permute.xlu1 %2621 }
0x1223   :  { %v2631_v27 = vmul.f32 %v2622_v8, %v2599_v43  ;;  %v1926_v37 = vpop.permute.xlu0 %1925  ;;  %3579 = vmatmul.msk.f32.gmra.mxu2 %vm89_vm1, %v2643_v2 }
0x1224   :  { %v1931_v7 = vmul.f32 %v1926_v37, %v4693_v1 }
0x1225   :  { %v2635_v10 = vadd.f32 %v2631_v27, %v2400_v57 }
0x1226   :  { %v2166_v39 = vadd.f32 %v2162_v44, %v1931_v7 }
0x1227   :  { %v2639_v55 = vadd.f32 %v2635_v10, %v4520_v12 }
0x1229   :  { %v2644_v14 = vadd.f32 %v3632_v61, %v2639_v55 }
0x122a   :  { %v2392_v22 = vpop.permute.xlu1 %2391 }
0x122b   :  { %v2397_v18 = vmul.f32 %v2392_v22, %v4841_v28  ;;  %v2627_v29 = vpop.permute.xlu0 %2626  ;;  %3580 = vmatmul.msk.f32.gmra.mxu2 %vm89_vm1, %v2644_v14  ;;  %v2831_v22 = vld [vmem:[%s5126_s1 + $0x2b8] sm:$0xff] }
0x122c   :  { %v2632_v30 = vmul.f32 %v2627_v29, %v2602_v52  ;;  %v3634_v52 = vld [vmem:[%s5127_s2 + $0x18] ss:$0 sm:$0xff] }
0x122d   :  { %v2401_v6 = vadd.f32 %v2397_v18, %v2166_v39  ;;  %v2830_v39 = vld [vmem:[%s5126_s1 + $0x2b0] sm:$0xff] }
0x122e   :  { %v3633_v18 = vld [vmem:[%s5127_s2 + $0x17] ss:$0 sm:$0xff] }
0x122f   :  { %v2636_v32 = vadd.f32 %v2632_v30, %v2401_v6 }
0x1231   :  { %v2640_v0 = vadd.f32 %v2636_v32, %v4527_v19 }
0x1233   :  { %v2645_v9 = vadd.f32 %v3632_v61, %v2640_v0 }
0x1235   :  { %3581 = vmatmul.msk.f32.gmra.mxu2 %vm89_vm1, %v2645_v9 }
0x129e   :  { %v2675_v12 = vpop.f32.mrf.mxu2 }
0x129f   :  { %2689 = vperm.xlu2 %3615, %v2675_v12  }
0x12a6   :  { %v2678_v1 = vpop.f32.mrf.mxu2 }
0x12a7   :  { %2694 = vperm.xlu1 %3614, %v2678_v1  }
0x12ae   :  { %v2681_v45 = vpop.f32.mrf.mxu2 }
0x12af   :  { %2699 = vperm.xlu0 %3616, %v2681_v45  }
0x12b8   :  { %v2684_v35 = vpop.f32.mrf.mxu2 }
0x12b9   :  { %2704 = vperm.xlu2 %3615, %v2684_v35  }
0x12f9   :  { %v2690_v28 = vpop.permute.xlu2 %2689 }
0x12fa   :  { %v4898_v20 = vsub.f32 %v2642_v63, %v2690_v28 }
0x12fc   :  { %v2711_v41 = vmul.f32 %v4898_v20, %v4898_v20 }
0x12fe   :  { %3582 = vmatmul.msk.f32.vlgmr.msra.gmra.mxu0 %vm89_vm1, %v2711_v41 }
0x1313   :  { %v2705_v21 = vpop.permute.xlu2 %2704 }
0x1314   :  { %v4913_v40 = vsub.f32 %v2645_v9, %v2705_v21 }
0x1316   :  { %v2714_v25 = vmul.f32 %v4913_v40, %v4913_v40 }
0x1319   :  { %v2695_v19 = vpop.permute.xlu1 %2694 }
0x131a   :  { %v4903_v58 = vsub.f32 %v2643_v2, %v2695_v19 }
0x131c   :  { %v2712_v42 = vmul.f32 %v4903_v58, %v4903_v58 }
0x131e   :  { %3583 = vmatmul.msk.f32.gmra.mxu0 %vm89_vm1, %v2712_v42 }
0x1321   :  { %v2700_v56 = vpop.permute.xlu0 %2699 }
0x1322   :  { %v4908_v34 = vsub.f32 %v2644_v14, %v2700_v56  ;;  %v2832_v14 = vld [vmem:[%s5126_s1 + $0x2c0] sm:$0xff]  ;;  %v4959_v56 = vld [vmem:[%s5127_s2 + $0x15] ss:$0 sm:$0xff] }
0x1323   :  { %2868 = vmatpush.msrb.mxu1 %v2832_v14 }
0x1324   :  { %v2713_v26 = vmul.f32 %v4908_v34, %v4908_v34 }
0x1325   :  { %2869 = vmatpush.msrb.mxu1 %v2831_v22 }
0x1326   :  { %3584 = vmatmul.msk.f32.gmra.mxu0 %vm89_vm1, %v2713_v26 }
0x1327   :  { %2870 = vmatpush.msrb.mxu1 %v2830_v39 }
0x132e   :  { %3585 = vmatmul.msk.f32.gmra.mxu0 %vm89_vm1, %v2714_v25 }
0x137b   :  { %v2744_v5 = vpop.f32.mrf.mxu0 }
0x137c   :  { %v2745_v13 = vadd.f32 1e-05, %v2744_v5 }
0x137e   :  { %3792 = vrsqrt.f32 %v2745_v13  ;;  %vm2762_vm15 = vweird.f32 %v2745_v13 }
0x1384   :  { %v3793_v31 = vpop.eup %3792 }
0x1385   :  { %v2757_v50 = vmul.f32 %v3793_v31, %v2745_v13  ;;  %vm2763_vm14 = vweird.f32 %v3793_v31 }
0x1386   :  { %vm2764_vm0 = vmor %vm2762_vm15, %vm2763_vm14 }
0x1387   :  { %v2758_v59 = vmul.f32 %v3793_v31, %v2757_v50  ;;  %v2840_v50 = vld [vmem:[%s5126_s1 + $0x300] sm:$0xff] }
0x1389   :  { %v2759_v33 = vmul.f32 0.5, %v2758_v59 }
0x138b   :  { %v2760_v36 = vsub.f32 1.5, %v2759_v33 }
0x138d   :  { %v2761_v24 = vmul.f32 %v3793_v31, %v2760_v36  ;;  %v2839_v36 = vld [vmem:[%s5126_s1 + $0x2f8] sm:$0xff] }
0x138f   :  { %v2765_v47 = vsel %vm2764_vm0, %v3793_v31, %v2761_v24 }
0x1390   :  { %2798 = vperm.xlu1 %3614, %v2765_v47  }
0x139b   :  { %v2747_v60 = vpop.f32.mrf.mxu0 }
0x139c   :  { %v2748_v4 = vadd.f32 1e-05, %v2747_v60  ;;  %v2838_v60 = vld [vmem:[%s5126_s1 + $0x2f0] sm:$0xff] }
0x139e   :  { %3794 = vrsqrt.f32 %v2748_v4  ;;  %vm2772_vm4 = vweird.f32 %v2748_v4 }
0x13a3   :  { %v2750_v48 = vpop.f32.mrf.mxu0 }
0x13a4   :  { %v3795_v61 = vpop.eup %3794  ;;  %v2751_v15 = vadd.f32 1e-05, %v2750_v48  ;;  %v2837_v48 = vld [vmem:[%s5126_s1 + $0x2e8] sm:$0xff] }
0x13a5   :  { %v2767_v46 = vmul.f32 %v3795_v61, %v2748_v4  ;;  %vm2773_vm2 = vweird.f32 %v3795_v61 }
0x13a6   :  { %3796 = vrsqrt.f32 %v2751_v15  ;;  %vm2774_vm5 = vmor %vm2772_vm4, %vm2773_vm2  ;;  %vm2782_vm7 = vweird.f32 %v2751_v15 }
0x13a7   :  { %v2768_v38 = vmul.f32 %v3795_v61, %v2767_v46 }
0x13a9   :  { %v2769_v63 = vmul.f32 0.5, %v2768_v38 }
0x13ab   :  { %v2770_v16 = vsub.f32 1.5, %v2769_v63  ;;  %v2753_v49 = vpop.f32.mrf.mxu0  ;;  %v2836_v63 = vld [vmem:[%s5126_s1 + $0x2e0] sm:$0xff] }
0x13ac   :  { %v3797_v51 = vpop.eup %3796  ;;  %v2754_v53 = vadd.f32 1e-05, %v2753_v49 }
0x13ad   :  { %v2777_v54 = vmul.f32 %v3797_v51, %v2751_v15  ;;  %v2771_v11 = vmul.f32 %v3795_v61, %v2770_v16  ;;  %vm2783_vm6 = vweird.f32 %v3797_v51 }
0x13ae   :  { %3798 = vrsqrt.f32 %v2754_v53  ;;  %vm2784_vm8 = vmor %vm2782_vm7, %vm2783_vm6  ;;  %vm2792_vm10 = vweird.f32 %v2754_v53 }
0x13af   :  { %v2778_v17 = vmul.f32 %v3797_v51, %v2777_v54  ;;  %v2775_v2 = vsel %vm2774_vm5, %v3795_v61, %v2771_v11  ;;  %v2834_v54 = vld [vmem:[%s5126_s1 + $0x2d0] sm:$0xff] }
0x13b0   :  { %2803 = vperm.xlu0 %3616, %v2775_v2  }
0x13b1   :  { %v2779_v3 = vmul.f32 0.5, %v2778_v17 }
0x13b3   :  { %v2780_v43 = vsub.f32 1.5, %v2779_v3 }
0x13b4   :  { %v3799_v8 = vpop.eup %3798 }
0x13b5   :  { %v2787_v57 = vmul.f32 %v3799_v8, %v2754_v53  ;;  %v2781_v27 = vmul.f32 %v3797_v51, %v2780_v43  ;;  %vm2793_vm9 = vweird.f32 %v3799_v8 }
0x13b6   :  { %vm2794_vm11 = vmor %vm2792_vm10, %vm2793_vm9 }
0x13b7   :  { %v2788_v37 = vmul.f32 %v3799_v8, %v2787_v57  ;;  %v2785_v10 = vsel %vm2784_vm8, %v3797_v51, %v2781_v27  ;;  %v2835_v51 = vld [vmem:[%s5126_s1 + $0x2d8] sm:$0xff] }
0x13b8   :  { %2808 = vperm.xlu2 %3615, %v2785_v10  }
0x13b9   :  { %v2789_v23 = vmul.f32 0.5, %v2788_v37 }
0x13bb   :  { %v2790_v55 = vsub.f32 1.5, %v2789_v23 }
0x13bd   :  { %v2791_v7 = vmul.f32 %v3799_v8, %v2790_v55 }
0x13bf   :  { %v2795_v44 = vsel %vm2794_vm11, %v3799_v8, %v2791_v7 }
0x13c0   :  { %2813 = vperm.xlu1 %3614, %v2795_v44  }
0x1402   :  { %v2799_v29 = vpop.permute.xlu1 %2798 }
0x1403   :  { %v2816_v6 = vmul.f32 %v2799_v29, %v4898_v20 }
0x1405   :  { %v2821_v30 = vmul.f32 %v3633_v18, %v2816_v6 }
0x1407   :  { %v4937_v32 = vadd.f32 %v3634_v52, %v2821_v30 }
0x1409   :  { %3586 = vmatmul.msk.f32.vlgmr.msrb.gmra.mxu1 %vm89_vm1, %v4937_v32 }
0x1412   :  { %v2809_v12 = vpop.permute.xlu2 %2808 }
0x1413   :  { %v2818_v45 = vmul.f32 %v2809_v12, %v4908_v34 }
0x1415   :  { %v2823_v28 = vmul.f32 %v3633_v18, %v2818_v45 }
0x1417   :  { %v4947_v20 = vadd.f32 %v3634_v52, %v2823_v28 }
0x1422   :  { %v2804_v0 = vpop.permute.xlu0 %2803 }
0x1423   :  { %v2817_v9 = vmul.f32 %v2804_v0, %v4903_v58 }
0x1425   :  { %v2822_v1 = vmul.f32 %v3633_v18, %v2817_v9 }
0x1427   :  { %v4943_v35 = vadd.f32 %v3634_v52, %v2822_v1 }
0x1429   :  { %3587 = vmatmul.msk.f32.gmra.mxu1 %vm89_vm1, %v4943_v35 }
0x1431   :  { %3588 = vmatmul.msk.f32.gmra.mxu1 %vm89_vm1, %v4947_v20 }
0x1432   :  { %v2814_v41 = vpop.permute.xlu1 %2813 }
0x1433   :  { %v2819_v19 = vmul.f32 %v2814_v41, %v4913_v40  ;;  %v2841_v40 = vld [vmem:[%s5126_s1 + $0x308] sm:$0xff] }
0x1434   :  { %3081 = vmatpush.msra.mxu3 %v2841_v40 }
0x1435   :  { %v2824_v42 = vmul.f32 %v3633_v18, %v2819_v19 }
0x1436   :  { %3082 = vmatpush.msra.mxu3 %v2840_v50 }
0x1437   :  { %v4952_v58 = vadd.f32 %v3634_v52, %v2824_v42 }
0x1438   :  { %3083 = vmatpush.msra.mxu3 %v2839_v36 }
0x1439   :  { %3589 = vmatmul.msk.f32.gmra.mxu1 %vm89_vm1, %v4952_v58 }
0x143a   :  { %3084 = vmatpush.msra.mxu3 %v2838_v60 }
0x143c   :  { %3085 = vmatpush.msra.mxu3 %v2837_v48 }
0x143e   :  { %3086 = vmatpush.msra.mxu3 %v2836_v63 }
0x1440   :  { %3087 = vmatpush.msra.mxu3 %v2835_v51 }
0x1442   :  { %3088 = vmatpush.msra.mxu3 %v2834_v54 }
0x1486   :  { %v2872_v34 = vpop.f32.mrf.mxu1 }
0x1487   :  { %v4962_v26 = vadd.f32 %v4959_v56, %v2872_v34 }
0x1489   :  { %v2888_v21 = vmul.f32 0.70710677, %v4962_v26 }
0x148b   :  { %v2892_v25 = vmul.f32 %v2888_v21, %v2888_v21 }
0x148d   :  { %v2893_v5 = vmin.f32 %v2892_v25, 16.0 }
0x148f   :  { %v2894_v13 = vmul.f32 2.1237322e-06, %v2893_v5  ;;  %v2905_v31 = vmul.f32 3.8918573e-05, %v2893_v5 }
0x1491   :  { %v2895_v59 = vadd.f32 0.00028619796, %v2894_v13  ;;  %v2906_v33 = vadd.f32 0.001143296, %v2905_v31 }
0x1493   :  { %v2896_v24 = vmul.f32 %v2895_v59, %v2893_v5  ;;  %v2907_v47 = vmul.f32 %v2906_v33, %v2893_v5  ;;  %v2884_v59 = vmul.f32 0.5, %v4962_v26 }
0x1495   :  { %v2908_v4 = vadd.f32 0.014752088, %v2907_v47  ;;  %v2897_v62 = vadd.f32 0.0036580483, %v2896_v24 }
0x1497   :  { %v2909_v61 = vmul.f32 %v2908_v4, %v2893_v5  ;;  %v2898_v46 = vmul.f32 %v2897_v62, %v2893_v5 }
0x1499   :  { %v2910_v15 = vadd.f32 0.112945676, %v2909_v61  ;;  %v2899_v49 = vadd.f32 0.05243302, %v2898_v46 }
0x149b   :  { %v2911_v38 = vmul.f32 %v2910_v15, %v2893_v5  ;;  %v2900_v17 = vmul.f32 %v2899_v49, %v2893_v5 }
0x149d   :  { %v2912_v16 = vadd.f32 0.4994258, %v2911_v38  ;;  %v2901_v2 = vadd.f32 0.18741608, %v2900_v17 }
0x149f   :  { %v2913_v53 = vmul.f32 %v2912_v16, %v2893_v5  ;;  %v2902_v27 = vmul.f32 %v2901_v2, %v2893_v5 }
0x14a1   :  { %v2914_v11 = vadd.f32 1.0, %v2913_v53  ;;  %v2903_v44 = vadd.f32 1.1283791, %v2902_v27 }
0x14a3   :  { %3800 = vrcp.f32 %v2914_v11  ;;  %v2926_v55 = vand.u32 2147483648, %v2914_v11  ;;  %v2924_v22 = vand.u32 2147483647, %v2914_v11  ;;  %vm2920_vm13 = vweird.f32 %v2914_v11 }
0x14a4   :  { %v2904_v12 = vmul.f32 %v2903_v44, %v2888_v21 }
0x14a5   :  { %v2927_v30 = vor.u32 1.1754944e-38, %v2926_v55  ;;  %vm2925_vm15 = vcmp.eq.f32.partialorder %v2924_v22, 8.507059e+37 }
0x14a6   :  { %v2875_v3 = vpop.f32.mrf.mxu1 }
0x14a7   :  { %v4990_v43 = vadd.f32 %v4959_v56, %v2875_v3 }
0x14a9   :  { %v3801_v8 = vpop.eup %3800  ;;  %v4993_v57 = vmul.f32 0.70710677, %v4990_v43 }
0x14aa   :  { %v2916_v37 = vmul.f32 %v3801_v8, %v2914_v11  ;;  %vm2921_vm12 = vweird.f32 %v3801_v8 }
0x14ab   :  { %v2932_v10 = vmul.f32 %v4993_v57, %v4993_v57  ;;  %vm2922_vm14 = vmor %vm2920_vm13, %vm2921_vm12 }
0x14ac   :  { %v2917_v23 = vsub.f32 1.0, %v2916_v37 }
0x14ad   :  { %v4997_v7 = vmin.f32 %v2932_v10, 16.0 }
0x14ae   :  { %v2918_v14 = vmul.f32 %v3801_v8, %v2917_v23  ;;  %v2878_v39 = vpop.f32.mrf.mxu1 }
0x14af   :  { %v2934_v18 = vmul.f32 2.1237322e-06, %v4997_v7  ;;  %v2945_v29 = vmul.f32 3.8918573e-05, %v4997_v7  ;;  %v5002_v52 = vadd.f32 %v4959_v56, %v2878_v39 }
0x14b0   :  { %v2919_v6 = vadd.f32 %v3801_v8, %v2918_v14 }
0x14b1   :  { %v2935_v0 = vadd.f32 0.00028619796, %v2934_v18  ;;  %v2946_v9 = vadd.f32 0.001143296, %v2945_v29  ;;  %v5005_v45 = vmul.f32 0.70710677, %v5002_v52 }
0x14b2   :  { %v2923_v1 = vsel %vm2922_vm14, %v3801_v8, %v2919_v6 }
0x14b3   :  { %v2928_v28 = vsel %vm2925_vm15, %v2927_v30, %v2923_v1  ;;  %v2936_v41 = vmul.f32 %v2935_v0, %v4997_v7  ;;  %v2947_v19 = vmul.f32 %v2946_v9, %v4997_v7  ;;  %v2972_v34 = vmul.f32 %v5005_v45, %v5005_v45 }
0x14b4   :  { %v2929_v42 = vmul.f32 %v2928_v28, %v2904_v12 }
0x14b5   :  { %v2937_v25 = vadd.f32 0.0036580483, %v2936_v41  ;;  %v2948_v5 = vadd.f32 0.014752088, %v2947_v19  ;;  %v5011_v13 = vmin.f32 %v2972_v34, 16.0 }
0x14b6   :  { %v3590_v40 = vclamps-f32 %v2929_v42, 1.0  ;;  %v2881_v21 = vpop.f32.mrf.mxu1 }
0x14b7   :  { %v2949_v31 = vmul.f32 %v2948_v5, %v4997_v7  ;;  %v5015_v50 = vadd.f32 %v4959_v56, %v2881_v21  ;;  %v2974_v36 = vmul.f32 2.1237322e-06, %v5011_v13  ;;  %v2985_v24 = vmul.f32 3.8918573e-05, %v5011_v13 }
0x14b8   :  { %v3052_v33 = vadd.f32 1.0, %v3590_v40  ;;  %v2938_v47 = vmul.f32 %v2937_v25, %v4997_v7 }
0x14b9   :  { %v2950_v60 = vadd.f32 0.112945676, %v2949_v31  ;;  %v2975_v62 = vadd.f32 0.00028619796, %v2974_v36  ;;  %v2986_v48 = vadd.f32 0.001143296, %v2985_v24 }
0x14ba   :  { %v3056_v4 = vmul.f32 %v3052_v33, %v2884_v59  ;;  %v5022_v61 = vmul.f32 0.70710677, %v5015_v50  ;;  %v2939_v38 = vadd.f32 0.05243302, %v2938_v47 }
0x14bb   :  { %v2951_v15 = vmul.f32 %v2950_v60, %v4997_v7  ;;  %v2976_v56 = vmul.f32 %v2975_v62, %v5011_v13  ;;  %v2987_v26 = vmul.f32 %v2986_v48, %v5011_v13 }
0x14bc   :  { %v3012_v46 = vmul.f32 %v5022_v61, %v5022_v61  ;;  %3594 = vmatmul.msk.f32.vlgmr.msra.gmra.mxu3 %vm1452_vm3, %v3056_v4  ;;  %v2940_v17 = vmul.f32 %v2939_v38, %v4997_v7 }
0x14bd   :  { %v2952_v63 = vadd.f32 0.4994258, %v2951_v15  ;;  %v2988_v16 = vadd.f32 0.014752088, %v2987_v26  ;;  %v2977_v53 = vadd.f32 0.0036580483, %v2976_v56 }
0x14be   :  { %v5030_v49 = vmin.f32 %v3012_v46, 16.0  ;;  %v2941_v23 = vadd.f32 0.18741608, %v2940_v17 }
0x14bf   :  { %v2953_v51 = vmul.f32 %v2952_v63, %v4997_v7  ;;  %v2989_v54 = vmul.f32 %v2988_v16, %v5011_v13  ;;  %v2978_v37 = vmul.f32 %v2977_v53, %v5011_v13 }
0x14c0   :  { %v3014_v11 = vmul.f32 2.1237322e-06, %v5030_v49  ;;  %v3025_v3 = vmul.f32 3.8918573e-05, %v5030_v49  ;;  %v2942_v6 = vmul.f32 %v2941_v23, %v4997_v7 }
0x14c1   :  { %v2954_v2 = vadd.f32 1.0, %v2953_v51  ;;  %v2990_v8 = vadd.f32 0.112945676, %v2989_v54  ;;  %v2979_v22 = vadd.f32 0.05243302, %v2978_v37  ;;  %v2885_v54 = vmul.f32 0.5, %v4990_v43 }
0x14c2   :  { %v3015_v27 = vadd.f32 0.00028619796, %v3014_v11  ;;  %v3026_v55 = vadd.f32 0.001143296, %v3025_v3  ;;  %v2943_v19 = vadd.f32 1.1283791, %v2942_v6 }
0x14c3   :  { %3802 = vrcp.f32 %v2954_v2  ;;  %v2991_v10 = vmul.f32 %v2990_v8, %v5011_v13  ;;  %v2980_v1 = vmul.f32 %v2979_v22, %v5011_v13  ;;  %v2966_v42 = vand.u32 2147483648, %v2954_v2 }
0x14c4   :  { %v3016_v14 = vmul.f32 %v3015_v27, %v5030_v49  ;;  %v3027_v39 = vmul.f32 %v3026_v55, %v5030_v49  ;;  %v2964_v5 = vand.u32 2147483647, %v2954_v2  ;;  %vm2960_vm2 = vweird.f32 %v2954_v2 }
0x14c5   :  { %v2992_v44 = vadd.f32 0.4994258, %v2991_v10  ;;  %v2981_v21 = vadd.f32 0.18741608, %v2980_v1  ;;  %v2967_v59 = vor.u32 1.1754944e-38, %v2966_v42  ;;  %v2944_v24 = vmul.f32 %v2943_v19, %v4993_v57 }
0x14c6   :  { %v3028_v30 = vadd.f32 0.014752088, %v3027_v39  ;;  %v3017_v12 = vadd.f32 0.0036580483, %v3016_v14  ;;  %vm2965_vm5 = vcmp.eq.f32.partialorder %v2964_v5, 8.507059e+37  ;;  %v2886_v14 = vmul.f32 0.5, %v5002_v52 }
0x14c7   :  { %v2993_v18 = vmul.f32 %v2992_v44, %v5011_v13  ;;  %v2982_v62 = vmul.f32 %v2981_v21, %v5011_v13 }
0x14c8   :  { %v3029_v28 = vmul.f32 %v3028_v30, %v5030_v49  ;;  %v3018_v40 = vmul.f32 %v3017_v12, %v5030_v49 }
0x14c9   :  { %v3803_v29 = vpop.eup %3802  ;;  %v2994_v9 = vadd.f32 1.0, %v2993_v18  ;;  %v2983_v51 = vadd.f32 1.1283791, %v2982_v62 }
0x14ca   :  { %v2956_v0 = vmul.f32 %v3803_v29, %v2954_v2  ;;  %v3030_v34 = vadd.f32 0.112945676, %v3029_v28  ;;  %vm2961_vm0 = vweird.f32 %v3803_v29  ;;  %v3019_v60 = vadd.f32 0.05243302, %v3018_v40 }
0x14cb   :  { %3804 = vrcp.f32 %v2994_v9  ;;  %vm2962_vm4 = vmor %vm2960_vm2, %vm2961_vm0  ;;  %v3006_v38 = vand.u32 2147483648, %v2994_v9  ;;  %v3004_v57 = vand.u32 2147483647, %v2994_v9  ;;  %vm3000_vm7 = vweird.f32 %v2994_v9 }
0x14cc   :  { %v2957_v41 = vsub.f32 1.0, %v2956_v0  ;;  %v3031_v7 = vmul.f32 %v3030_v34, %v5030_v49  ;;  %v3020_v63 = vmul.f32 %v3019_v60, %v5030_v49  ;;  %v2984_v8 = vmul.f32 %v2983_v51, %v5005_v45  ;;  %v3636_v34 = vld [vmem:[%s5127_s2 + $0x16] ss:$0 sm:$0xff] }
0x14cd   :  { %v3007_v2 = vor.u32 1.1754944e-38, %v3006_v38  ;;  %vm3005_vm9 = vcmp.eq.f32.partialorder %v3004_v57, 8.507059e+37 }
0x14ce   :  { %v2958_v25 = vmul.f32 %v3803_v29, %v2957_v41  ;;  %v3032_v33 = vadd.f32 0.4994258, %v3031_v7  ;;  %v3021_v3 = vadd.f32 0.18741608, %v3020_v63  ;;  %v2887_v41 = vmul.f32 0.5, %v5015_v50 }
0x14d0   :  { %v2959_v31 = vadd.f32 %v3803_v29, %v2958_v25  ;;  %v3033_v56 = vmul.f32 %v3032_v33, %v5030_v49  ;;  %v3022_v55 = vmul.f32 %v3021_v3, %v5030_v49 }
0x14d1   :  { %v3805_v36 = vpop.eup %3804 }
0x14d2   :  { %v2963_v47 = vsel %vm2962_vm4, %v3803_v29, %v2959_v31  ;;  %v2996_v48 = vmul.f32 %v3805_v36, %v2994_v9  ;;  %v3034_v16 = vadd.f32 1.0, %v3033_v56  ;;  %vm3001_vm6 = vweird.f32 %v3805_v36 }
0x14d3   :  { %v2968_v4 = vsel %vm2965_vm5, %v2967_v59, %v2963_v47  ;;  %vm3002_vm8 = vmor %vm3000_vm7, %vm3001_vm6  ;;  %v3023_v18 = vadd.f32 1.1283791, %v3022_v55 }
0x14d4   :  { %v2969_v15 = vmul.f32 %v2968_v4, %v2944_v24  ;;  %v2997_v26 = vsub.f32 1.0, %v2996_v48  ;;  %3806 = vrcp.f32 %v3034_v16  ;;  %v3046_v29 = vand.u32 2147483648, %v3034_v16 }
0x14d5   :  { %v3044_v45 = vand.u32 2147483647, %v3034_v16  ;;  %vm3040_vm11 = vweird.f32 %v3034_v16  ;;  %v3024_v49 = vmul.f32 %v3023_v18, %v5022_v61 }
0x14d6   :  { %v3591_v46 = vclamps-f32 %v2969_v15, 1.0  ;;  %v2998_v53 = vmul.f32 %v3805_v36, %v2997_v26  ;;  %v3047_v9 = vor.u32 1.1754944e-38, %v3046_v29 }
0x14d7   :  { %vm3045_vm13 = vcmp.eq.f32.partialorder %v3044_v45, 8.507059e+37 }
0x14d8   :  { %v3053_v11 = vadd.f32 1.0, %v3591_v46  ;;  %v2999_v17 = vadd.f32 %v3805_v36, %v2998_v53 }
0x14da   :  { %v3057_v13 = vmul.f32 %v3053_v11, %v2885_v54  ;;  %v3003_v27 = vsel %vm3002_vm8, %v3805_v36, %v2999_v17  ;;  %v3807_v23 = vpop.eup %3806 }
0x14db   :  { %v3008_v37 = vsel %vm3005_vm9, %v3007_v2, %v3003_v27  ;;  %v3036_v44 = vmul.f32 %v3807_v23, %v3034_v16  ;;  %vm3041_vm10 = vweird.f32 %v3807_v23 }
0x14dc   :  { %3595 = vmatmul.msk.f32.gmra.mxu3 %vm1452_vm3, %v3057_v13  ;;  %v3009_v10 = vmul.f32 %v3008_v37, %v2984_v8  ;;  %vm3042_vm12 = vmor %vm3040_vm11, %vm3041_vm10 }
0x14dd   :  { %v3037_v39 = vsub.f32 1.0, %v3036_v44 }
0x14de   :  { %v3592_v43 = vclamps-f32 %v3009_v10, 1.0 }
0x14df   :  { %v3038_v30 = vmul.f32 %v3807_v23, %v3037_v39 }
0x14e0   :  { %v3054_v22 = vadd.f32 1.0, %v3592_v43 }
0x14e1   :  { %v3039_v0 = vadd.f32 %v3807_v23, %v3038_v30 }
0x14e2   :  { %v3058_v6 = vmul.f32 %v3054_v22, %v2886_v14 }
0x14e3   :  { %v3043_v12 = vsel %vm3042_vm12, %v3807_v23, %v3039_v0 }
0x14e4   :  { %3596 = vmatmul.msk.f32.gmra.mxu3 %vm1452_vm3, %v3058_v6  ;;  %v3048_v1 = vsel %vm3045_vm13, %v3047_v9, %v3043_v12 }
0x14e5   :  { %v3049_v52 = vmul.f32 %v3048_v1, %v3024_v49 }
0x14e7   :  { %v3593_v28 = vclamps-f32 %v3049_v52, 1.0 }
0x14e9   :  { %v3055_v19 = vadd.f32 1.0, %v3593_v28 }
0x14eb   :  { %v3059_v42 = vmul.f32 %v3055_v19, %v2887_v41 }
0x14ed   :  { %3597 = vmatmul.msk.f32.gmra.mxu3 %vm1452_vm3, %v3059_v42 }
0x153f   :  { %v3090_v25 = vpop.f32.mrf.mxu3 }
0x1540   :  { %v3091_v5 = vadd.f32 %v3636_v34, %v3090_v25  ;;  %v24_v25 = vld [vmem:[%s5126_s1 + $0x48] sm:$0xff] }
0x1541   :  { %3329 = vmatpush.msrb.mxu3 %v24_v25 }
0x1542   :  { %v3102_v40 = vadd.f32 %v3091_v5, %v4937_v32  ;;  %v23_v5 = vld [vmem:[%s5126_s1 + $0x40] sm:$0xff] }
0x1543   :  { %3330 = vmatpush.msrb.mxu3 %v23_v5 }
0x1544   :  { %3598 = vmatmul.msk.f32.vlgmr.msrb.gmra.mxu2 %vm89_vm1, %v3102_v40 }
0x155f   :  { %v3093_v61 = vpop.f32.mrf.mxu3 }
0x1560   :  { %v3094_v21 = vadd.f32 %v3636_v34, %v3093_v61  ;;  %v21_v61 = vld [vmem:[%s5126_s1 + $0x30] sm:$0xff] }
0x1562   :  { %v3103_v7 = vadd.f32 %v3094_v21, %v4943_v35 }
0x1564   :  { %3599 = vmatmul.msk.f32.gmra.mxu2 %vm89_vm1, %v3103_v7 }
0x1567   :  { %v3096_v50 = vpop.f32.mrf.mxu3 }
0x1568   :  { %v3097_v31 = vadd.f32 %v3636_v34, %v3096_v50 }
0x156a   :  { %v3104_v59 = vadd.f32 %v3097_v31, %v4947_v20  ;;  %v3638_v31 = vld [vmem:[%s5127_s2 + $0x1a] ss:$0 sm:$0xff] }
0x156c   :  { %3600 = vmatmul.msk.f32.gmra.mxu2 %vm89_vm1, %v3104_v59 }
0x1570   :  { %v3099_v33 = vpop.f32.mrf.mxu3 }
0x1571   :  { %v3100_v36 = vadd.f32 %v3636_v34, %v3099_v33 }
0x1573   :  { %v3105_v24 = vadd.f32 %v3100_v36, %v4952_v58 }
0x1575   :  { %3601 = vmatmul.msk.f32.gmra.mxu2 %vm89_vm1, %v3105_v24 }
0x15c7   :  { %v3135_v32 = vpop.f32.mrf.mxu2 }
0x15c8   :  { %3149 = vperm.xlu0 %3616, %v3135_v32  }
0x15e7   :  { %v3138_v47 = vpop.f32.mrf.mxu2 }
0x15e8   :  { %3154 = vperm.xlu2 %3615, %v3138_v47  }
0x15ef   :  { %v3141_v60 = vpop.f32.mrf.mxu2 }
0x15f0   :  { %3159 = vperm.xlu1 %3614, %v3141_v60  }
0x15f8   :  { %v3144_v35 = vpop.f32.mrf.mxu2 }
0x15f9   :  { %3164 = vperm.xlu0 %3616, %v3144_v35  }
0x163a   :  { %v3150_v4 = vpop.permute.xlu0 %3149 }
0x163b   :  { %v5071_v62 = vsub.f32 %v3102_v40, %v3150_v4  ;;  %v22_v40 = vld [vmem:[%s5126_s1 + $0x38] sm:$0xff] }
0x163c   :  { %3331 = vmatpush.msrb.mxu3 %v22_v40 }
0x163d   :  { %v3171_v20 = vmul.f32 %v5071_v62, %v5071_v62 }
0x163e   :  { %3332 = vmatpush.msrb.mxu3 %v21_v61 }
0x163f   :  { %3602 = vmatmul.msk.f32.vlgmr.msrb.gmra.mxu0 %vm89_vm1, %v3171_v20 }
0x1642   :  { %v3155_v48 = vpop.permute.xlu2 %3154 }
0x1643   :  { %v5076_v58 = vsub.f32 %v3103_v7, %v3155_v48  ;;  %v3637_v7 = vld [vmem:[%s5127_s2 + $0x19] ss:$0 sm:$0xff] }
0x1645   :  { %v3172_v15 = vmul.f32 %v5076_v58, %v5076_v58 }
0x1647   :  { %3603 = vmatmul.msk.f32.gmra.mxu0 %vm89_vm1, %v3172_v15 }
0x1662   :  { %v3160_v56 = vpop.permute.xlu1 %3159 }
0x1663   :  { %v5081_v26 = vsub.f32 %v3104_v59, %v3160_v56 }
0x1665   :  { %v3173_v46 = vmul.f32 %v5081_v26, %v5081_v26 }
0x1667   :  { %3604 = vmatmul.msk.f32.gmra.mxu0 %vm89_vm1, %v3173_v46 }
0x166b   :  { %v3165_v38 = vpop.permute.xlu0 %3164 }
0x166c   :  { %v5086_v63 = vsub.f32 %v3105_v24, %v3165_v38  ;;  %v19_v38 = vld [vmem:[%s5126_s1 + $0x20] sm:$0xff] }
0x166e   :  { %v3174_v16 = vmul.f32 %v5086_v63, %v5086_v63 }
0x1670   :  { %3605 = vmatmul.msk.f32.gmra.mxu0 %vm89_vm1, %v3174_v16 }
0x16bc   :  { %v3204_v51 = vpop.f32.mrf.mxu0 }
0x16bd   :  { %v3205_v10 = vadd.f32 1e-05, %v3204_v51 }
0x16bf   :  { %vm3222_vm10 = vweird.f32 %v3205_v10 }
0x16c4   :  { %v3207_v53 = vpop.f32.mrf.mxu0 }
0x16c5   :  { %v3208_v57 = vadd.f32 1e-05, %v3207_v53 }
0x16c7   :  { %3808 = vrsqrt.f32 %v3208_v57  ;;  %vm3232_vm15 = vweird.f32 %v3208_v57 }
0x16cd   :  { %v3809_v54 = vpop.eup %3808 }
0x16ce   :  { %v3227_v11 = vmul.f32 %v3809_v54, %v3208_v57  ;;  %vm3233_vm14 = vweird.f32 %v3809_v54 }
0x16cf   :  { %vm3234_vm0 = vmor %vm3232_vm15, %vm3233_vm14 }
0x16d0   :  { %v3228_v17 = vmul.f32 %v3809_v54, %v3227_v11 }
0x16d2   :  { %v3229_v13 = vmul.f32 0.5, %v3228_v17 }
0x16d4   :  { %v3230_v2 = vsub.f32 1.5, %v3229_v13 }
0x16d6   :  { %v3231_v3 = vmul.f32 %v3809_v54, %v3230_v2 }
0x16d8   :  { %v3235_v8 = vsel %vm3234_vm0, %v3809_v54, %v3231_v3 }
0x16d9   :  { %3263 = vperm.xlu0 %3616, %v3235_v8  }
0x16e4   :  { %v3210_v27 = vpop.f32.mrf.mxu0 }
0x16e5   :  { %v3211_v37 = vadd.f32 1e-05, %v3210_v27 }
0x16e7   :  { %3810 = vrsqrt.f32 %v3211_v37  ;;  %vm3242_vm4 = vweird.f32 %v3211_v37 }
0x16e8   :  { %3812 = vrsqrt.f32 %v3205_v10 }
0x16ed   :  { %v3811_v23 = vpop.eup %3810  ;;  %v3213_v44 = vpop.f32.mrf.mxu0 }
0x16ee   :  { %v3237_v55 = vmul.f32 %v3811_v23, %v3211_v37  ;;  %v3214_v14 = vadd.f32 1e-05, %v3213_v44  ;;  %vm3243_vm2 = vweird.f32 %v3811_v23  ;;  %v3813_v18 = vpop.eup %3812 }
0x16ef   :  { %vm3244_vm5 = vmor %vm3242_vm4, %vm3243_vm2  ;;  %v3217_v6 = vmul.f32 %v3813_v18, %v3205_v10  ;;  %vm3223_vm9 = vweird.f32 %v3813_v18 }
0x16f0   :  { %v3238_v43 = vmul.f32 %v3811_v23, %v3237_v55  ;;  %3814 = vrsqrt.f32 %v3214_v14  ;;  %vm3252_vm7 = vweird.f32 %v3214_v14  ;;  %vm3224_vm11 = vmor %vm3222_vm10, %vm3223_vm9 }
0x16f1   :  { %v3218_v9 = vmul.f32 %v3813_v18, %v3217_v6 }
0x16f2   :  { %v3239_v22 = vmul.f32 0.5, %v3238_v43 }
0x16f3   :  { %v3219_v1 = vmul.f32 0.5, %v3218_v9 }
0x16f4   :  { %v3240_v39 = vsub.f32 1.5, %v3239_v22 }
0x16f5   :  { %v3220_v41 = vsub.f32 1.5, %v3219_v1 }
0x16f6   :  { %v3241_v29 = vmul.f32 %v3811_v23, %v3240_v39  ;;  %v3815_v45 = vpop.eup %3814 }
0x16f7   :  { %v3247_v0 = vmul.f32 %v3815_v45, %v3214_v14  ;;  %vm3253_vm6 = vweird.f32 %v3815_v45  ;;  %v3221_v42 = vmul.f32 %v3813_v18, %v3220_v41 }
0x16f8   :  { %v3245_v30 = vsel %vm3244_vm5, %v3811_v23, %v3241_v29  ;;  %vm3254_vm8 = vmor %vm3252_vm7, %vm3253_vm6 }
0x16f9   :  { %3268 = vperm.xlu1 %3614, %v3245_v30   ;;  %v3248_v49 = vmul.f32 %v3815_v45, %v3247_v0  ;;  %v3225_v34 = vsel %vm3224_vm11, %v3813_v18, %v3221_v42 }
0x16fb   :  { %v3249_v12 = vmul.f32 0.5, %v3248_v49 }
0x16fd   :  { %v3250_v52 = vsub.f32 1.5, %v3249_v12 }
0x16ff   :  { %v3251_v28 = vmul.f32 %v3815_v45, %v3250_v52 }
0x1701   :  { %v3255_v19 = vsel %vm3254_vm8, %v3815_v45, %v3251_v28 }
0x1702   :  { %3273 = vperm.xlu2 %3615, %v3255_v19  }
0x170a   :  { %3258 = vperm.xlu2 %3615, %v3225_v34  }
0x174b   :  { %v3264_v36 = vpop.permute.xlu0 %3263 }
0x174c   :  { %v3277_v32 = vmul.f32 %v3264_v36, %v5076_v58 }
0x174e   :  { %v3282_v4 = vmul.f32 %v3637_v7, %v3277_v32 }
0x1750   :  { %v3287_v56 = vadd.f32 %v3638_v31, %v3282_v4 }
0x175c   :  { %v3274_v21 = vpop.permute.xlu2 %3273 }
0x175d   :  { %v3279_v50 = vmul.f32 %v3274_v21, %v5086_v63 }
0x175f   :  { %v3284_v59 = vmul.f32 %v3637_v7, %v3279_v50 }
0x1761   :  { %v3289_v33 = vadd.f32 %v3638_v31, %v3284_v59 }
0x1763   :  { %3305 = vmatpush.msra.mxu1 %v3289_v33 }
0x1764   :  { %v3259_v24 = vpop.permute.xlu2 %3258 }
0x1765   :  { %v3276_v60 = vmul.f32 %v3259_v24, %v5071_v62  ;;  %v3639_v62 = vld [vmem:[%s5127_s2 + $0x20] ss:$0 sm:$0xff] }
0x1767   :  { %v3281_v48 = vmul.f32 %v3637_v7, %v3276_v60 }
0x1769   :  { %v3286_v46 = vadd.f32 %v3638_v31, %v3281_v48 }
0x176b   :  { %v3269_v47 = vpop.permute.xlu1 %3268 }
0x176c   :  { %v3278_v35 = vmul.f32 %v3269_v47, %v5081_v26 }
0x176e   :  { %v3283_v20 = vmul.f32 %v3637_v7, %v3278_v35 }
0x1770   :  { %v3288_v15 = vadd.f32 %v3638_v31, %v3283_v20 }
0x1772   :  { %3306 = vmatpush.msra.mxu1 %v3288_v15 }
0x1774   :  { %3307 = vmatpush.msra.mxu1 %v3287_v56 }
0x1776   :  { %3308 = vmatpush.msra.mxu1 %v3286_v46 }
0x1777   :  { %3606 = vmatmul.msk.f32.vlgmr.msra.gmra.mxu1 %vm89_vm1, %v19_v38 }
0x17f4   :  { %v3310_v58 = vpop.f32.mrf.mxu1 }
0x17f5   :  { %3607 = vmatmul.msk.f32.vlgmr.msrb.gmra.mxu3 %vm89_vm1, %v3310_v58 }
0x1878   :  { %v3334_v26 = vpop.f32.mrf.mxu3 }
0x1879   :  { %v3335_v63 = vadd.f32 %v3639_v62, %v3334_v26 }
0x187b   :  { %3337 = vst.msk [vmem:[#allocation2] sm:$0xff] %vm1452_vm3, %v3335_v63 }
0x187c   :  { %3348 = dma.vmem_to_hbm [thread:$0]  %s3344_s19, 128, %s3346_s22, [#allocation3]  }
0x187d   :  { %3844 = dma.done.wait [#allocation3], 128  }
0x187e   :  { %3845 = vsyncadd [#allocation3], 4294967168 }
0x187f   :  { %3353 = vsyncpa [#allocation3], 1 }

</bundles_post_ra>
